<compile_context>
chip_gen: v7x
topology: tpu7x:2x2x1
jax: 0.10.0
libtpu: 0.0.40
codegen_flags: <defaults>
</compile_context>

<pallas_src>
import math
import functools

import numpy as np
import jax
import jax.numpy as jnp
from jax import lax
from jax.experimental import pallas as pl
from jax.experimental.pallas import tpu as pltpu


# ----------------------------- kernel helpers -------------------------------

def _softmax_last(x, *, approx):
    m = jnp.max(x, axis=-1, keepdims=True)
    e = jnp.exp(x - m)
    s = jnp.sum(e, axis=-1, keepdims=True)
    if approx:
        return e * pl.reciprocal(s, approx=True)   # EUP slot; no-grad branch
    return e * (1.0 / s)                           # exact for the final probs


def _layernorm(x, g, b, eps=1e-5):
    mu = jnp.mean(x, axis=-1, keepdims=True)
    xc = x - mu
    var = jnp.mean(xc * xc, axis=-1, keepdims=True)
    return xc * lax.rsqrt(var + eps) * g + b


# --------------------------------- kernel -----------------------------------

def transformer_layer_kernel(
    neg_gamma_ref,                       # VMEM (H, 1, 1) f32: -softplus(gammas)
    q_ref, k_ref, v_ref,                 # q: (1, TQ, D); k/v: (1, S, D) f32
    wq_ref, bq_ref, wk_ref, bk_ref, wv_ref, bv_ref,   # W: bf16, b: f32
    wo_ref, bo_ref,                      # (D, D) bf16, (1, D) f32
    ln1_g_ref, ln1_b_ref,
    w1_ref, b1_ref, w2_ref, b2_ref,
    ln2_g_ref, ln2_b_ref,
    out_ref,                             # VMEM (1, TQ, D) f32
    *, n_heads, d_k, mask_k, zero_pad, apply_pos):
    f32 = jnp.float32
    bf16 = jnp.bfloat16
    TQ = q_ref.shape[1]
    S = k_ref.shape[1]
    D = q_ref.shape[2]
    q0 = pl.program_id(1) * TQ           # global index of this tile's 1st query

    q_in = q_ref[0]                      # (TQ, D) f32
    k_in = k_ref[0]                      # (S, D)
    v_in = v_ref[0]

    def linear(x, w_r, b_r):
        y = jnp.dot(x.astype(bf16), w_r[...], preferred_element_type=f32)
        return y + b_r[...]

    # Q/K/V projections: lane-dense bf16 matmuls on the MXU, f32 accumulation.
    qp = linear(q_in, wq_ref, bq_ref)    # (TQ, D)
    kp = linear(k_in, wk_ref, bk_ref)    # (S, D)
    vp = linear(v_in, wv_ref, bv_ref)    # (S, D)

    # Head split: single reshape + transpose + one cast (no per-head slices,
    # no stack / concatenate).
    def to_heads(x):
        n = x.shape[0]
        return jnp.transpose(x.reshape(n, n_heads, d_k), (1, 0, 2)).astype(bf16)

    qh = to_heads(qp)                    # (H, TQ, d_k) bf16
    kh = to_heads(kp)                    # (H, S,  d_k)
    vh = to_heads(vp)

    # In-kernel iota-derived matrices for this query tile (no HBM mask input).
    rowg = lax.broadcasted_iota(jnp.int32, (TQ, S), 0) + q0   # global q index
    col = lax.broadcasted_iota(jnp.int32, (TQ, S), 1)
    mask_b = col < (rowg + mask_k)                            # True = attend
    pos_effect = jnp.abs(rowg - col).astype(f32)              # |x1 - x2|
    kr = lax.broadcasted_iota(jnp.int32, (S, S), 0)
    kc = lax.broadcasted_iota(jnp.int32, (S, S), 1)
    suffix_mat = jnp.where(kr > kc, 1.0, 0.0).astype(bf16)    # [k,j]=1 iff k>j

    scale = 1.0 / math.sqrt(d_k)
    scores = jnp.einsum('hqd,hkd->hqk', qh, kh,
                        preferred_element_type=f32) * scale   # (H, TQ, S)

    # ---- AKT distance-decay branch (torch.no_grad in the reference) ----
    s_ = jnp.where(mask_b, _softmax_last(scores, approx=True), 0.0)
    # disttotal - distcum == suffix sum over keys: one batched bf16 matmul.
    # TODO(synk): on v5e (slow MXU, no bf16 VPU/EUP) a lax.cumsum formulation
    # may be preferable at very large S.
    rest = jnp.dot(s_.reshape(n_heads * TQ, S).astype(bf16), suffix_mat,
                   preferred_element_type=f32).reshape(n_heads, TQ, S)
    dist_scores = jnp.sqrt(jnp.maximum(rest * pos_effect, 0.0))
    total_effect = jnp.clip(jnp.exp(dist_scores * neg_gamma_ref[...]),
                            1e-5, 1e5)                        # (H,1,1) bcast

    scores = scores * total_effect
    scores = jnp.where(mask_b, scores, -1e20)
    probs = _softmax_last(scores, approx=False).astype(bf16)  # (H, TQ, S)

    # Attention-weighted values, batched over heads.
    head_out = jnp.einsum('hqk,hkd->hqd', probs, vh,
                          preferred_element_type=f32)         # (H, TQ, d_k)

    # Output projection: merge heads into a lane-dense (TQ, D) operand and do
    # ONE MXU matmul with contraction length D (no (H,TQ,D) f32 intermediate,
    # no cross-sublane head sum).
    concat = jnp.transpose(head_out, (1, 0, 2)).reshape(TQ, D).astype(bf16)
    attn = jnp.dot(concat, wo_ref[...], preferred_element_type=f32)  # (TQ, D)

    if zero_pad:
        grow = lax.broadcasted_iota(jnp.int32, attn.shape, 0) + q0
        attn = jnp.where(grow == 0, 0.0, attn)     # zero global query row 0
    attn = attn + bo_ref[...]

    # residual + layernorm1 (dropout = identity in eval)
    x = _layernorm(q_in + attn, ln1_g_ref[...], ln1_b_ref[...])

    if apply_pos:
        h1 = jnp.maximum(
            jnp.dot(x.astype(bf16), w1_ref[...],
                    preferred_element_type=f32) + b1_ref[...], 0.0)
        ff = jnp.dot(h1.astype(bf16), w2_ref[...],
                     preferred_element_type=f32) + b2_ref[...]
        x = _layernorm(x + ff, ln2_g_ref[...], ln2_b_ref[...])

    out_ref[0] = x.astype(out_ref.dtype)


# -------------------------------- wrapper ------------------------------------

def _pick_vmem_limit():
    """~75% of per-core VMEM: ~48 MiB on v7x (64 MiB/TC), ~96 MiB on the
    128 MiB v5e/v6e parts; v7x-safe 48 MiB fallback."""
    try:
        cap = int(pltpu.get_tpu_info().vmem_capacity_bytes)
        return int(min(100 * 1024 * 1024, (cap * 3) // 4))
    except Exception:
        return 48 * 1024 * 1024


def transformer_layer_forward(params, mask_k, query, key, values,
                              apply_pos=True, q_tile=128):
    B, S, D = query.shape
    H = params["n_heads"]
    d_k = D // H
    zero_pad = bool(mask_k == 0)
    bf16 = jnp.bfloat16

    # Query-tile size: one tile for typical AKT lengths (no K/V-projection
    # recompute); 128-row tiles above that so the (H, TQ, S) working set fits
    # v7x's 64 MiB/TC VMEM (raise q_tile to 256 on 128 MiB parts if desired).
    TQ = S if S <= 256 else q_tile
    num_q = pl.cdiv(S, TQ)

    # gamma = -softplus(gammas); tiny scalar glue, heavy math stays in kernel.
    neg_gamma = (-jax.nn.softplus(params["gammas"])).reshape(H, 1, 1).astype(jnp.float32)

    # Cast matmul weights to bf16 at the boundary (halves weight DMA / VMEM).
    wq = params["wq"].astype(bf16)
    wk = params["wk"].astype(bf16)
    wv = params["wv"].astype(bf16)
    wo = params["wo"].astype(bf16)
    w1 = params["w1"].astype(bf16)
    w2 = params["w2"].astype(bf16)

    kernel = functools.partial(
        transformer_layer_kernel, n_heads=H, d_k=d_k, mask_k=int(mask_k),
        zero_pad=zero_pad, apply_pos=apply_pos)

    args = (neg_gamma, query, key, values,
            wq, params["bq"], wk, params["bk"], wv, params["bv"],
            wo, params["bo"],
            params["ln1_g"], params["ln1_b"],
            w1, params["b1"], w2, params["b2"],
            params["ln2_g"], params["ln2_b"])

    q_spec = pl.BlockSpec((1, TQ, D), lambda b, qt: (b, qt, 0))
    kv_spec = pl.BlockSpec((1, S, D), lambda b, qt: (b, 0, 0))

    def build(single_buffer):
        def const_spec(shape):
            nd = len(shape)
            imap = lambda b, qt, _n=nd: (0,) * _n
            if single_buffer:
                # Same block index at every grid step -> one VMEM buffer.
                return pl.BlockSpec(shape, imap, pipeline_mode=pl.Buffered(1))
            return pl.BlockSpec(shape, imap)

        in_specs = [
            const_spec((H, 1, 1)),                          # neg_gamma
            q_spec, kv_spec, kv_spec,                       # q, k, v
            const_spec(wq.shape), const_spec(params["bq"].shape),
            const_spec(wk.shape), const_spec(params["bk"].shape),
            const_spec(wv.shape), const_spec(params["bv"].shape),
            const_spec(wo.shape), const_spec(params["bo"].shape),
            const_spec(params["ln1_g"].shape), const_spec(params["ln1_b"].shape),
            const_spec(w1.shape), const_spec(params["b1"].shape),
            const_spec(w2.shape), const_spec(params["b2"].shape),
            const_spec(params["ln2_g"].shape), const_spec(params["ln2_b"].shape),
        ]

        return pl.pallas_call(
            kernel,
            out_shape=jax.ShapeDtypeStruct((B, S, D), jnp.float32),
            grid_spec=pltpu.PrefetchScalarGridSpec(
                num_scalar_prefetch=0,
                grid=(B, num_q),
                in_specs=in_specs,
                out_specs=q_spec),
            compiler_params=pltpu.CompilerParams(
                # 2-D parallel grid: both v7x TensorCores get work even when
                # the batch axis alone is 1 / odd.
                dimension_semantics=("parallel", "parallel"),
                vmem_limit_bytes=_pick_vmem_limit()),
        )

    try:
        return build(True)(*args)
    except Exception:
        # pl.Buffered(1) rejected by this JAX build -> default buffering.
        return build(False)(*args)


# --------------------------- pure-JAX reference -------------------------------

def reference_forward(params, mask_k, query, key, values, apply_pos=True):
    B, S, D = query.shape
    H = params["n_heads"]
    d_k = D // H
    hp = jax.lax.Precision.HIGHEST

    nopeek = np.triu(np.ones((S, S), dtype=np.float32), k=mask_k)
    mask = jnp.asarray((nopeek == 0).astype(np.float32))[None, None]

    def lin(x, w, b):
        return jnp.dot(x, w, precision=hp) + b.reshape(-1)

    def split_heads(x):
        return x.reshape(B, S, H, d_k).transpose(0, 2, 1, 3)

    qp = split_heads(lin(query, params["wq"], params["bq"]))
    kp = split_heads(lin(key, params["wk"], params["bk"]))
    vp = split_heads(lin(values, params["wv"], params["bv"]))

    scores = jnp.einsum("bhqd,bhkd->bhqk", qp, kp, precision=hp) / math.sqrt(d_k)
    s_ = jax.nn.softmax(scores, -1) * mask
    distcum = jnp.cumsum(s_, -1)
    disttotal = jnp.sum(s_, -1, keepdims=True)
    x1 = jnp.arange(S)
    pos = jnp.abs(x1[None, :] - x1[:, None]).astype(jnp.float32)[None, None]
    dist_scores = jnp.sqrt(jnp.maximum((disttotal - distcum) * pos, 0.0))
    gamma = -jax.nn.softplus(params["gammas"]).reshape(1, H, 1, 1)
    total_effect = jnp.clip(jnp.exp(dist_scores * gamma), 1e-5, 1e5)
    scores = scores * total_effect
    scores = jnp.where(mask == 0.0, -1e20, scores)
    scores = jax.nn.softmax(scores, -1)
    if mask_k == 0:
        scores = scores.at[:, :, 0, :].set(0.0)
    out = jnp.einsum("bhqk,bhkd->bhqd", scores, vp, precision=hp)
    concat = out.transpose(0, 2, 1, 3).reshape(B, S, D)
    attn = lin(concat, params["wo"], params["bo"])

    def ln(x, g, b, eps=1e-5):
        mu = jnp.mean(x, -1, keepdims=True)
        var = jnp.mean((x - mu) ** 2, -1, keepdims=True)
        return (x - mu) / jnp.sqrt(var + eps) * g.reshape(-1) + b.reshape(-1)

    x = ln(query + attn, params["ln1_g"], params["ln1_b"])
    if apply_pos:
        h1 = jnp.maximum(lin(x, params["w1"], params["b1"]), 0.0)
        ff = lin(h1, params["w2"], params["b2"])
        x = ln(x + ff, params["ln2_g"], params["ln2_b"])
    return x


# ------------------------------ parameter init --------------------------------

def init_params(rng, d_model, d_ff, n_heads, kq_same=False):
    keys = jax.random.split(rng, 8)

    def linear(k, fan_in, fan_out):
        lim = 1.0 / math.sqrt(fan_in)
        w = jax.random.uniform(k, (fan_in, fan_out), jnp.float32, -lim, lim)
        b = jax.random.uniform(jax.random.fold_in(k, 1), (1, fan_out),
                               jnp.float32, -lim, lim)
        return w, b

    wk, bk = linear(keys[0], d_model, d_model)
    if kq_same:
        wq, bq = wk, bk
    else:
        wq, bq = linear(keys[1], d_model, d_model)
    wv, bv = linear(keys[2], d_model, d_model)
    wo, bo = linear(keys[3], d_model, d_model)
    w1, b1 = linear(keys[4], d_model, d_ff)
    w2, b2 = linear(keys[5], d_ff, d_model)
    # gammas: xavier_uniform on (n_heads, 1, 1) -> bound sqrt(6/(1+1)) = sqrt(3)
    gammas = jax.random.uniform(keys[6], (n_heads,), jnp.float32,
                                -math.sqrt(3.0), math.sqrt(3.0))
    return {
        "n_heads": n_heads,
        "wq": wq, "bq": bq, "wk": wk, "bk": bk, "wv": wv, "bv": bv,
        "wo": wo, "bo": bo,
        "ln1_g": jnp.ones((1, d_model), jnp.float32),
        "ln1_b": jnp.zeros((1, d_model), jnp.float32),
        "w1": w1, "b1": b1, "w2": w2, "b2": b2,
        "ln2_g": jnp.ones((1, d_model), jnp.float32),
        "ln2_b": jnp.zeros((1, d_model), jnp.float32),
        "gammas": gammas,
    }


# ----------------------------------- main -------------------------------------

if __name__ == "__main__":
    B, S, D = 2, 8, 32
    n_heads, d_ff = 4, 64
    mask_k = 0          # AKT "mask=0" branch: strict causal mask + zero_pad=True

    root = jax.random.PRNGKey(0)
    k_p, k_q, k_k, k_v = jax.random.split(root, 4)

    params = init_params(k_p, D, d_ff, n_heads, kq_same=False)
    query = jax.random.normal(k_q, (B, S, D), jnp.float32)
    key = jax.random.normal(k_k, (B, S, D), jnp.float32)
    values = jax.random.normal(k_v, (B, S, D), jnp.float32)

    out = transformer_layer_forward(params, mask_k, query, key, values, apply_pos=True)
    out = jax.block_until_ready(out)

    ref = jax.block_until_ready(
        reference_forward(params, mask_k, query, key, values, apply_pos=True))
    # bf16 matmul operands (f32 accumulation) -> slightly looser tolerance than
    # an all-f32 variant; a semantic error would be O(1), so this still checks
    # correctness meaningfully.
    np.testing.assert_allclose(np.asarray(out), np.asarray(ref), rtol=3e-2, atol=3e-2)

    print("KERNEL_OK")
</pallas_src>

<mosaic_0001>
module attributes {stable_mosaic.version = 11 : i64} {
  func.func @transformer_layer_kernel(%arg0: i32, %arg1: i32, %arg2: memref<4x1x1xf32, #tpu.memory_space<vmem>>, %arg3: memref<1x8x32xf32, #tpu.memory_space<vmem>>, %arg4: memref<1x8x32xf32, #tpu.memory_space<vmem>>, %arg5: memref<1x8x32xf32, #tpu.memory_space<vmem>>, %arg6: memref<32x32xbf16, #tpu.memory_space<vmem>>, %arg7: memref<1x32xf32, #tpu.memory_space<vmem>>, %arg8: memref<32x32xbf16, #tpu.memory_space<vmem>>, %arg9: memref<1x32xf32, #tpu.memory_space<vmem>>, %arg10: memref<32x32xbf16, #tpu.memory_space<vmem>>, %arg11: memref<1x32xf32, #tpu.memory_space<vmem>>, %arg12: memref<32x32xbf16, #tpu.memory_space<vmem>>, %arg13: memref<1x32xf32, #tpu.memory_space<vmem>>, %arg14: memref<1x32xf32, #tpu.memory_space<vmem>>, %arg15: memref<1x32xf32, #tpu.memory_space<vmem>>, %arg16: memref<32x64xbf16, #tpu.memory_space<vmem>>, %arg17: memref<1x64xf32, #tpu.memory_space<vmem>>, %arg18: memref<64x32xbf16, #tpu.memory_space<vmem>>, %arg19: memref<1x32xf32, #tpu.memory_space<vmem>>, %arg20: memref<1x32xf32, #tpu.memory_space<vmem>>, %arg21: memref<1x32xf32, #tpu.memory_space<vmem>>, %arg22: memref<1x8x32xf32, #tpu.memory_space<vmem>>) attributes {dimension_semantics = [#tpu.dimension_semantics<parallel>, #tpu.dimension_semantics<parallel>], iteration_bounds = array<i64: 2, 1>, scalar_prefetch = 0 : i64, scratch_operands = 0 : i64, tpu.core_type = #tpu.core_type<tc>, window_params = [{pipeline_mode = #tpu.pipeline_mode<synchronous>, transform_indices = @transform_0, window_bounds = array<i64: 4, 1, 1>}, {transform_indices = @transform_1, window_bounds = array<i64: 1, 8, 32>}, {transform_indices = @transform_2, window_bounds = array<i64: 1, 8, 32>}, {transform_indices = @transform_3, window_bounds = array<i64: 1, 8, 32>}, {pipeline_mode = #tpu.pipeline_mode<synchronous>, transform_indices = @transform_4, window_bounds = array<i64: 32, 32>}, {pipeline_mode = #tpu.pipeline_mode<synchronous>, transform_indices = @transform_5, window_bounds = array<i64: 1, 32>}, {pipeline_mode = #tpu.pipeline_mode<synchronous>, transform_indices = @transform_6, window_bounds = array<i64: 32, 32>}, {pipeline_mode = #tpu.pipeline_mode<synchronous>, transform_indices = @transform_7, window_bounds = array<i64: 1, 32>}, {pipeline_mode = #tpu.pipeline_mode<synchronous>, transform_indices = @transform_8, window_bounds = array<i64: 32, 32>}, {pipeline_mode = #tpu.pipeline_mode<synchronous>, transform_indices = @transform_9, window_bounds = array<i64: 1, 32>}, {pipeline_mode = #tpu.pipeline_mode<synchronous>, transform_indices = @transform_10, window_bounds = array<i64: 32, 32>}, {pipeline_mode = #tpu.pipeline_mode<synchronous>, transform_indices = @transform_11, window_bounds = array<i64: 1, 32>}, {pipeline_mode = #tpu.pipeline_mode<synchronous>, transform_indices = @transform_12, window_bounds = array<i64: 1, 32>}, {pipeline_mode = #tpu.pipeline_mode<synchronous>, transform_indices = @transform_13, window_bounds = array<i64: 1, 32>}, {pipeline_mode = #tpu.pipeline_mode<synchronous>, transform_indices = @transform_14, window_bounds = array<i64: 32, 64>}, {pipeline_mode = #tpu.pipeline_mode<synchronous>, transform_indices = @transform_15, window_bounds = array<i64: 1, 64>}, {pipeline_mode = #tpu.pipeline_mode<synchronous>, transform_indices = @transform_16, window_bounds = array<i64: 64, 32>}, {pipeline_mode = #tpu.pipeline_mode<synchronous>, transform_indices = @transform_17, window_bounds = array<i64: 1, 32>}, {pipeline_mode = #tpu.pipeline_mode<synchronous>, transform_indices = @transform_18, window_bounds = array<i64: 1, 32>}, {pipeline_mode = #tpu.pipeline_mode<synchronous>, transform_indices = @transform_19, window_bounds = array<i64: 1, 32>}, {transform_indices = @transform_20, window_bounds = array<i64: 1, 8, 32>}]} {
    %c8_i32 = arith.constant 8 : i32
    %0 = arith.muli %arg1, %c8_i32 : i32
    %c0 = arith.constant 0 : index
    %c0_0 = arith.constant 0 : index
    %c0_1 = arith.constant 0 : index
    %1 = vector.load %arg3[%c0, %c0_0, %c0_1] : memref<1x8x32xf32, #tpu.memory_space<vmem>>, vector<1x8x32xf32>
    %2 = vector.shape_cast %1 : vector<1x8x32xf32> to vector<8x32xf32>
    %c0_2 = arith.constant 0 : index
    %c0_3 = arith.constant 0 : index
    %c0_4 = arith.constant 0 : index
    %3 = vector.load %arg4[%c0_2, %c0_3, %c0_4] : memref<1x8x32xf32, #tpu.memory_space<vmem>>, vector<1x8x32xf32>
    %4 = vector.shape_cast %3 : vector<1x8x32xf32> to vector<8x32xf32>
    %c0_5 = arith.constant 0 : index
    %c0_6 = arith.constant 0 : index
    %c0_7 = arith.constant 0 : index
    %5 = vector.load %arg5[%c0_5, %c0_6, %c0_7] : memref<1x8x32xf32, #tpu.memory_space<vmem>>, vector<1x8x32xf32>
    %6 = vector.shape_cast %5 : vector<1x8x32xf32> to vector<8x32xf32>
    %7 = arith.truncf %2 : vector<8x32xf32> to vector<8x32xbf16>
    %c0_8 = arith.constant 0 : index
    %c0_9 = arith.constant 0 : index
    %8 = vector.load %arg6[%c0_8, %c0_9] : memref<32x32xbf16, #tpu.memory_space<vmem>>, vector<32x32xbf16>
    %cst = arith.constant dense<0.000000e+00> : vector<8x32xf32>
    %9 = tpu.matmul %7, %8, %cst {dimension_numbers = #tpu.dot_dimension_numbers<[1], [0], [0], [1], [0, 0, 1, 1], [], []>} : vector<8x32xbf16>, vector<32x32xbf16>, vector<8x32xf32> -> vector<8x32xf32>
    %c0_10 = arith.constant 0 : index
    %c0_11 = arith.constant 0 : index
    %10 = vector.load %arg7[%c0_10, %c0_11] : memref<1x32xf32, #tpu.memory_space<vmem>>, vector<1x32xf32>
    %11 = vector.broadcast %10 : vector<1x32xf32> to vector<8x32xf32>
    %12 = arith.addf %9, %11 : vector<8x32xf32>
    %13 = arith.truncf %4 : vector<8x32xf32> to vector<8x32xbf16>
    %c0_12 = arith.constant 0 : index
    %c0_13 = arith.constant 0 : index
    %14 = vector.load %arg8[%c0_12, %c0_13] : memref<32x32xbf16, #tpu.memory_space<vmem>>, vector<32x32xbf16>
    %cst_14 = arith.constant dense<0.000000e+00> : vector<8x32xf32>
    %15 = tpu.matmul %13, %14, %cst_14 {dimension_numbers = #tpu.dot_dimension_numbers<[1], [0], [0], [1], [0, 0, 1, 1], [], []>} : vector<8x32xbf16>, vector<32x32xbf16>, vector<8x32xf32> -> vector<8x32xf32>
    %c0_15 = arith.constant 0 : index
    %c0_16 = arith.constant 0 : index
    %16 = vector.load %arg9[%c0_15, %c0_16] : memref<1x32xf32, #tpu.memory_space<vmem>>, vector<1x32xf32>
    %17 = vector.broadcast %16 : vector<1x32xf32> to vector<8x32xf32>
    %18 = arith.addf %15, %17 : vector<8x32xf32>
    %19 = arith.truncf %6 : vector<8x32xf32> to vector<8x32xbf16>
    %c0_17 = arith.constant 0 : index
    %c0_18 = arith.constant 0 : index
    %20 = vector.load %arg10[%c0_17, %c0_18] : memref<32x32xbf16, #tpu.memory_space<vmem>>, vector<32x32xbf16>
    %cst_19 = arith.constant dense<0.000000e+00> : vector<8x32xf32>
    %21 = tpu.matmul %19, %20, %cst_19 {dimension_numbers = #tpu.dot_dimension_numbers<[1], [0], [0], [1], [0, 0, 1, 1], [], []>} : vector<8x32xbf16>, vector<32x32xbf16>, vector<8x32xf32> -> vector<8x32xf32>
    %c0_20 = arith.constant 0 : index
    %c0_21 = arith.constant 0 : index
    %22 = vector.load %arg11[%c0_20, %c0_21] : memref<1x32xf32, #tpu.memory_space<vmem>>, vector<1x32xf32>
    %23 = vector.broadcast %22 : vector<1x32xf32> to vector<8x32xf32>
    %24 = arith.addf %21, %23 : vector<8x32xf32>
    %25 = vector.shape_cast %12 : vector<8x32xf32> to vector<8x4x8xf32>
    %26 = tpu.transpose %25, [1, 0, 2] : vector<8x4x8xf32> -> vector<4x8x8xf32>
    %27 = arith.truncf %26 : vector<4x8x8xf32> to vector<4x8x8xbf16>
    %28 = vector.shape_cast %18 : vector<8x32xf32> to vector<8x4x8xf32>
    %29 = tpu.transpose %28, [1, 0, 2] : vector<8x4x8xf32> -> vector<4x8x8xf32>
    %30 = arith.truncf %29 : vector<4x8x8xf32> to vector<4x8x8xbf16>
    %31 = vector.shape_cast %24 : vector<8x32xf32> to vector<8x4x8xf32>
    %32 = tpu.transpose %31, [1, 0, 2] : vector<8x4x8xf32> -> vector<4x8x8xf32>
    %33 = arith.truncf %32 : vector<4x8x8xf32> to vector<4x8x8xbf16>
    %34 = tpu.iota {dimensions = array<i32: 0>} : vector<8x8xi32>
    %35 = vector.broadcast %0 : i32 to vector<8x8xi32>
    %36 = arith.addi %34, %35 : vector<8x8xi32>
    %37 = tpu.iota {dimensions = array<i32: 1>} : vector<8x8xi32>
    %c0_i32 = arith.constant 0 : i32
    %38 = vector.broadcast %c0_i32 : i32 to vector<8x8xi32>
    %39 = arith.addi %36, %38 : vector<8x8xi32>
    %40 = arith.cmpi slt, %37, %39 : vector<8x8xi32>
    %41 = arith.subi %36, %37 : vector<8x8xi32>
    %42 = math.absi %41 : vector<8x8xi32>
    %43 = arith.sitofp %42 : vector<8x8xi32> to vector<8x8xf32>
    %44 = tpu.iota {dimensions = array<i32: 0>} : vector<8x8xi32>
    %45 = tpu.iota {dimensions = array<i32: 1>} : vector<8x8xi32>
    %46 = arith.cmpi sgt, %44, %45 : vector<8x8xi32>
    %cst_22 = arith.constant 1.000000e+00 : f32
    %cst_23 = arith.constant 0.000000e+00 : f32
    %47 = vector.broadcast %cst_22 : f32 to vector<8x8xf32>
    %48 = vector.broadcast %cst_23 : f32 to vector<8x8xf32>
    %49 = arith.select %46, %47, %48 : vector<8x8xi1>, vector<8x8xf32>
    %50 = arith.truncf %49 : vector<8x8xf32> to vector<8x8xbf16>
    "tpu.trace_start"() <{level = 10 : i32, message = "hqd,hkd->hqk"}> : () -> ()
    %cst_24 = arith.constant dense<0.000000e+00> : vector<4x8x8xf32>
    %51 = tpu.matmul %27, %30, %cst_24 {dimension_numbers = #tpu.dot_dimension_numbers<[2], [2], [1], [1], [0, 0, 0, 1, 1, 1], [0], [0]>} : vector<4x8x8xbf16>, vector<4x8x8xbf16>, vector<4x8x8xf32> -> vector<4x8x8xf32>
    "tpu.trace_stop"() : () -> ()
    %cst_25 = arith.constant 0.353553385 : f32
    %52 = vector.broadcast %cst_25 : f32 to vector<4x8x8xf32>
    %53 = arith.mulf %51, %52 : vector<4x8x8xf32>
    %cst_26 = arith.constant dense<0xFF800000> : vector<4x8xf32>
    %54 = vector.multi_reduction <maximumf>, %53, %cst_26 [2] : vector<4x8x8xf32> to vector<4x8xf32>
    %55 = vector.shape_cast %54 : vector<4x8xf32> to vector<4x8x1xf32>
    %56 = vector.broadcast %55 : vector<4x8x1xf32> to vector<4x8x8xf32>
    %57 = arith.subf %53, %56 : vector<4x8x8xf32>
    %58 = math.exp %57 : vector<4x8x8xf32>
    %cst_27 = arith.constant dense<0.000000e+00> : vector<4x8xf32>
    %59 = vector.multi_reduction <add>, %58, %cst_27 [2] : vector<4x8x8xf32> to vector<4x8xf32>
    %60 = vector.shape_cast %59 : vector<4x8xf32> to vector<4x8x1xf32>
    %61 = tpu.reciprocal %60 {approx = true} : vector<4x8x1xf32> -> vector<4x8x1xf32>
    %62 = vector.broadcast %61 : vector<4x8x1xf32> to vector<4x8x8xf32>
    %63 = arith.mulf %58, %62 : vector<4x8x8xf32>
    %cst_28 = arith.constant 0.000000e+00 : f32
    %64 = vector.shape_cast %40 : vector<8x8xi1> to vector<1x8x8xi1>
    %65 = vector.broadcast %64 : vector<1x8x8xi1> to vector<4x8x8xi1>
    %66 = vector.broadcast %cst_28 : f32 to vector<4x8x8xf32>
    %67 = arith.select %65, %63, %66 : vector<4x8x8xi1>, vector<4x8x8xf32>
    %68 = vector.shape_cast %67 : vector<4x8x8xf32> to vector<32x8xf32>
    %69 = arith.truncf %68 : vector<32x8xf32> to vector<32x8xbf16>
    %cst_29 = arith.constant dense<0.000000e+00> : vector<32x8xf32>
    %70 = tpu.matmul %69, %50, %cst_29 {dimension_numbers = #tpu.dot_dimension_numbers<[1], [0], [0], [1], [0, 0, 1, 1], [], []>} : vector<32x8xbf16>, vector<8x8xbf16>, vector<32x8xf32> -> vector<32x8xf32>
    %71 = vector.shape_cast %70 : vector<32x8xf32> to vector<4x8x8xf32>
    %72 = vector.shape_cast %43 : vector<8x8xf32> to vector<1x8x8xf32>
    %73 = vector.broadcast %72 : vector<1x8x8xf32> to vector<4x8x8xf32>
    %74 = arith.mulf %71, %73 : vector<4x8x8xf32>
    %cst_30 = arith.constant 0.000000e+00 : f32
    %75 = vector.broadcast %cst_30 : f32 to vector<4x8x8xf32>
    %76 = arith.maximumf %74, %75 : vector<4x8x8xf32>
    %77 = math.sqrt %76 : vector<4x8x8xf32>
    %c0_31 = arith.constant 0 : index
    %c0_32 = arith.constant 0 : index
    %c0_33 = arith.constant 0 : index
    %78 = vector.load %arg2[%c0_31, %c0_32, %c0_33] : memref<4x1x1xf32, #tpu.memory_space<vmem>>, vector<4x1x1xf32>
    %79 = vector.broadcast %78 : vector<4x1x1xf32> to vector<4x8x8xf32>
    %80 = arith.mulf %77, %79 : vector<4x8x8xf32>
    %81 = math.exp %80 : vector<4x8x8xf32>
    %cst_34 = arith.constant 9.99999974E-6 : f32
    %cst_35 = arith.constant 1.000000e+05 : f32
    %82 = vector.broadcast %cst_34 : f32 to vector<4x8x8xf32>
    %83 = arith.maximumf %82, %81 : vector<4x8x8xf32>
    %84 = vector.broadcast %cst_35 : f32 to vector<4x8x8xf32>
    %85 = arith.minimumf %84, %83 : vector<4x8x8xf32>
    %86 = arith.mulf %53, %85 : vector<4x8x8xf32>
    %cst_36 = arith.constant -1.000000e+20 : f32
    %87 = vector.shape_cast %40 : vector<8x8xi1> to vector<1x8x8xi1>
    %88 = vector.broadcast %87 : vector<1x8x8xi1> to vector<4x8x8xi1>
    %89 = vector.broadcast %cst_36 : f32 to vector<4x8x8xf32>
    %90 = arith.select %88, %86, %89 : vector<4x8x8xi1>, vector<4x8x8xf32>
    %cst_37 = arith.constant dense<0xFF800000> : vector<4x8xf32>
    %91 = vector.multi_reduction <maximumf>, %90, %cst_37 [2] : vector<4x8x8xf32> to vector<4x8xf32>
    %92 = vector.shape_cast %91 : vector<4x8xf32> to vector<4x8x1xf32>
    %93 = vector.broadcast %92 : vector<4x8x1xf32> to vector<4x8x8xf32>
    %94 = arith.subf %90, %93 : vector<4x8x8xf32>
    %95 = math.exp %94 : vector<4x8x8xf32>
    %cst_38 = arith.constant dense<0.000000e+00> : vector<4x8xf32>
    %96 = vector.multi_reduction <add>, %95, %cst_38 [2] : vector<4x8x8xf32> to vector<4x8xf32>
    %97 = vector.shape_cast %96 : vector<4x8xf32> to vector<4x8x1xf32>
    %cst_39 = arith.constant 1.000000e+00 : f32
    %98 = vector.broadcast %cst_39 : f32 to vector<4x8x1xf32>
    %99 = arith.divf %98, %97 : vector<4x8x1xf32>
    %100 = vector.broadcast %99 : vector<4x8x1xf32> to vector<4x8x8xf32>
    %101 = arith.mulf %95, %100 : vector<4x8x8xf32>
    %102 = arith.truncf %101 : vector<4x8x8xf32> to vector<4x8x8xbf16>
    "tpu.trace_start"() <{level = 10 : i32, message = "hqk,hkd->hqd"}> : () -> ()
    %cst_40 = arith.constant dense<0.000000e+00> : vector<4x8x8xf32>
    %103 = tpu.matmul %102, %33, %cst_40 {dimension_numbers = #tpu.dot_dimension_numbers<[2], [1], [1], [2], [0, 0, 0, 1, 1, 2], [0], [0]>} : vector<4x8x8xbf16>, vector<4x8x8xbf16>, vector<4x8x8xf32> -> vector<4x8x8xf32>
    "tpu.trace_stop"() : () -> ()
    %104 = tpu.transpose %103, [1, 0, 2] : vector<4x8x8xf32> -> vector<8x4x8xf32>
    %105 = vector.shape_cast %104 : vector<8x4x8xf32> to vector<8x32xf32>
    %106 = arith.truncf %105 : vector<8x32xf32> to vector<8x32xbf16>
    %c0_41 = arith.constant 0 : index
    %c0_42 = arith.constant 0 : index
    %107 = vector.load %arg12[%c0_41, %c0_42] : memref<32x32xbf16, #tpu.memory_space<vmem>>, vector<32x32xbf16>
    %cst_43 = arith.constant dense<0.000000e+00> : vector<8x32xf32>
    %108 = tpu.matmul %106, %107, %cst_43 {dimension_numbers = #tpu.dot_dimension_numbers<[1], [0], [0], [1], [0, 0, 1, 1], [], []>} : vector<8x32xbf16>, vector<32x32xbf16>, vector<8x32xf32> -> vector<8x32xf32>
    %109 = tpu.iota {dimensions = array<i32: 0>} : vector<8x32xi32>
    %110 = vector.broadcast %0 : i32 to vector<8x32xi32>
    %111 = arith.addi %109, %110 : vector<8x32xi32>
    %c0_i32_44 = arith.constant 0 : i32
    %112 = vector.broadcast %c0_i32_44 : i32 to vector<8x32xi32>
    %113 = arith.cmpi eq, %111, %112 : vector<8x32xi32>
    %cst_45 = arith.constant 0.000000e+00 : f32
    %114 = vector.broadcast %cst_45 : f32 to vector<8x32xf32>
    %115 = arith.select %113, %114, %108 : vector<8x32xi1>, vector<8x32xf32>
    %c0_46 = arith.constant 0 : index
    %c0_47 = arith.constant 0 : index
    %116 = vector.load %arg13[%c0_46, %c0_47] : memref<1x32xf32, #tpu.memory_space<vmem>>, vector<1x32xf32>
    %117 = vector.broadcast %116 : vector<1x32xf32> to vector<8x32xf32>
    %118 = arith.addf %115, %117 : vector<8x32xf32>
    %119 = arith.addf %2, %118 : vector<8x32xf32>
    %c0_48 = arith.constant 0 : index
    %c0_49 = arith.constant 0 : index
    %120 = vector.load %arg14[%c0_48, %c0_49] : memref<1x32xf32, #tpu.memory_space<vmem>>, vector<1x32xf32>
    %c0_50 = arith.constant 0 : index
    %c0_51 = arith.constant 0 : index
    %121 = vector.load %arg15[%c0_50, %c0_51] : memref<1x32xf32, #tpu.memory_space<vmem>>, vector<1x32xf32>
    %cst_52 = arith.constant dense<0.000000e+00> : vector<8xf32>
    %122 = vector.multi_reduction <add>, %119, %cst_52 [1] : vector<8x32xf32> to vector<8xf32>
    %123 = vector.shape_cast %122 : vector<8xf32> to vector<8x1xf32>
    %cst_53 = arith.constant 3.200000e+01 : f32
    %124 = vector.broadcast %cst_53 : f32 to vector<8x1xf32>
    %125 = arith.divf %123, %124 : vector<8x1xf32>
    %126 = vector.broadcast %125 : vector<8x1xf32> to vector<8x32xf32>
    %127 = arith.subf %119, %126 : vector<8x32xf32>
    %128 = arith.mulf %127, %127 : vector<8x32xf32>
    %cst_54 = arith.constant dense<0.000000e+00> : vector<8xf32>
    %129 = vector.multi_reduction <add>, %128, %cst_54 [1] : vector<8x32xf32> to vector<8xf32>
    %130 = vector.shape_cast %129 : vector<8xf32> to vector<8x1xf32>
    %cst_55 = arith.constant 3.200000e+01 : f32
    %131 = vector.broadcast %cst_55 : f32 to vector<8x1xf32>
    %132 = arith.divf %130, %131 : vector<8x1xf32>
    %cst_56 = arith.constant 9.99999974E-6 : f32
    %133 = vector.broadcast %cst_56 : f32 to vector<8x1xf32>
    %134 = arith.addf %132, %133 : vector<8x1xf32>
    %135 = math.rsqrt %134 : vector<8x1xf32>
    %136 = vector.broadcast %135 : vector<8x1xf32> to vector<8x32xf32>
    %137 = arith.mulf %127, %136 : vector<8x32xf32>
    %138 = vector.broadcast %120 : vector<1x32xf32> to vector<8x32xf32>
    %139 = arith.mulf %137, %138 : vector<8x32xf32>
    %140 = vector.broadcast %121 : vector<1x32xf32> to vector<8x32xf32>
    %141 = arith.addf %139, %140 : vector<8x32xf32>
    %142 = arith.truncf %141 : vector<8x32xf32> to vector<8x32xbf16>
    %c0_57 = arith.constant 0 : index
    %c0_58 = arith.constant 0 : index
    %143 = vector.load %arg16[%c0_57, %c0_58] : memref<32x64xbf16, #tpu.memory_space<vmem>>, vector<32x64xbf16>
    %cst_59 = arith.constant dense<0.000000e+00> : vector<8x64xf32>
    %144 = tpu.matmul %142, %143, %cst_59 {dimension_numbers = #tpu.dot_dimension_numbers<[1], [0], [0], [1], [0, 0, 1, 1], [], []>} : vector<8x32xbf16>, vector<32x64xbf16>, vector<8x64xf32> -> vector<8x64xf32>
    %c0_60 = arith.constant 0 : index
    %c0_61 = arith.constant 0 : index
    %145 = vector.load %arg17[%c0_60, %c0_61] : memref<1x64xf32, #tpu.memory_space<vmem>>, vector<1x64xf32>
    %146 = vector.broadcast %145 : vector<1x64xf32> to vector<8x64xf32>
    %147 = arith.addf %144, %146 : vector<8x64xf32>
    %cst_62 = arith.constant 0.000000e+00 : f32
    %148 = vector.broadcast %cst_62 : f32 to vector<8x64xf32>
    %149 = arith.maximumf %147, %148 : vector<8x64xf32>
    %150 = arith.truncf %149 : vector<8x64xf32> to vector<8x64xbf16>
    %c0_63 = arith.constant 0 : index
    %c0_64 = arith.constant 0 : index
    %151 = vector.load %arg18[%c0_63, %c0_64] : memref<64x32xbf16, #tpu.memory_space<vmem>>, vector<64x32xbf16>
    %cst_65 = arith.constant dense<0.000000e+00> : vector<8x32xf32>
    %152 = tpu.matmul %150, %151, %cst_65 {dimension_numbers = #tpu.dot_dimension_numbers<[1], [0], [0], [1], [0, 0, 1, 1], [], []>} : vector<8x64xbf16>, vector<64x32xbf16>, vector<8x32xf32> -> vector<8x32xf32>
    %c0_66 = arith.constant 0 : index
    %c0_67 = arith.constant 0 : index
    %153 = vector.load %arg19[%c0_66, %c0_67] : memref<1x32xf32, #tpu.memory_space<vmem>>, vector<1x32xf32>
    %154 = vector.broadcast %153 : vector<1x32xf32> to vector<8x32xf32>
    %155 = arith.addf %152, %154 : vector<8x32xf32>
    %156 = arith.addf %141, %155 : vector<8x32xf32>
    %c0_68 = arith.constant 0 : index
    %c0_69 = arith.constant 0 : index
    %157 = vector.load %arg20[%c0_68, %c0_69] : memref<1x32xf32, #tpu.memory_space<vmem>>, vector<1x32xf32>
    %c0_70 = arith.constant 0 : index
    %c0_71 = arith.constant 0 : index
    %158 = vector.load %arg21[%c0_70, %c0_71] : memref<1x32xf32, #tpu.memory_space<vmem>>, vector<1x32xf32>
    %cst_72 = arith.constant dense<0.000000e+00> : vector<8xf32>
    %159 = vector.multi_reduction <add>, %156, %cst_72 [1] : vector<8x32xf32> to vector<8xf32>
    %160 = vector.shape_cast %159 : vector<8xf32> to vector<8x1xf32>
    %cst_73 = arith.constant 3.200000e+01 : f32
    %161 = vector.broadcast %cst_73 : f32 to vector<8x1xf32>
    %162 = arith.divf %160, %161 : vector<8x1xf32>
    %163 = vector.broadcast %162 : vector<8x1xf32> to vector<8x32xf32>
    %164 = arith.subf %156, %163 : vector<8x32xf32>
    %165 = arith.mulf %164, %164 : vector<8x32xf32>
    %cst_74 = arith.constant dense<0.000000e+00> : vector<8xf32>
    %166 = vector.multi_reduction <add>, %165, %cst_74 [1] : vector<8x32xf32> to vector<8xf32>
    %167 = vector.shape_cast %166 : vector<8xf32> to vector<8x1xf32>
    %cst_75 = arith.constant 3.200000e+01 : f32
    %168 = vector.broadcast %cst_75 : f32 to vector<8x1xf32>
    %169 = arith.divf %167, %168 : vector<8x1xf32>
    %cst_76 = arith.constant 9.99999974E-6 : f32
    %170 = vector.broadcast %cst_76 : f32 to vector<8x1xf32>
    %171 = arith.addf %169, %170 : vector<8x1xf32>
    %172 = math.rsqrt %171 : vector<8x1xf32>
    %173 = vector.broadcast %172 : vector<8x1xf32> to vector<8x32xf32>
    %174 = arith.mulf %164, %173 : vector<8x32xf32>
    %175 = vector.broadcast %157 : vector<1x32xf32> to vector<8x32xf32>
    %176 = arith.mulf %174, %175 : vector<8x32xf32>
    %177 = vector.broadcast %158 : vector<1x32xf32> to vector<8x32xf32>
    %178 = arith.addf %176, %177 : vector<8x32xf32>
    %c0_77 = arith.constant 0 : index
    %c0_78 = arith.constant 0 : index
    %c0_79 = arith.constant 0 : index
    %179 = vector.load %arg22[%c0_77, %c0_78, %c0_79] : memref<1x8x32xf32, #tpu.memory_space<vmem>>, vector<1x8x32xf32>
    %180 = vector.shape_cast %179 : vector<1x8x32xf32> to vector<8x32xf32>
    %181 = vector.shape_cast %178 : vector<8x32xf32> to vector<1x8x32xf32>
    tpu.vector_store %arg22[%c0_77, %c0_78, %c0_79], %181 {strides = array<i32>} : memref<1x8x32xf32, #tpu.memory_space<vmem>>, vector<1x8x32xf32>,
    return
  }
  func.func @transform_0(%arg0: i32, %arg1: i32) -> (i32, i32, i32) {
    %c0_i32 = arith.constant 0 : i32
    %c0_i32_0 = arith.constant 0 : i32
    %c0_i32_1 = arith.constant 0 : i32
    %c0_i32_2 = arith.constant 0 : i32
    return %c0_i32, %c0_i32_0, %c0_i32_1 : i32, i32, i32
  }
  func.func @transform_1(%arg0: i32, %arg1: i32) -> (i32, i32, i32) {
    %c0_i32 = arith.constant 0 : i32
    %c0_i32_0 = arith.constant 0 : i32
    return %arg0, %arg1, %c0_i32 : i32, i32, i32
  }
  func.func @transform_2(%arg0: i32, %arg1: i32) -> (i32, i32, i32) {
    %c0_i32 = arith.constant 0 : i32
    %c0_i32_0 = arith.constant 0 : i32
    %c0_i32_1 = arith.constant 0 : i32
    return %arg0, %c0_i32, %c0_i32_0 : i32, i32, i32
  }
  func.func @transform_3(%arg0: i32, %arg1: i32) -> (i32, i32, i32) {
    %c0_i32 = arith.constant 0 : i32
    %c0_i32_0 = arith.constant 0 : i32
    %c0_i32_1 = arith.constant 0 : i32
    return %arg0, %c0_i32, %c0_i32_0 : i32, i32, i32
  }
  func.func @transform_4(%arg0: i32, %arg1: i32) -> (i32, i32) {
    %c0_i32 = arith.constant 0 : i32
    %c0_i32_0 = arith.constant 0 : i32
    %c0_i32_1 = arith.constant 0 : i32
    return %c0_i32, %c0_i32_0 : i32, i32
  }
  func.func @transform_5(%arg0: i32, %arg1: i32) -> (i32, i32) {
    %c0_i32 = arith.constant 0 : i32
    %c0_i32_0 = arith.constant 0 : i32
    %c0_i32_1 = arith.constant 0 : i32
    return %c0_i32, %c0_i32_0 : i32, i32
  }
  func.func @transform_6(%arg0: i32, %arg1: i32) -> (i32, i32) {
    %c0_i32 = arith.constant 0 : i32
    %c0_i32_0 = arith.constant 0 : i32
    %c0_i32_1 = arith.constant 0 : i32
    return %c0_i32, %c0_i32_0 : i32, i32
  }
  func.func @transform_7(%arg0: i32, %arg1: i32) -> (i32, i32) {
    %c0_i32 = arith.constant 0 : i32
    %c0_i32_0 = arith.constant 0 : i32
    %c0_i32_1 = arith.constant 0 : i32
    return %c0_i32, %c0_i32_0 : i32, i32
  }
  func.func @transform_8(%arg0: i32, %arg1: i32) -> (i32, i32) {
    %c0_i32 = arith.constant 0 : i32
    %c0_i32_0 = arith.constant 0 : i32
    %c0_i32_1 = arith.constant 0 : i32
    return %c0_i32, %c0_i32_0 : i32, i32
  }
  func.func @transform_9(%arg0: i32, %arg1: i32) -> (i32, i32) {
    %c0_i32 = arith.constant 0 : i32
    %c0_i32_0 = arith.constant 0 : i32
    %c0_i32_1 = arith.constant 0 : i32
    return %c0_i32, %c0_i32_0 : i32, i32
  }
  func.func @transform_10(%arg0: i32, %arg1: i32) -> (i32, i32) {
    %c0_i32 = arith.constant 0 : i32
    %c0_i32_0 = arith.constant 0 : i32
    %c0_i32_1 = arith.constant 0 : i32
    return %c0_i32, %c0_i32_0 : i32, i32
  }
  func.func @transform_11(%arg0: i32, %arg1: i32) -> (i32, i32) {
    %c0_i32 = arith.constant 0 : i32
    %c0_i32_0 = arith.constant 0 : i32
    %c0_i32_1 = arith.constant 0 : i32
    return %c0_i32, %c0_i32_0 : i32, i32
  }
  func.func @transform_12(%arg0: i32, %arg1: i32) -> (i32, i32) {
    %c0_i32 = arith.constant 0 : i32
    %c0_i32_0 = arith.constant 0 : i32
    %c0_i32_1 = arith.constant 0 : i32
    return %c0_i32, %c0_i32_0 : i32, i32
  }
  func.func @transform_13(%arg0: i32, %arg1: i32) -> (i32, i32) {
    %c0_i32 = arith.constant 0 : i32
    %c0_i32_0 = arith.constant 0 : i32
    %c0_i32_1 = arith.constant 0 : i32
    return %c0_i32, %c0_i32_0 : i32, i32
  }
  func.func @transform_14(%arg0: i32, %arg1: i32) -> (i32, i32) {
    %c0_i32 = arith.constant 0 : i32
    %c0_i32_0 = arith.constant 0 : i32
    %c0_i32_1 = arith.constant 0 : i32
    return %c0_i32, %c0_i32_0 : i32, i32
  }
  func.func @transform_15(%arg0: i32, %arg1: i32) -> (i32, i32) {
    %c0_i32 = arith.constant 0 : i32
    %c0_i32_0 = arith.constant 0 : i32
    %c0_i32_1 = arith.constant 0 : i32
    return %c0_i32, %c0_i32_0 : i32, i32
  }
  func.func @transform_16(%arg0: i32, %arg1: i32) -> (i32, i32) {
    %c0_i32 = arith.constant 0 : i32
    %c0_i32_0 = arith.constant 0 : i32
    %c0_i32_1 = arith.constant 0 : i32
    return %c0_i32, %c0_i32_0 : i32, i32
  }
  func.func @transform_17(%arg0: i32, %arg1: i32) -> (i32, i32) {
    %c0_i32 = arith.constant 0 : i32
    %c0_i32_0 = arith.constant 0 : i32
    %c0_i32_1 = arith.constant 0 : i32
    return %c0_i32, %c0_i32_0 : i32, i32
  }
  func.func @transform_18(%arg0: i32, %arg1: i32) -> (i32, i32) {
    %c0_i32 = arith.constant 0 : i32
    %c0_i32_0 = arith.constant 0 : i32
    %c0_i32_1 = arith.constant 0 : i32
    return %c0_i32, %c0_i32_0 : i32, i32
  }
  func.func @transform_19(%arg0: i32, %arg1: i32) -> (i32, i32) {
    %c0_i32 = arith.constant 0 : i32
    %c0_i32_0 = arith.constant 0 : i32
    %c0_i32_1 = arith.constant 0 : i32
    return %c0_i32, %c0_i32_0 : i32, i32
  }
  func.func @transform_20(%arg0: i32, %arg1: i32) -> (i32, i32, i32) {
    %c0_i32 = arith.constant 0 : i32
    %c0_i32_0 = arith.constant 0 : i32
    return %arg0, %arg1, %c0_i32 : i32, i32, i32
  }
}

module attributes {stable_mosaic.version = 11 : i64} {
  func.func @transformer_layer_kernel(%arg0: i32, %arg1: i32, %arg2: memref<4x1x1xf32, #tpu.memory_space<vmem>>, %arg3: memref<1x8x32xf32, #tpu.memory_space<vmem>>, %arg4: memref<1x8x32xf32, #tpu.memory_space<vmem>>, %arg5: memref<1x8x32xf32, #tpu.memory_space<vmem>>, %arg6: memref<32x32xbf16, #tpu.memory_space<vmem>>, %arg7: memref<1x32xf32, #tpu.memory_space<vmem>>, %arg8: memref<32x32xbf16, #tpu.memory_space<vmem>>, %arg9: memref<1x32xf32, #tpu.memory_space<vmem>>, %arg10: memref<32x32xbf16, #tpu.memory_space<vmem>>, %arg11: memref<1x32xf32, #tpu.memory_space<vmem>>, %arg12: memref<32x32xbf16, #tpu.memory_space<vmem>>, %arg13: memref<1x32xf32, #tpu.memory_space<vmem>>, %arg14: memref<1x32xf32, #tpu.memory_space<vmem>>, %arg15: memref<1x32xf32, #tpu.memory_space<vmem>>, %arg16: memref<32x64xbf16, #tpu.memory_space<vmem>>, %arg17: memref<1x64xf32, #tpu.memory_space<vmem>>, %arg18: memref<64x32xbf16, #tpu.memory_space<vmem>>, %arg19: memref<1x32xf32, #tpu.memory_space<vmem>>, %arg20: memref<1x32xf32, #tpu.memory_space<vmem>>, %arg21: memref<1x32xf32, #tpu.memory_space<vmem>>, %arg22: memref<1x8x32xf32, #tpu.memory_space<vmem>>) attributes {dimension_semantics = [#tpu.dimension_semantics<parallel>, #tpu.dimension_semantics<parallel>], iteration_bounds = array<i64: 2, 1>, scalar_prefetch = 0 : i64, scratch_operands = 0 : i64, tpu.core_type = #tpu.core_type<tc>, window_params = [{pipeline_mode = #tpu.pipeline_mode<synchronous>, transform_indices = @transform_0, window_bounds = array<i64: 4, 1, 1>}, {transform_indices = @transform_1, window_bounds = array<i64: 1, 8, 32>}, {transform_indices = @transform_2, window_bounds = array<i64: 1, 8, 32>}, {transform_indices = @transform_3, window_bounds = array<i64: 1, 8, 32>}, {pipeline_mode = #tpu.pipeline_mode<synchronous>, transform_indices = @transform_4, window_bounds = array<i64: 32, 32>}, {pipeline_mode = #tpu.pipeline_mode<synchronous>, transform_indices = @transform_5, window_bounds = array<i64: 1, 32>}, {pipeline_mode = #tpu.pipeline_mode<synchronous>, transform_indices = @transform_6, window_bounds = array<i64: 32, 32>}, {pipeline_mode = #tpu.pipeline_mode<synchronous>, transform_indices = @transform_7, window_bounds = array<i64: 1, 32>}, {pipeline_mode = #tpu.pipeline_mode<synchronous>, transform_indices = @transform_8, window_bounds = array<i64: 32, 32>}, {pipeline_mode = #tpu.pipeline_mode<synchronous>, transform_indices = @transform_9, window_bounds = array<i64: 1, 32>}, {pipeline_mode = #tpu.pipeline_mode<synchronous>, transform_indices = @transform_10, window_bounds = array<i64: 32, 32>}, {pipeline_mode = #tpu.pipeline_mode<synchronous>, transform_indices = @transform_11, window_bounds = array<i64: 1, 32>}, {pipeline_mode = #tpu.pipeline_mode<synchronous>, transform_indices = @transform_12, window_bounds = array<i64: 1, 32>}, {pipeline_mode = #tpu.pipeline_mode<synchronous>, transform_indices = @transform_13, window_bounds = array<i64: 1, 32>}, {pipeline_mode = #tpu.pipeline_mode<synchronous>, transform_indices = @transform_14, window_bounds = array<i64: 32, 64>}, {pipeline_mode = #tpu.pipeline_mode<synchronous>, transform_indices = @transform_15, window_bounds = array<i64: 1, 64>}, {pipeline_mode = #tpu.pipeline_mode<synchronous>, transform_indices = @transform_16, window_bounds = array<i64: 64, 32>}, {pipeline_mode = #tpu.pipeline_mode<synchronous>, transform_indices = @transform_17, window_bounds = array<i64: 1, 32>}, {pipeline_mode = #tpu.pipeline_mode<synchronous>, transform_indices = @transform_18, window_bounds = array<i64: 1, 32>}, {pipeline_mode = #tpu.pipeline_mode<synchronous>, transform_indices = @transform_19, window_bounds = array<i64: 1, 32>}, {transform_indices = @transform_20, window_bounds = array<i64: 1, 8, 32>}]} {
    %c8_i32 = arith.constant 8 : i32
    %0 = arith.muli %arg1, %c8_i32 : i32
    %c0 = arith.constant 0 : index
    %c0_0 = arith.constant 0 : index
    %c0_1 = arith.constant 0 : index
    %1 = vector.load %arg3[%c0, %c0_0, %c0_1] : memref<1x8x32xf32, #tpu.memory_space<vmem>>, vector<1x8x32xf32>
    %2 = vector.shape_cast %1 : vector<1x8x32xf32> to vector<8x32xf32>
    %c0_2 = arith.constant 0 : index
    %c0_3 = arith.constant 0 : index
    %c0_4 = arith.constant 0 : index
    %3 = vector.load %arg4[%c0_2, %c0_3, %c0_4] : memref<1x8x32xf32, #tpu.memory_space<vmem>>, vector<1x8x32xf32>
    %4 = vector.shape_cast %3 : vector<1x8x32xf32> to vector<8x32xf32>
    %c0_5 = arith.constant 0 : index
    %c0_6 = arith.constant 0 : index
    %c0_7 = arith.constant 0 : index
    %5 = vector.load %arg5[%c0_5, %c0_6, %c0_7] : memref<1x8x32xf32, #tpu.memory_space<vmem>>, vector<1x8x32xf32>
    %6 = vector.shape_cast %5 : vector<1x8x32xf32> to vector<8x32xf32>
    %7 = arith.truncf %2 : vector<8x32xf32> to vector<8x32xbf16>
    %c0_8 = arith.constant 0 : index
    %c0_9 = arith.constant 0 : index
    %8 = vector.load %arg6[%c0_8, %c0_9] : memref<32x32xbf16, #tpu.memory_space<vmem>>, vector<32x32xbf16>
    %cst = arith.constant dense<0.000000e+00> : vector<8x32xf32>
    %9 = tpu.matmul %7, %8, %cst {dimension_numbers = #tpu.dot_dimension_numbers<[1], [0], [0], [1], [0, 0, 1, 1], [], []>} : vector<8x32xbf16>, vector<32x32xbf16>, vector<8x32xf32> -> vector<8x32xf32>
    %c0_10 = arith.constant 0 : index
    %c0_11 = arith.constant 0 : index
    %10 = vector.load %arg7[%c0_10, %c0_11] : memref<1x32xf32, #tpu.memory_space<vmem>>, vector<1x32xf32>
    %11 = vector.broadcast %10 : vector<1x32xf32> to vector<8x32xf32>
    %12 = arith.addf %9, %11 : vector<8x32xf32>
    %13 = arith.truncf %4 : vector<8x32xf32> to vector<8x32xbf16>
    %c0_12 = arith.constant 0 : index
    %c0_13 = arith.constant 0 : index
    %14 = vector.load %arg8[%c0_12, %c0_13] : memref<32x32xbf16, #tpu.memory_space<vmem>>, vector<32x32xbf16>
    %cst_14 = arith.constant dense<0.000000e+00> : vector<8x32xf32>
    %15 = tpu.matmul %13, %14, %cst_14 {dimension_numbers = #tpu.dot_dimension_numbers<[1], [0], [0], [1], [0, 0, 1, 1], [], []>} : vector<8x32xbf16>, vector<32x32xbf16>, vector<8x32xf32> -> vector<8x32xf32>
    %c0_15 = arith.constant 0 : index
    %c0_16 = arith.constant 0 : index
    %16 = vector.load %arg9[%c0_15, %c0_16] : memref<1x32xf32, #tpu.memory_space<vmem>>, vector<1x32xf32>
    %17 = vector.broadcast %16 : vector<1x32xf32> to vector<8x32xf32>
    %18 = arith.addf %15, %17 : vector<8x32xf32>
    %19 = arith.truncf %6 : vector<8x32xf32> to vector<8x32xbf16>
    %c0_17 = arith.constant 0 : index
    %c0_18 = arith.constant 0 : index
    %20 = vector.load %arg10[%c0_17, %c0_18] : memref<32x32xbf16, #tpu.memory_space<vmem>>, vector<32x32xbf16>
    %cst_19 = arith.constant dense<0.000000e+00> : vector<8x32xf32>
    %21 = tpu.matmul %19, %20, %cst_19 {dimension_numbers = #tpu.dot_dimension_numbers<[1], [0], [0], [1], [0, 0, 1, 1], [], []>} : vector<8x32xbf16>, vector<32x32xbf16>, vector<8x32xf32> -> vector<8x32xf32>
    %c0_20 = arith.constant 0 : index
    %c0_21 = arith.constant 0 : index
    %22 = vector.load %arg11[%c0_20, %c0_21] : memref<1x32xf32, #tpu.memory_space<vmem>>, vector<1x32xf32>
    %23 = vector.broadcast %22 : vector<1x32xf32> to vector<8x32xf32>
    %24 = arith.addf %21, %23 : vector<8x32xf32>
    %25 = vector.shape_cast %12 : vector<8x32xf32> to vector<8x4x8xf32>
    %26 = tpu.transpose %25, [1, 0, 2] : vector<8x4x8xf32> -> vector<4x8x8xf32>
    %27 = arith.truncf %26 : vector<4x8x8xf32> to vector<4x8x8xbf16>
    %28 = vector.shape_cast %18 : vector<8x32xf32> to vector<8x4x8xf32>
    %29 = tpu.transpose %28, [1, 0, 2] : vector<8x4x8xf32> -> vector<4x8x8xf32>
    %30 = arith.truncf %29 : vector<4x8x8xf32> to vector<4x8x8xbf16>
    %31 = vector.shape_cast %24 : vector<8x32xf32> to vector<8x4x8xf32>
    %32 = tpu.transpose %31, [1, 0, 2] : vector<8x4x8xf32> -> vector<4x8x8xf32>
    %33 = arith.truncf %32 : vector<4x8x8xf32> to vector<4x8x8xbf16>
    %34 = tpu.iota {dimensions = array<i32: 0>} : vector<8x8xi32>
    %35 = vector.broadcast %0 : i32 to vector<8x8xi32>
    %36 = arith.addi %34, %35 : vector<8x8xi32>
    %37 = tpu.iota {dimensions = array<i32: 1>} : vector<8x8xi32>
    %c0_i32 = arith.constant 0 : i32
    %38 = vector.broadcast %c0_i32 : i32 to vector<8x8xi32>
    %39 = arith.addi %36, %38 : vector<8x8xi32>
    %40 = arith.cmpi slt, %37, %39 : vector<8x8xi32>
    %41 = arith.subi %36, %37 : vector<8x8xi32>
    %42 = math.absi %41 : vector<8x8xi32>
    %43 = arith.sitofp %42 : vector<8x8xi32> to vector<8x8xf32>
    %44 = tpu.iota {dimensions = array<i32: 0>} : vector<8x8xi32>
    %45 = tpu.iota {dimensions = array<i32: 1>} : vector<8x8xi32>
    %46 = arith.cmpi sgt, %44, %45 : vector<8x8xi32>
    %cst_22 = arith.constant 1.000000e+00 : f32
    %cst_23 = arith.constant 0.000000e+00 : f32
    %47 = vector.broadcast %cst_22 : f32 to vector<8x8xf32>
    %48 = vector.broadcast %cst_23 : f32 to vector<8x8xf32>
    %49 = arith.select %46, %47, %48 : vector<8x8xi1>, vector<8x8xf32>
    %50 = arith.truncf %49 : vector<8x8xf32> to vector<8x8xbf16>
    "tpu.trace_start"() <{level = 10 : i32, message = "hqd,hkd->hqk"}> : () -> ()
    %cst_24 = arith.constant dense<0.000000e+00> : vector<4x8x8xf32>
    %51 = tpu.matmul %27, %30, %cst_24 {dimension_numbers = #tpu.dot_dimension_numbers<[2], [2], [1], [1], [0, 0, 0, 1, 1, 1], [0], [0]>} : vector<4x8x8xbf16>, vector<4x8x8xbf16>, vector<4x8x8xf32> -> vector<4x8x8xf32>
    "tpu.trace_stop"() : () -> ()
    %cst_25 = arith.constant 0.353553385 : f32
    %52 = vector.broadcast %cst_25 : f32 to vector<4x8x8xf32>
    %53 = arith.mulf %51, %52 : vector<4x8x8xf32>
    %cst_26 = arith.constant dense<0xFF800000> : vector<4x8xf32>
    %54 = vector.multi_reduction <maximumf>, %53, %cst_26 [2] : vector<4x8x8xf32> to vector<4x8xf32>
    %55 = vector.shape_cast %54 : vector<4x8xf32> to vector<4x8x1xf32>
    %56 = vector.broadcast %55 : vector<4x8x1xf32> to vector<4x8x8xf32>
    %57 = arith.subf %53, %56 : vector<4x8x8xf32>
    %58 = math.exp %57 : vector<4x8x8xf32>
    %cst_27 = arith.constant dense<0.000000e+00> : vector<4x8xf32>
    %59 = vector.multi_reduction <add>, %58, %cst_27 [2] : vector<4x8x8xf32> to vector<4x8xf32>
    %60 = vector.shape_cast %59 : vector<4x8xf32> to vector<4x8x1xf32>
    %61 = tpu.reciprocal %60 {approx = true} : vector<4x8x1xf32> -> vector<4x8x1xf32>
    %62 = vector.broadcast %61 : vector<4x8x1xf32> to vector<4x8x8xf32>
    %63 = arith.mulf %58, %62 : vector<4x8x8xf32>
    %cst_28 = arith.constant 0.000000e+00 : f32
    %64 = vector.shape_cast %40 : vector<8x8xi1> to vector<1x8x8xi1>
    %65 = vector.broadcast %64 : vector<1x8x8xi1> to vector<4x8x8xi1>
    %66 = vector.broadcast %cst_28 : f32 to vector<4x8x8xf32>
    %67 = arith.select %65, %63, %66 : vector<4x8x8xi1>, vector<4x8x8xf32>
    %68 = vector.shape_cast %67 : vector<4x8x8xf32> to vector<32x8xf32>
    %69 = arith.truncf %68 : vector<32x8xf32> to vector<32x8xbf16>
    %cst_29 = arith.constant dense<0.000000e+00> : vector<32x8xf32>
    %70 = tpu.matmul %69, %50, %cst_29 {dimension_numbers = #tpu.dot_dimension_numbers<[1], [0], [0], [1], [0, 0, 1, 1], [], []>} : vector<32x8xbf16>, vector<8x8xbf16>, vector<32x8xf32> -> vector<32x8xf32>
    %71 = vector.shape_cast %70 : vector<32x8xf32> to vector<4x8x8xf32>
    %72 = vector.shape_cast %43 : vector<8x8xf32> to vector<1x8x8xf32>
    %73 = vector.broadcast %72 : vector<1x8x8xf32> to vector<4x8x8xf32>
    %74 = arith.mulf %71, %73 : vector<4x8x8xf32>
    %cst_30 = arith.constant 0.000000e+00 : f32
    %75 = vector.broadcast %cst_30 : f32 to vector<4x8x8xf32>
    %76 = arith.maximumf %74, %75 : vector<4x8x8xf32>
    %77 = math.sqrt %76 : vector<4x8x8xf32>
    %c0_31 = arith.constant 0 : index
    %c0_32 = arith.constant 0 : index
    %c0_33 = arith.constant 0 : index
    %78 = vector.load %arg2[%c0_31, %c0_32, %c0_33] : memref<4x1x1xf32, #tpu.memory_space<vmem>>, vector<4x1x1xf32>
    %79 = vector.broadcast %78 : vector<4x1x1xf32> to vector<4x8x8xf32>
    %80 = arith.mulf %77, %79 : vector<4x8x8xf32>
    %81 = math.exp %80 : vector<4x8x8xf32>
    %cst_34 = arith.constant 9.99999974E-6 : f32
    %cst_35 = arith.constant 1.000000e+05 : f32
    %82 = vector.broadcast %cst_34 : f32 to vector<4x8x8xf32>
    %83 = arith.maximumf %82, %81 : vector<4x8x8xf32>
    %84 = vector.broadcast %cst_35 : f32 to vector<4x8x8xf32>
    %85 = arith.minimumf %84, %83 : vector<4x8x8xf32>
    %86 = arith.mulf %53, %85 : vector<4x8x8xf32>
    %cst_36 = arith.constant -1.000000e+20 : f32
    %87 = vector.shape_cast %40 : vector<8x8xi1> to vector<1x8x8xi1>
    %88 = vector.broadcast %87 : vector<1x8x8xi1> to vector<4x8x8xi1>
    %89 = vector.broadcast %cst_36 : f32 to vector<4x8x8xf32>
    %90 = arith.select %88, %86, %89 : vector<4x8x8xi1>, vector<4x8x8xf32>
    %cst_37 = arith.constant dense<0xFF800000> : vector<4x8xf32>
    %91 = vector.multi_reduction <maximumf>, %90, %cst_37 [2] : vector<4x8x8xf32> to vector<4x8xf32>
    %92 = vector.shape_cast %91 : vector<4x8xf32> to vector<4x8x1xf32>
    %93 = vector.broadcast %92 : vector<4x8x1xf32> to vector<4x8x8xf32>
    %94 = arith.subf %90, %93 : vector<4x8x8xf32>
    %95 = math.exp %94 : vector<4x8x8xf32>
    %cst_38 = arith.constant dense<0.000000e+00> : vector<4x8xf32>
    %96 = vector.multi_reduction <add>, %95, %cst_38 [2] : vector<4x8x8xf32> to vector<4x8xf32>
    %97 = vector.shape_cast %96 : vector<4x8xf32> to vector<4x8x1xf32>
    %cst_39 = arith.constant 1.000000e+00 : f32
    %98 = vector.broadcast %cst_39 : f32 to vector<4x8x1xf32>
    %99 = arith.divf %98, %97 : vector<4x8x1xf32>
    %100 = vector.broadcast %99 : vector<4x8x1xf32> to vector<4x8x8xf32>
    %101 = arith.mulf %95, %100 : vector<4x8x8xf32>
    %102 = arith.truncf %101 : vector<4x8x8xf32> to vector<4x8x8xbf16>
    "tpu.trace_start"() <{level = 10 : i32, message = "hqk,hkd->hqd"}> : () -> ()
    %cst_40 = arith.constant dense<0.000000e+00> : vector<4x8x8xf32>
    %103 = tpu.matmul %102, %33, %cst_40 {dimension_numbers = #tpu.dot_dimension_numbers<[2], [1], [1], [2], [0, 0, 0, 1, 1, 2], [0], [0]>} : vector<4x8x8xbf16>, vector<4x8x8xbf16>, vector<4x8x8xf32> -> vector<4x8x8xf32>
    "tpu.trace_stop"() : () -> ()
    %104 = tpu.transpose %103, [1, 0, 2] : vector<4x8x8xf32> -> vector<8x4x8xf32>
    %105 = vector.shape_cast %104 : vector<8x4x8xf32> to vector<8x32xf32>
    %106 = arith.truncf %105 : vector<8x32xf32> to vector<8x32xbf16>
    %c0_41 = arith.constant 0 : index
    %c0_42 = arith.constant 0 : index
    %107 = vector.load %arg12[%c0_41, %c0_42] : memref<32x32xbf16, #tpu.memory_space<vmem>>, vector<32x32xbf16>
    %cst_43 = arith.constant dense<0.000000e+00> : vector<8x32xf32>
    %108 = tpu.matmul %106, %107, %cst_43 {dimension_numbers = #tpu.dot_dimension_numbers<[1], [0], [0], [1], [0, 0, 1, 1], [], []>} : vector<8x32xbf16>, vector<32x32xbf16>, vector<8x32xf32> -> vector<8x32xf32>
    %109 = tpu.iota {dimensions = array<i32: 0>} : vector<8x32xi32>
    %110 = vector.broadcast %0 : i32 to vector<8x32xi32>
    %111 = arith.addi %109, %110 : vector<8x32xi32>
    %c0_i32_44 = arith.constant 0 : i32
    %112 = vector.broadcast %c0_i32_44 : i32 to vector<8x32xi32>
    %113 = arith.cmpi eq, %111, %112 : vector<8x32xi32>
    %cst_45 = arith.constant 0.000000e+00 : f32
    %114 = vector.broadcast %cst_45 : f32 to vector<8x32xf32>
    %115 = arith.select %113, %114, %108 : vector<8x32xi1>, vector<8x32xf32>
    %c0_46 = arith.constant 0 : index
    %c0_47 = arith.constant 0 : index
    %116 = vector.load %arg13[%c0_46, %c0_47] : memref<1x32xf32, #tpu.memory_space<vmem>>, vector<1x32xf32>
    %117 = vector.broadcast %116 : vector<1x32xf32> to vector<8x32xf32>
    %118 = arith.addf %115, %117 : vector<8x32xf32>
    %119 = arith.addf %2, %118 : vector<8x32xf32>
    %c0_48 = arith.constant 0 : index
    %c0_49 = arith.constant 0 : index
    %120 = vector.load %arg14[%c0_48, %c0_49] : memref<1x32xf32, #tpu.memory_space<vmem>>, vector<1x32xf32>
    %c0_50 = arith.constant 0 : index
    %c0_51 = arith.constant 0 : index
    %121 = vector.load %arg15[%c0_50, %c0_51] : memref<1x32xf32, #tpu.memory_space<vmem>>, vector<1x32xf32>
    %cst_52 = arith.constant dense<0.000000e+00> : vector<8xf32>
    %122 = vector.multi_reduction <add>, %119, %cst_52 [1] : vector<8x32xf32> to vector<8xf32>
    %123 = vector.shape_cast %122 : vector<8xf32> to vector<8x1xf32>
    %cst_53 = arith.constant 3.200000e+01 : f32
    %124 = vector.broadcast %cst_53 : f32 to vector<8x1xf32>
    %125 = arith.divf %123, %124 : vector<8x1xf32>
    %126 = vector.broadcast %125 : vector<8x1xf32> to vector<8x32xf32>
    %127 = arith.subf %119, %126 : vector<8x32xf32>
    %128 = arith.mulf %127, %127 : vector<8x32xf32>
    %cst_54 = arith.constant dense<0.000000e+00> : vector<8xf32>
    %129 = vector.multi_reduction <add>, %128, %cst_54 [1] : vector<8x32xf32> to vector<8xf32>
    %130 = vector.shape_cast %129 : vector<8xf32> to vector<8x1xf32>
    %cst_55 = arith.constant 3.200000e+01 : f32
    %131 = vector.broadcast %cst_55 : f32 to vector<8x1xf32>
    %132 = arith.divf %130, %131 : vector<8x1xf32>
    %cst_56 = arith.constant 9.99999974E-6 : f32
    %133 = vector.broadcast %cst_56 : f32 to vector<8x1xf32>
    %134 = arith.addf %132, %133 : vector<8x1xf32>
    %135 = math.rsqrt %134 : vector<8x1xf32>
    %136 = vector.broadcast %135 : vector<8x1xf32> to vector<8x32xf32>
    %137 = arith.mulf %127, %136 : vector<8x32xf32>
    %138 = vector.broadcast %120 : vector<1x32xf32> to vector<8x32xf32>
    %139 = arith.mulf %137, %138 : vector<8x32xf32>
    %140 = vector.broadcast %121 : vector<1x32xf32> to vector<8x32xf32>
    %141 = arith.addf %139, %140 : vector<8x32xf32>
    %142 = arith.truncf %141 : vector<8x32xf32> to vector<8x32xbf16>
    %c0_57 = arith.constant 0 : index
    %c0_58 = arith.constant 0 : index
    %143 = vector.load %arg16[%c0_57, %c0_58] : memref<32x64xbf16, #tpu.memory_space<vmem>>, vector<32x64xbf16>
    %cst_59 = arith.constant dense<0.000000e+00> : vector<8x64xf32>
    %144 = tpu.matmul %142, %143, %cst_59 {dimension_numbers = #tpu.dot_dimension_numbers<[1], [0], [0], [1], [0, 0, 1, 1], [], []>} : vector<8x32xbf16>, vector<32x64xbf16>, vector<8x64xf32> -> vector<8x64xf32>
    %c0_60 = arith.constant 0 : index
    %c0_61 = arith.constant 0 : index
    %145 = vector.load %arg17[%c0_60, %c0_61] : memref<1x64xf32, #tpu.memory_space<vmem>>, vector<1x64xf32>
    %146 = vector.broadcast %145 : vector<1x64xf32> to vector<8x64xf32>
    %147 = arith.addf %144, %146 : vector<8x64xf32>
    %cst_62 = arith.constant 0.000000e+00 : f32
    %148 = vector.broadcast %cst_62 : f32 to vector<8x64xf32>
    %149 = arith.maximumf %147, %148 : vector<8x64xf32>
    %150 = arith.truncf %149 : vector<8x64xf32> to vector<8x64xbf16>
    %c0_63 = arith.constant 0 : index
    %c0_64 = arith.constant 0 : index
    %151 = vector.load %arg18[%c0_63, %c0_64] : memref<64x32xbf16, #tpu.memory_space<vmem>>, vector<64x32xbf16>
    %cst_65 = arith.constant dense<0.000000e+00> : vector<8x32xf32>
    %152 = tpu.matmul %150, %151, %cst_65 {dimension_numbers = #tpu.dot_dimension_numbers<[1], [0], [0], [1], [0, 0, 1, 1], [], []>} : vector<8x64xbf16>, vector<64x32xbf16>, vector<8x32xf32> -> vector<8x32xf32>
    %c0_66 = arith.constant 0 : index
    %c0_67 = arith.constant 0 : index
    %153 = vector.load %arg19[%c0_66, %c0_67] : memref<1x32xf32, #tpu.memory_space<vmem>>, vector<1x32xf32>
    %154 = vector.broadcast %153 : vector<1x32xf32> to vector<8x32xf32>
    %155 = arith.addf %152, %154 : vector<8x32xf32>
    %156 = arith.addf %141, %155 : vector<8x32xf32>
    %c0_68 = arith.constant 0 : index
    %c0_69 = arith.constant 0 : index
    %157 = vector.load %arg20[%c0_68, %c0_69] : memref<1x32xf32, #tpu.memory_space<vmem>>, vector<1x32xf32>
    %c0_70 = arith.constant 0 : index
    %c0_71 = arith.constant 0 : index
    %158 = vector.load %arg21[%c0_70, %c0_71] : memref<1x32xf32, #tpu.memory_space<vmem>>, vector<1x32xf32>
    %cst_72 = arith.constant dense<0.000000e+00> : vector<8xf32>
    %159 = vector.multi_reduction <add>, %156, %cst_72 [1] : vector<8x32xf32> to vector<8xf32>
    %160 = vector.shape_cast %159 : vector<8xf32> to vector<8x1xf32>
    %cst_73 = arith.constant 3.200000e+01 : f32
    %161 = vector.broadcast %cst_73 : f32 to vector<8x1xf32>
    %162 = arith.divf %160, %161 : vector<8x1xf32>
    %163 = vector.broadcast %162 : vector<8x1xf32> to vector<8x32xf32>
    %164 = arith.subf %156, %163 : vector<8x32xf32>
    %165 = arith.mulf %164, %164 : vector<8x32xf32>
    %cst_74 = arith.constant dense<0.000000e+00> : vector<8xf32>
    %166 = vector.multi_reduction <add>, %165, %cst_74 [1] : vector<8x32xf32> to vector<8xf32>
    %167 = vector.shape_cast %166 : vector<8xf32> to vector<8x1xf32>
    %cst_75 = arith.constant 3.200000e+01 : f32
    %168 = vector.broadcast %cst_75 : f32 to vector<8x1xf32>
    %169 = arith.divf %167, %168 : vector<8x1xf32>
    %cst_76 = arith.constant 9.99999974E-6 : f32
    %170 = vector.broadcast %cst_76 : f32 to vector<8x1xf32>
    %171 = arith.addf %169, %170 : vector<8x1xf32>
    %172 = math.rsqrt %171 : vector<8x1xf32>
    %173 = vector.broadcast %172 : vector<8x1xf32> to vector<8x32xf32>
    %174 = arith.mulf %164, %173 : vector<8x32xf32>
    %175 = vector.broadcast %157 : vector<1x32xf32> to vector<8x32xf32>
    %176 = arith.mulf %174, %175 : vector<8x32xf32>
    %177 = vector.broadcast %158 : vector<1x32xf32> to vector<8x32xf32>
    %178 = arith.addf %176, %177 : vector<8x32xf32>
    %c0_77 = arith.constant 0 : index
    %c0_78 = arith.constant 0 : index
    %c0_79 = arith.constant 0 : index
    %179 = vector.load %arg22[%c0_77, %c0_78, %c0_79] : memref<1x8x32xf32, #tpu.memory_space<vmem>>, vector<1x8x32xf32>
    %180 = vector.shape_cast %179 : vector<1x8x32xf32> to vector<8x32xf32>
    %181 = vector.shape_cast %178 : vector<8x32xf32> to vector<1x8x32xf32>
    tpu.vector_store %arg22[%c0_77, %c0_78, %c0_79], %181 {strides = array<i32>} : memref<1x8x32xf32, #tpu.memory_space<vmem>>, vector<1x8x32xf32>,
    return
  }
  func.func @transform_0(%arg0: i32, %arg1: i32) -> (i32, i32, i32) {
    %c0_i32 = arith.constant 0 : i32
    %c0_i32_0 = arith.constant 0 : i32
    %c0_i32_1 = arith.constant 0 : i32
    %c0_i32_2 = arith.constant 0 : i32
    return %c0_i32, %c0_i32_0, %c0_i32_1 : i32, i32, i32
  }
  func.func @transform_1(%arg0: i32, %arg1: i32) -> (i32, i32, i32) {
    %c0_i32 = arith.constant 0 : i32
    %c0_i32_0 = arith.constant 0 : i32
    return %arg0, %arg1, %c0_i32 : i32, i32, i32
  }
  func.func @transform_2(%arg0: i32, %arg1: i32) -> (i32, i32, i32) {
    %c0_i32 = arith.constant 0 : i32
    %c0_i32_0 = arith.constant 0 : i32
    %c0_i32_1 = arith.constant 0 : i32
    return %arg0, %c0_i32, %c0_i32_0 : i32, i32, i32
  }
  func.func @transform_3(%arg0: i32, %arg1: i32) -> (i32, i32, i32) {
    %c0_i32 = arith.constant 0 : i32
    %c0_i32_0 = arith.constant 0 : i32
    %c0_i32_1 = arith.constant 0 : i32
    return %arg0, %c0_i32, %c0_i32_0 : i32, i32, i32
  }
  func.func @transform_4(%arg0: i32, %arg1: i32) -> (i32, i32) {
    %c0_i32 = arith.constant 0 : i32
    %c0_i32_0 = arith.constant 0 : i32
    %c0_i32_1 = arith.constant 0 : i32
    return %c0_i32, %c0_i32_0 : i32, i32
  }
  func.func @transform_5(%arg0: i32, %arg1: i32) -> (i32, i32) {
    %c0_i32 = arith.constant 0 : i32
    %c0_i32_0 = arith.constant 0 : i32
    %c0_i32_1 = arith.constant 0 : i32
    return %c0_i32, %c0_i32_0 : i32, i32
  }
  func.func @transform_6(%arg0: i32, %arg1: i32) -> (i32, i32) {
    %c0_i32 = arith.constant 0 : i32
    %c0_i32_0 = arith.constant 0 : i32
    %c0_i32_1 = arith.constant 0 : i32
    return %c0_i32, %c0_i32_0 : i32, i32
  }
  func.func @transform_7(%arg0: i32, %arg1: i32) -> (i32, i32) {
    %c0_i32 = arith.constant 0 : i32
    %c0_i32_0 = arith.constant 0 : i32
    %c0_i32_1 = arith.constant 0 : i32
    return %c0_i32, %c0_i32_0 : i32, i32
  }
  func.func @transform_8(%arg0: i32, %arg1: i32) -> (i32, i32) {
    %c0_i32 = arith.constant 0 : i32
    %c0_i32_0 = arith.constant 0 : i32
    %c0_i32_1 = arith.constant 0 : i32
    return %c0_i32, %c0_i32_0 : i32, i32
  }
  func.func @transform_9(%arg0: i32, %arg1: i32) -> (i32, i32) {
    %c0_i32 = arith.constant 0 : i32
    %c0_i32_0 = arith.constant 0 : i32
    %c0_i32_1 = arith.constant 0 : i32
    return %c0_i32, %c0_i32_0 : i32, i32
  }
  func.func @transform_10(%arg0: i32, %arg1: i32) -> (i32, i32) {
    %c0_i32 = arith.constant 0 : i32
    %c0_i32_0 = arith.constant 0 : i32
    %c0_i32_1 = arith.constant 0 : i32
    return %c0_i32, %c0_i32_0 : i32, i32
  }
  func.func @transform_11(%arg0: i32, %arg1: i32) -> (i32, i32) {
    %c0_i32 = arith.constant 0 : i32
    %c0_i32_0 = arith.constant 0 : i32
    %c0_i32_1 = arith.constant 0 : i32
    return %c0_i32, %c0_i32_0 : i32, i32
  }
  func.func @transform_12(%arg0: i32, %arg1: i32) -> (i32, i32) {
    %c0_i32 = arith.constant 0 : i32
    %c0_i32_0 = arith.constant 0 : i32
    %c0_i32_1 = arith.constant 0 : i32
    return %c0_i32, %c0_i32_0 : i32, i32
  }
  func.func @transform_13(%arg0: i32, %arg1: i32) -> (i32, i32) {
    %c0_i32 = arith.constant 0 : i32
    %c0_i32_0 = arith.constant 0 : i32
    %c0_i32_1 = arith.constant 0 : i32
    return %c0_i32, %c0_i32_0 : i32, i32
  }
  func.func @transform_14(%arg0: i32, %arg1: i32) -> (i32, i32) {
    %c0_i32 = arith.constant 0 : i32
    %c0_i32_0 = arith.constant 0 : i32
    %c0_i32_1 = arith.constant 0 : i32
    return %c0_i32, %c0_i32_0 : i32, i32
  }
  func.func @transform_15(%arg0: i32, %arg1: i32) -> (i32, i32) {
    %c0_i32 = arith.constant 0 : i32
    %c0_i32_0 = arith.constant 0 : i32
    %c0_i32_1 = arith.constant 0 : i32
    return %c0_i32, %c0_i32_0 : i32, i32
  }
  func.func @transform_16(%arg0: i32, %arg1: i32) -> (i32, i32) {
    %c0_i32 = arith.constant 0 : i32
    %c0_i32_0 = arith.constant 0 : i32
    %c0_i32_1 = arith.constant 0 : i32
    return %c0_i32, %c0_i32_0 : i32, i32
  }
  func.func @transform_17(%arg0: i32, %arg1: i32) -> (i32, i32) {
    %c0_i32 = arith.constant 0 : i32
    %c0_i32_0 = arith.constant 0 : i32
    %c0_i32_1 = arith.constant 0 : i32
    return %c0_i32, %c0_i32_0 : i32, i32
  }
  func.func @transform_18(%arg0: i32, %arg1: i32) -> (i32, i32) {
    %c0_i32 = arith.constant 0 : i32
    %c0_i32_0 = arith.constant 0 : i32
    %c0_i32_1 = arith.constant 0 : i32
    return %c0_i32, %c0_i32_0 : i32, i32
  }
  func.func @transform_19(%arg0: i32, %arg1: i32) -> (i32, i32) {
    %c0_i32 = arith.constant 0 : i32
    %c0_i32_0 = arith.constant 0 : i32
    %c0_i32_1 = arith.constant 0 : i32
    return %c0_i32, %c0_i32_0 : i32, i32
  }
  func.func @transform_20(%arg0: i32, %arg1: i32) -> (i32, i32, i32) {
    %c0_i32 = arith.constant 0 : i32
    %c0_i32_0 = arith.constant 0 : i32
    return %arg0, %arg1, %c0_i32 : i32, i32, i32
  }
}

</mosaic_0001>

<bundles_post_ra>
// kernel: tpu_custom_call.1
= control target key start
LH: loop header
LB: loop body
LE: loop exit
PB: predicated region body
PF: predicated region fallthrough
CT: control target
= control target key end

     0   :  { %s4085_s0 = inlined_call_operand.vmem [shape: f32[4,1,1], index: 0, kind: input, shape index: {}]   ;;  %s4086_s1 = inlined_call_operand.vmem [shape: f32[2,8,32], index: 1, kind: input, shape index: {}]   ;;  %s4087_s2 = inlined_call_operand.vmem [shape: f32[2,8,32], index: 2, kind: input, shape index: {}]   ;;  %s4088_s3 = inlined_call_operand.vmem [shape: f32[2,8,32], index: 3, kind: input, shape index: {}]   ;;  %s4089_s4 = inlined_call_operand.hbm [shape: bf16[32,32], index: 4, kind: input, shape index: {}]   ;;  %s4090_s5 = inlined_call_operand.vmem [shape: f32[1,32], index: 5, kind: input, shape index: {}]   ;;  %s4091_s6 = inlined_call_operand.hbm [shape: bf16[32,32], index: 6, kind: input, shape index: {}]   ;;  %s4092_s7 = inlined_call_operand.vmem [shape: f32[1,32], index: 7, kind: input, shape index: {}]   ;;  %s4093_s8 = inlined_call_operand.vmem [shape: bf16[32,32], index: 8, kind: input, shape index: {}]   ;;  %s4094_s9 = inlined_call_operand.hbm [shape: f32[1,32], index: 9, kind: input, shape index: {}]   ;;  %s4095_s10 = inlined_call_operand.hbm [shape: bf16[32,32], index: 10, kind: input, shape index: {}]   ;;  %s4096_s11 = inlined_call_operand.hbm [shape: f32[1,32], index: 11, kind: input, shape index: {}]   ;;  %s4097_s12 = inlined_call_operand.hbm [shape: f32[1,32], index: 12, kind: input, shape index: {}]   ;;  %s4098_s13 = inlined_call_operand.vmem [shape: f32[1,32], index: 13, kind: input, shape index: {}]   ;;  %s4099_s14 = inlined_call_operand.vmem [shape: bf16[32,64], index: 14, kind: input, shape index: {}]   ;;  %s4100_s15 = inlined_call_operand.vmem [shape: f32[1,64], index: 15, kind: input, shape index: {}]   ;;  %s4101_s16 = inlined_call_operand.vmem [shape: bf16[64,32], index: 16, kind: input, shape index: {}]   ;;  %s4102_s17 = inlined_call_operand.vmem [shape: f32[1,32], index: 17, kind: input, shape index: {}]   ;;  %s4103_s18 = inlined_call_operand.vmem [shape: f32[1,32], index: 18, kind: input, shape index: {}]   ;;  %s4104_s19 = inlined_call_operand.vmem [shape: f32[1,32], index: 19, kind: input, shape index: {}]   ;;  %s4105_s20 = inlined_call_operand.hbm [shape: f32[2,8,32], index: 20, kind: output, shape index: {}]  }
   0x1   :  { %4123 = sst [smem:[#allocation28_spill]] %s4085_s0 }
   0x2   :  { %4124 = sst [smem:[#allocation29_spill]] %s4086_s1 }
   0x3   :  { %4125 = sst [smem:[#allocation30_spill]] %s4087_s2 }
   0x4   :  { %4126 = sst [smem:[#allocation31_spill]] %s4088_s3 }
   0x5   :  { %4127 = sst [smem:[#allocation32_spill]] %s4089_s4 }
   0x6   :  { %4128 = sst [smem:[#allocation33_spill]] %s4091_s6 }
   0x7   :  { %4129 = sst [smem:[#allocation34_spill]] %s4100_s15 }
   0x8   :  { %4130 = sst [smem:[#allocation35_spill]] %s4102_s17 }
   0x9   :  { %4131 = sst [smem:[#allocation36_spill]] %s4103_s18 }
   0xa   :  { %4132 = sst [smem:[#allocation37_spill]] %s4104_s19 }
   0xb   :  { %4133 = sst [smem:[#allocation38_spill]] %s4105_s20 }
   0xc   :  { %25 = vsyncpa [#allocation3], 0 }
   0xd   :  { %26 = vsyncpa [#allocation6], 0 }
   0xe   :  { %27 = vsyncpa [#allocation9], 0 }
   0xf   :  { %28 = vsyncpa [#allocation12], 0 }
  0x10   :  { %29 = vsyncpa [#allocation4], 0 }
  0x11   :  { %31 = vsyncpa [#allocation4 + $0x1], 0  ;;  %s3496_s1 = smov 0   ;;  %s3498_s22 = smov 0  }
  0x12   :  { %s3500_s23 = smov 0   ;;  %s3502_s24 = smov 0  }
  0x13   :  { %s3504_s2 = smov 0   ;;  %s3506_s25 = smov 0  }
  0x14 LB: > { %4134 = sst [smem:[#allocation19_spill]] %s3349_s1  ;;  %s2685_s3 = sadd.s32 4294967295, %s3369_s25   ;;  %s3369_s25 = sphi %s3506_s25, %s37_s25   ;;  %s3365_s2 = sphi %s3504_s2, %s4176_s2   ;;  %s3361_s24 = sphi %s3502_s24, %s4175_s24   ;;  %s3357_s23 = sphi %s3500_s23, %s4174_s23   ;;  %s3353_s22 = sphi %s3498_s22, %s4173_s22   ;;  %s3349_s1 = sphi %s3496_s1, %s4172_s1  }
  0x15   : > { %4135 = sst [smem:[#allocation20_spill]] %s3353_s22  ;;  %s2686_s26 = sadd.s32 4294967294, %s3369_s25  }
  0x16   : > { %4136 = sst [smem:[#allocation21_spill]] %s3357_s23  ;;  %s49_s27 = sadd.s32 1, %s3365_s2 }
  0x17   : > { %4137 = sst [smem:[#allocation22_spill]] %s3365_s2  ;;  %s495_s28 = sadd.s32 1, %s3357_s23 }
  0x18   : > { %4138 = sst [smem:[#allocation23_spill]] %s3369_s25  ;;  %p51_p0 = scmp.ge.s32.totalorder %s49_s27, 2 }
  0x19   : > { %p505_p1 = scmp.ne.s32.totalorder %s3357_s23, %s3353_s22  ;;  %p506_p2 = scmp.eq.s32.totalorder %s2685_s3, 1 }
  0x1a   : > { %p511_p3 = scmp.ne.s32.totalorder %s3353_s22, %s3349_s1  ;;  %s4178_s27 = smov (%p51_p0, %s49_s27), 0 }
  0x1b   : > { %4139 = sst [smem:[#allocation24_spill]] %s4178_s27  ;;  %p3536_p4 = por %p506_p2, %p505_p1 }
  0x1c   : > { %p512_p5 = scmp.eq.s32.totalorder %s2686_s26, 1  ;;  %s490_s29 = ssub.s32 %s3365_s2, %s4178_s27 }
  0x1d   : > { %s4140_s4 = scalar_select %p3536_p4, 1, 0 }
  0x1e   : > { %p2687_p6 = scmp.ge.s32.totalorder %s3369_s25, 1  ;;  %p493_p7 = scmp.eq.s32.totalorder %s490_s29, 0 }
  0x1f   : > { %4141 = sst [smem:[#allocation25_spill]] %s4140_s4  ;;  %p3543_p8 = por %p512_p5, %p511_p3 }
  0x20   : > { %p519_p9 = scmp.lt.s32.totalorder %s3369_s25, 3  ;;  %p3555_p11 = scmp.eq.s32.totalorder %s2685_s3, 0 }
  0x21   : > { %s4142_s30 = scalar_select %p3543_p8, 1, 0 }
  0x22   : > { %s3549_s0 = scalar_select %p493_p7, %s3357_s23, %s495_s28  }
  0x23   : > { %4143 = sst [smem:[#allocation26_spill]] %s4142_s30  ;;  %p3551_p10 = pnand %p2687_p6, %p519_p9 }
  0x24   : > { %4144 = sst [smem:[#allocation27_spill]] %s3549_s0  ;;  %s3371_s26 = smov [#allocation5]  }
  0x25   : > { %s4145_s21 = scalar_select %p3551_p10, 1, 0 }
  0x26   : > { %s4146_s1 = scalar_select %p3555_p11, 1, 0 }
  0x27   : > { %p2935_p12 = pneg %p3551_p10  ;;  %s550_s29 = sshll.u32 %s3371_s26, 4  ;;  %s551_s29 = int_to_ptr.vmem [resolvable:$true] %s550_s29 }
  0x28   : > { %s3372_s28 = smov [#allocation8]   ;;  %s4148_s6 = sld [smem:[#allocation33_spill]] }
  0x29   : > { %p3563_p13 = pnand %p3555_p11, %p2935_p12  ;;  %s580_s2 = sshll.u32 %s3372_s28, 4  ;;  %s3567_s2 = int_to_ptr.vmem [resolvable:$true] %s580_s2 }
  0x2b   : > { %p3577_p1 = pneg %p3563_p13 }
  0x2e   : > { %s3107_s23 = scalar_lea.hbm %s4148_s6, 256 }
  0x2f   : > { %p3108_p0 = scmp.ne.s32.totalorder %s4148_s6, %s3107_s23  ;;  %p3114_p5 = scmp.lt.u32.totalorder %s3107_s23, %s4148_s6 }
  0x31   : > { %p3110_p2 = pnand %p3577_p1, %p3108_p0 }
  0x33   : > { %p3111_p3 = pneg %p3110_p2 }
  0x35   : > { %p3116_p6 = pnand %p3114_p5, %p3111_p3 }
  0x37   : > { %3119 = shalt.err (!%p3116_p6)
}
  0x38   : > { %s3120_s0 = scalar_lea.vmem %s551_s29, 256  ;;  %p3128_p8 = scmp.lt.s32.totalorder %s551_s29, %s551_s29 }
  0x39   : > { %p3121_p7 = scmp.ne.s32.totalorder %s551_s29, %s3120_s0  ;;  %p3129_p4 = scmp.lt.s32.totalorder %s3120_s0, %s3120_s0 }
  0x3b   : > { %p3123_p9 = pnand %p3121_p7, %p3577_p1  ;;  %p3130_p11 = por %p3129_p4, %p3128_p8 }
  0x3d   : > { %p3124_p12 = pneg %p3123_p9 }
  0x3f   : > { %p3131_p10 = pnand %p3130_p11, %p3124_p12 }
  0x41   : > { %3134 = shalt.err (!%p3131_p10)
}
  0x42   : > { %s3373_s25 = smov 64   ;;  %s3374_s30 = smov 4  }
  0x43   : > { %2941 = dma.hbm_to_vmem [thread:$0]  (!%p3563_p13), %s4148_s6, 256, %s551_s29, [#allocation6], %s3373_s25, %s3373_s25, %s3374_s30  }
  0x44   : > { %s3135_s19 = scalar_lea.hbm %s4095_s10, 256 }
  0x45   : > { %p3136_p4 = scmp.ne.s32.totalorder %s4095_s10, %s3135_s19  ;;  %p3142_p11 = scmp.lt.u32.totalorder %s3135_s19, %s4095_s10 }
  0x47   : > { %p3138_p8 = pnand %p3136_p4, %p3577_p1 }
  0x49   : > { %p3139_p10 = pneg %p3138_p8 }
  0x4b   : > { %p3144_p0 = pnand %p3142_p11, %p3139_p10 }
  0x4d   : > { %3147 = shalt.err (!%p3144_p0)
}
  0x4e   : > { %s3148_s29 = scalar_lea.vmem %s3567_s2, 256  ;;  %p3156_p6 = scmp.lt.s32.totalorder %s3567_s2, %s3567_s2 }
  0x4f   : > { %p3149_p2 = scmp.ne.s32.totalorder %s3567_s2, %s3148_s29  ;;  %p3157_p7 = scmp.lt.s32.totalorder %s3148_s29, %s3148_s29 }
  0x51   : > { %p3151_p3 = pnand %p3149_p2, %p3577_p1  ;;  %p3158_p9 = por %p3157_p7, %p3156_p6 }
  0x53   : > { %p3152_p5 = pneg %p3151_p3 }
  0x55   : > { %p3159_p12 = pnand %p3158_p9, %p3152_p5 }
  0x57   : > { %3162 = shalt.err (!%p3159_p12)
}
  0x58   : > { %2947 = dma.hbm_to_vmem [thread:$0]  (!%p3563_p13), %s4095_s10, 256, %s3567_s2, [#allocation9], %s3373_s25, %s3373_s25, %s3374_s30  }
  0x59   : > { %s3375_s22 = smov [#allocation2]   ;;  %s3376_s20 = smov [#allocation7]  }
  0x5a   : > { %s534_s4 = sshll.u32 %s3375_s22, 4  ;;  %s570_s23 = sshll.u32 %s3376_s20, 4  ;;  %s535_s4 = int_to_ptr.vmem [resolvable:$true] %s534_s4  ;;  %s571_s23 = int_to_ptr.vmem [resolvable:$true] %s570_s23 }
  0x5b   : > { %s4150_s0 = sld [smem:[#allocation32_spill]] }
  0x61   : > { %s3163_s29 = scalar_lea.hbm %s4150_s0, 256 }
  0x62   : > { %p3164_p4 = scmp.ne.s32.totalorder %s4150_s0, %s3163_s29  ;;  %p3170_p11 = scmp.lt.u32.totalorder %s3163_s29, %s4150_s0 }
  0x64   : > { %p3166_p8 = pnand %p3164_p4, %p3577_p1 }
  0x66   : > { %p3167_p10 = pneg %p3166_p8 }
  0x68   : > { %p3172_p0 = pnand %p3170_p11, %p3167_p10 }
  0x6a   : > { %3175 = shalt.err (!%p3172_p0)
}
  0x6b   : > { %s3176_s2 = scalar_lea.vmem %s535_s4, 256  ;;  %p3184_p6 = scmp.lt.s32.totalorder %s535_s4, %s535_s4 }
  0x6c   : > { %p3177_p2 = scmp.ne.s32.totalorder %s535_s4, %s3176_s2  ;;  %p3185_p7 = scmp.lt.s32.totalorder %s3176_s2, %s3176_s2 }
  0x6e   : > { %p3179_p3 = pnand %p3177_p2, %p3577_p1  ;;  %p3186_p9 = por %p3185_p7, %p3184_p6 }
  0x70   : > { %p3180_p5 = pneg %p3179_p3 }
  0x72   : > { %p3187_p12 = pnand %p3186_p9, %p3180_p5 }
  0x74   : > { %3190 = shalt.err (!%p3187_p12)
}
  0x75   : > { %2938 = dma.hbm_to_vmem [thread:$0]  (!%p3563_p13), %s4150_s0, 256, %s535_s4, [#allocation3], %s3373_s25, %s3373_s25, %s3374_s30  }
  0x76   : > { %s3191_s22 = scalar_lea.hbm %s4094_s9, 16 }
  0x77   : > { %p3192_p4 = scmp.ne.s32.totalorder %s4094_s9, %s3191_s22  ;;  %p3198_p11 = scmp.lt.u32.totalorder %s3191_s22, %s4094_s9 }
  0x79   : > { %p3194_p8 = pnand %p3192_p4, %p3577_p1 }
  0x7b   : > { %p3195_p10 = pneg %p3194_p8 }
  0x7d   : > { %p3200_p0 = pnand %p3198_p11, %p3195_p10 }
  0x7f   : > { %3203 = shalt.err (!%p3200_p0)
}
  0x80   : > { %s3204_s18 = scalar_lea.vmem %s571_s23, 16  ;;  %s3211_s25 = scalar_lea.vmem %s571_s23, 32 }
  0x81   : > { %p3205_p2 = scmp.ne.s32.totalorder %s571_s23, %s3204_s18  ;;  %p3212_p6 = scmp.lt.s32.totalorder %s571_s23, %s571_s23 }
  0x82   : > { %p3213_p7 = scmp.lt.s32.totalorder %s3211_s25, %s3204_s18 }
  0x83   : > { %p3207_p3 = pnand %p3205_p2, %p3577_p1 }
  0x84   : > { %p3214_p9 = por %p3213_p7, %p3212_p6 }
  0x85   : > { %p3208_p5 = pneg %p3207_p3 }
  0x87   : > { %p3215_p12 = pnand %p3214_p9, %p3208_p5 }
  0x89   : > { %3218 = shalt.err (!%p3215_p12)
}
  0x8a   : > { %2944 = dma.hbm_to_vmem [thread:$0]  (!%p3563_p13), %s4094_s9, 16, %s571_s23, [#allocation6]  }
  0x8b   : > { %s3377_s2 = smov [#allocation10]   ;;  %s3378_s15 = smov [#allocation11]  }
  0x8c   : > { %s594_s6 = sshll.u32 %s3377_s2, 4  ;;  %s605_s17 = sshll.u32 %s3378_s15, 4  ;;  %s595_s6 = int_to_ptr.vmem [resolvable:$true] %s594_s6  ;;  %s606_s17 = int_to_ptr.vmem [resolvable:$true] %s605_s17 }
  0x8d   : > { %s3219_s20 = scalar_lea.hbm %s4096_s11, 16 }
  0x8e   : > { %p3220_p4 = scmp.ne.s32.totalorder %s4096_s11, %s3219_s20  ;;  %p3226_p11 = scmp.lt.u32.totalorder %s3219_s20, %s4096_s11 }
  0x90   : > { %p3222_p8 = pnand %p3220_p4, %p3577_p1 }
  0x92   : > { %p3223_p10 = pneg %p3222_p8 }
  0x94   : > { %p3228_p0 = pnand %p3226_p11, %p3223_p10 }
  0x96   : > { %3231 = shalt.err (!%p3228_p0)
}
  0x97   : > { %s3232_s23 = scalar_lea.vmem %s595_s6, 16  ;;  %s3239_s25 = scalar_lea.vmem %s595_s6, 32 }
  0x98   : > { %p3233_p2 = scmp.ne.s32.totalorder %s595_s6, %s3232_s23  ;;  %p3240_p6 = scmp.lt.s32.totalorder %s595_s6, %s595_s6 }
  0x99   : > { %p3241_p7 = scmp.lt.s32.totalorder %s3239_s25, %s3232_s23 }
  0x9a   : > { %p3235_p3 = pnand %p3233_p2, %p3577_p1 }
  0x9b   : > { %p3242_p9 = por %p3241_p7, %p3240_p6 }
  0x9c   : > { %p3236_p5 = pneg %p3235_p3 }
  0x9e   : > { %p3243_p12 = pnand %p3242_p9, %p3236_p5 }
  0xa0   : > { %3246 = shalt.err (!%p3243_p12)
}
  0xa1   : > { %2950 = dma.hbm_to_vmem [thread:$0]  (!%p3563_p13), %s4096_s11, 16, %s595_s6, [#allocation9]  }
  0xa2   : > { %s3247_s19 = scalar_lea.hbm %s4097_s12, 16 }
  0xa3   : > { %p3248_p4 = scmp.ne.s32.totalorder %s4097_s12, %s3247_s19  ;;  %p3254_p11 = scmp.lt.u32.totalorder %s3247_s19, %s4097_s12 }
  0xa5   : > { %p3250_p8 = pnand %p3248_p4, %p3577_p1 }
  0xa7   : > { %p3251_p10 = pneg %p3250_p8 }
  0xa9   : > { %p3256_p0 = pnand %p3254_p11, %p3251_p10 }
  0xab   : > { %3259 = shalt.err (!%p3256_p0)
}
  0xac   : > { %s3260_s29 = scalar_lea.vmem %s606_s17, 16  ;;  %s3267_s6 = scalar_lea.vmem %s606_s17, 32 }
  0xad   : > { %p3261_p2 = scmp.ne.s32.totalorder %s606_s17, %s3260_s29  ;;  %p3268_p6 = scmp.lt.s32.totalorder %s606_s17, %s606_s17 }
  0xae   : > { %p3269_p7 = scmp.lt.s32.totalorder %s3267_s6, %s3260_s29 }
  0xaf   : > { %p3263_p3 = pnand %p3261_p2, %p3577_p1 }
  0xb0   : > { %p3270_p9 = por %p3269_p7, %p3268_p6 }
  0xb1   : > { %p3264_p5 = pneg %p3263_p3 }
  0xb3   : > { %p3271_p12 = pnand %p3270_p9, %p3264_p5 }
  0xb5   : > { %3274 = shalt.err (!%p3271_p12)
}
  0xb6   : > { %2953 = dma.hbm_to_vmem [thread:$0]  (!%p3563_p13), %s4097_s12, 16, %s606_s17, [#allocation12]  }
  0xb7   : > { %p4151_p4 = scmp.ne.s32.totalorder %s4145_s21, 0 }
  0xb8   : > { %p4152_p8 = scmp.ne.s32.totalorder (!%p4151_p4), %s4146_s1, 0 }
  0xb9   : > { %663 = sbr.rel (%p4151_p4) target bundleno = 3393 (0xd41), region = 100 }
  0xc0   : > { %3328 = dma.done.wait (%p4152_p8), [#allocation3], 256  }
  0xc1   : > { %3330 = vsyncadd (%p4152_p8), [#allocation3], 4294967040 }
  0xc2   : > { %3332 = dma.done.wait (%p4152_p8), [#allocation6], 272  }
  0xc3   : > { %3334 = vsyncadd (%p4152_p8), [#allocation6], 4294967024 }
  0xc4   : > { %3336 = dma.done.wait (%p4152_p8), [#allocation9], 272  }
  0xc5   : > { %3338 = vsyncadd (%p4152_p8), [#allocation9], 4294967024 }
  0xc6   : > { %3340 = dma.done.wait (%p4152_p8), [#allocation12], 16  }
  0xc7   : > { %3342 = vsyncadd (%p4152_p8), [#allocation12], 4294967280  ;;  %p751_p13 = scmp.lt.s32.totalorder %s3361_s24, 1  ;;  %v3379_v0 = vmov 0.0   ;;  %vm3380_vm0 = vmmov 0   ;;  %s4153_s17 = sld [smem:[#allocation29_spill]]  ;;  %v988_v27 = vlaneseq }
  0xc8   : > { %2802 = vmatprep.subr.bf16.mxu1 %v3379_v0  ;;  %2806 = vmatprep.mubr.msk.bf16.mxu1 %vm3380_vm0, %v3379_v0  ;;  %v3040_v1 = vld [vmem:[#allocation2] sm:$0xff]   ;;  %v3041_v2 = vld [vmem:[#allocation2 + $0x8] sm:$0xff]   ;;  %vm795_vm1 = vcmask 261120   ;;  %v3042_v4 = vld [vmem:[#allocation5] sm:$0xff]   ;;  %s4154_s2 = sld [smem:[#allocation30_spill]]  ;;  %s3381_s6 = smov 104  }
  0xc9   : > { %s752_s27 = scalar_select %p751_p13, %s3361_s24, 1  ;;  %2818 = vmatprep.subr.bf16.mxu0 %v3379_v0  ;;  %2822 = vmatprep.mubr.msk.bf16.mxu0 %vm3380_vm0, %v3379_v0  ;;  %v3043_v6 = vld [vmem:[#allocation5 + $0x8] sm:$0xff]   ;;  %v2710_v13 = vld [vmem:[%s4092_s7] ss:$0 sm:$0xff]  ;;  %v3045_v22 = vld [vmem:[%s4093_s8 + $0x8] sm:$0xff]   ;;  %v3774_v31 = vshrl.u32 %v988_v27, 7 }
  0xca   : > { %2803 = vmatpush3.bf16.msra.mxu1 %v3040_v1  ;;  %v3044_v17 = vld [vmem:[%s4093_s8] sm:$0xff]   ;;  %s3382_s18 = smov 120   ;;  %s3383_s1 = smov 112   ;;  %v3384_v25 = vmov 1983009808   ;;  %vm1438_vm2 = vcmask 64512  }
  0xcb   : > { %s3723_s21 = sshll.u32 %s752_s27, 3  ;;  %2804 = vmatprep.subr.bf16.mxu1 %v3379_v0  ;;  %v2706_v18 = vld [vmem:[%s4090_s5] ss:$0 sm:$0xff]  ;;  %2819 = vmatpush3.bf16.msra.mxu0 %v3044_v17  ;;  %s4155_s30 = sld [smem:[#allocation31_spill]]  ;;  %v986_v26 = vunpack.c.l.s4 %v3384_v25  ;;  %v3385_v28 = vmov 1934713408  }
  0xcc   : > { %2820 = vmatprep.subr.bf16.mxu0 %v3379_v0  ;;  %v1018_v29 = vunpack.c.l.s4 %v3385_v28  ;;  %vm1685_vm4 = vcmask 1043456   ;;  %s3389_s23 = smov 24   ;;  %vm2227_vm14 = vcmask 130048   ;;  %vm2229_vm15 = vcmask 195584   ;;  %s4161_s26 = sld [smem:[#allocation20_spill]] }
  0xcd   : > { %s3729_s25 = scalar_lea.vmem %s4153_s17, %s3723_s21  ;;  %v987_v30 = vunpack.c.0.s8 %v986_v26  ;;  %s4164_s20 = sld [smem:[#allocation37_spill]] }
  0xce   : > { %v768_v3 = vld [vmem:[%s3729_s25] sm:$0xff]  ;;  %s761_s15 = scalar_lea.vmem %s4154_s2, %s3723_s21  ;;  %2805 = vmatpush3.bf16.msra.mxu1 %v3041_v2  ;;  %v1019_v34 = vunpack.c.0.s8 %v1018_v29  ;;  %s4163_s2 = sld [smem:[#allocation36_spill]] }
  0xcf   : > { %v771_v5 = vpack.c.bf16 %v768_v3, %v768_v3  ;;  %2810 = vmatprep.subr.bf16.mxu1 %v3379_v0  ;;  %v769_v7 = vld [vmem:[%s761_s15] sm:$0xff]  ;;  %2821 = vmatpush3.bf16.msra.mxu0 %v3045_v22  ;;  %v3777_v35 = vsub.s32 %v987_v30, %v3774_v31  ;;  %s4156_s15 = sld [smem:[#allocation28_spill]]  ;;  %s2760_s3 = sshll.u32 %s3361_s24, 7 }
  0xd0   : > { %v839_v8 = vpack.c.bf16 %v769_v7, %v769_v7  ;;  %2832 = vmatprep.subr.bf16.mxu0 %v3379_v0  ;;  %v3780_v42 = vsub.s32 %v1019_v34, %v3774_v31  ;;  %s3390_s24 = smov [#allocation13]  }
  0xd1   : > { %2807 = vmatmul.mubr.msk.bf16.vlgmr.msra.gmra.mrb[0].mxu1 %vm795_vm1, %v771_v5  ;;  %s765_s4 = scalar_lea.vmem %s4155_s30, %s3723_s21  ;;  %s4162_s30 = sld [smem:[#allocation25_spill]] }
  0xd2   : > { %2811 = vmatpush3.bf16.msra.mxu1 %v3042_v4  ;;  %2814 = vmatprep.mubr.msk.bf16.mxu1 %vm3380_vm0, %v3379_v0  ;;  %v770_v23 = vld [vmem:[%s765_s4] sm:$0xff]  ;;  %s748_s17 = sand.u32 1, %s4161_s26  }
  0xd3   : > { %2812 = vmatprep.subr.bf16.mxu1 %v3379_v0  ;;  %v906_v24 = vpack.c.bf16 %v770_v23, %v770_v23  ;;  %s2516_s26 = scalar_lea.sflag [#allocation4], %s748_s17 }
  0xd5   : > { %2823 = vmatmul.mubr.msk.bf16.vlgmr.msra.gmra.mrb[0].mxu0 %vm795_vm1, %v906_v24 }
  0xd6   : > { %2813 = vmatpush3.bf16.msra.mxu1 %v3043_v6  ;;  %2834 = vmatprep.mubr.msk.bf16.mxu0 %vm3380_vm0, %v3379_v0 }
  0xd7   : > { %2826 = vmatprep.subr.bf16.mxu1 %v3379_v0  ;;  %p4167_p10 = scmp.ne.s32.totalorder %s4162_s30, 0 }
  0xd9   : > { %2815 = vmatmul.mubr.msk.bf16.vlgmr.msra.gmra.mrb[4].mxu1 %vm795_vm1, %v839_v8 }
  0xda   : > { %2828 = vmatprep.mubr.msk.bf16.mxu1 %vm3380_vm0, %v3379_v0 }
 0x1a4   : > { %v833_v9 = vpop.f32.mrb[0].mxu1 }
 0x1a5   : > { %v2808_v10 = vpop.f32.mrb[1].mxu1  ;;  %v834_v21 = vadd.f32 %v2706_v18, %v833_v9 }
 0x1a6   : > { %v836_v11 = vpop.f32.mrb[2].mxu1 }
 0x1a7   : > { %v2809_v12 = vpop.f32.mrb[3].mxu1 }
 0x1ac   : > { %v900_v14 = vpop.f32.mrb[4].mxu1 }
 0x1ad   : > { %v901_v15 = vadd.f32 %v2710_v13, %v900_v14  ;;  %v2816_v16 = vpop.f32.mrb[5].mxu1 }
 0x1ae   : > { %v903_v19 = vpop.f32.mrb[6].mxu1 }
 0x1af   : > { %1130 = vrot.lane.b32.xlu1 %v901_v15, %s3381_s6  ;;  %1124 = vrot.lane.b32.xlu0 %v901_v15, %s3382_s18  ;;  %v2817_v20 = vpop.f32.mrb[7].mxu1 }
 0x1b3   : > { %974 = vrot.lane.b32.xlu1 %v834_v21, %s3382_s18  ;;  %1127 = vrot.lane.b32.xlu0 %v901_v15, %s3383_s1 }
 0x1b7   : > { %980 = vrot.lane.b32.xlu1 %v834_v21, %s3381_s6  ;;  %977 = vrot.lane.b32.xlu0 %v834_v21, %s3383_s1 }
 0x221   : > { %v1131_v32 = vpop.permute.xlu1 %1130  ;;  %v1125_v33 = vpop.permute.xlu0 %1124 }
 0x222   : > { %v1149_v36 = vcombine.low %v1125_v33, %v1131_v32  ;;  %v1150_v37 = vcombine.high %v1125_v33, %v1131_v32 }
 0x224   : > { %v1157_v43 = vrot.slane %v1149_v36, %v3777_v35  ;;  %v1164_v44 = vrot.slane %v1150_v37, %v3777_v35 }
 0x225   : > { %v975_v38 = vpop.permute.xlu1 %974  ;;  %v1128_v39 = vpop.permute.xlu0 %1127 }
 0x226   : > { %v1133_v40 = vcombine.low %v901_v15, %v1128_v39  ;;  %v1134_v41 = vcombine.high %v901_v15, %v1128_v39 }
 0x228   : > { %v1141_v45 = vrot.slane %v1133_v40, %v3777_v35  ;;  %v1148_v46 = vrot.slane %v1134_v41, %v3777_v35 }
 0x229   : > { %v981_v47 = vpop.permute.xlu1 %980  ;;  %v978_v48 = vpop.permute.xlu0 %977 }
 0x22a   : > { %v1165_v49 = vcombine.low %v1141_v45, %v1157_v43  ;;  %v1166_v50 = vcombine.high %v1141_v45, %v1157_v43  ;;  %v1181_v51 = vcombine.low %v1148_v46, %v1164_v44  ;;  %v1182_v52 = vcombine.high %v1148_v46, %v1164_v44 }
 0x22b   : > { %v999_v53 = vcombine.low %v975_v38, %v981_v47  ;;  %v1000_v54 = vcombine.high %v975_v38, %v981_v47  ;;  %v983_v55 = vcombine.low %v834_v21, %v978_v48  ;;  %v984_v56 = vcombine.high %v834_v21, %v978_v48 }
 0x22c   : > { %v1173_v57 = vrot.slane %v1165_v49, %v3780_v42  ;;  %v1180_v58 = vrot.slane %v1166_v50, %v3780_v42  ;;  %v1189_v59 = vrot.slane %v1181_v51, %v3780_v42  ;;  %v1196_v60 = vrot.slane %v1182_v52, %v3780_v42 }
 0x22d   : > { %v1007_v61 = vrot.slane %v999_v53, %v3777_v35  ;;  %v1014_v62 = vrot.slane %v1000_v54, %v3777_v35  ;;  %v991_v63 = vrot.slane %v983_v55, %v3777_v35  ;;  %v998_v1 = vrot.slane %v984_v56, %v3777_v35 }
 0x22e   : > { %v1201_v2 = vcombine.low %v1173_v57, %v1180_v58  ;;  %v2720_v3 = vcombine.high %v1173_v57, %v1180_v58  ;;  %v1217_v4 = vcombine.low %v1189_v59, %v1196_v60  ;;  %v2721_v5 = vcombine.high %v1189_v59, %v1196_v60 }
 0x22f   : > { %v1015_v6 = vcombine.low %v991_v63, %v1007_v61  ;;  %v1016_v7 = vcombine.high %v991_v63, %v1007_v61  ;;  %v1031_v8 = vcombine.low %v998_v1, %v1014_v62  ;;  %v1032_v9 = vcombine.high %v998_v1, %v1014_v62 }
 0x230   : > { %v1208_v10 = vrot.slane %v1201_v2, %v3777_v35  ;;  %v1216_v11 = vrot.slane %v2720_v3, %v3777_v35  ;;  %v1224_v12 = vrot.slane %v1217_v4, %v3777_v35  ;;  %v1232_v13 = vrot.slane %v2721_v5, %v3777_v35  ;;  %v3831_v3 = vpop.f32.mrb[0].mxu0 }
 0x231   : > { %v1023_v14 = vrot.slane %v1015_v6, %v3780_v42  ;;  %v1030_v15 = vrot.slane %v1016_v7, %v3780_v42  ;;  %v1039_v16 = vrot.slane %v1031_v8, %v3780_v42  ;;  %v1046_v17 = vrot.slane %v1032_v9, %v3780_v42  ;;  %v2824_v4 = vpop.f32.mrb[1].mxu0 }
 0x232   : > { %v1233_v18 = vcombine.low %v1208_v10, %v1216_v11  ;;  %v1249_v19 = vcombine.low %v1224_v12, %v1232_v13  ;;  %v1234_v20 = vcombine.high %v1208_v10, %v1216_v11  ;;  %v1250_v21 = vcombine.high %v1224_v12, %v1232_v13  ;;  %v970_v5 = vpop.f32.mrb[2].mxu0 }
 0x233   : > { %v1051_v22 = vcombine.low %v1023_v14, %v1030_v15  ;;  %v2718_v23 = vcombine.high %v1023_v14, %v1030_v15  ;;  %v1067_v24 = vcombine.low %v1039_v16, %v1046_v17  ;;  %v2719_v25 = vcombine.high %v1039_v16, %v1046_v17  ;;  %v2825_v6 = vpop.f32.mrb[3].mxu0 }
 0x234   : > { %v1241_v26 = vrot.slane %v1233_v18, %v3780_v42  ;;  %v1257_v28 = vrot.slane %v1249_v19, %v3780_v42  ;;  %v1248_v37 = vrot.slane %v1234_v20, %v3780_v42  ;;  %v1264_v38 = vrot.slane %v1250_v21, %v3780_v42 }
 0x235   : > { %v1058_v29 = vrot.slane %v1051_v22, %v3777_v35  ;;  %v1066_v30 = vrot.slane %v2718_v23, %v3777_v35  ;;  %v1074_v32 = vrot.slane %v1067_v24, %v3777_v35  ;;  %v1082_v33 = vrot.slane %v2719_v25, %v3777_v35 }
 0x236   : > { %v1265_v34 = vcombine.low %v1241_v26, %v1257_v28  ;;  %v1266_v36 = vcombine.high %v1241_v26, %v1257_v28  ;;  %v1267_v48 = vcombine.low %v1248_v37, %v1264_v38  ;;  %v1268_v49 = vcombine.high %v1248_v37, %v1264_v38 }
 0x237   : > { %v1083_v39 = vcombine.low %v1058_v29, %v1066_v30  ;;  %v1099_v40 = vcombine.low %v1074_v32, %v1082_v33  ;;  %v1084_v50 = vcombine.high %v1058_v29, %v1066_v30  ;;  %v1100_v51 = vcombine.high %v1074_v32, %v1082_v33 }
 0x238   : > { %v1269_v41 = vpack.c.bf16 %v1265_v34, %v1265_v34  ;;  %v1270_v43 = vpack.c.bf16 %v1266_v36, %v1266_v36  ;;  %v1271_v54 = vpack.c.bf16 %v1267_v48, %v1267_v48  ;;  %v1272_v55 = vpack.c.bf16 %v1268_v49, %v1268_v49 }
 0x239   : > { %v1091_v44 = vrot.slane %v1083_v39, %v3780_v42  ;;  %v1107_v45 = vrot.slane %v1099_v40, %v3780_v42  ;;  %v1098_v58 = vrot.slane %v1084_v50, %v3780_v42  ;;  %v1114_v59 = vrot.slane %v1100_v51, %v3780_v42 }
 0x23a   : > { %v1443_v46 = vsel %vm1438_vm2, %v1269_v41, 0  ;;  %v1489_v47 = vsel %vm1438_vm2, %v1270_v43, 0  ;;  %v1535_v60 = vsel %vm1438_vm2, %v1271_v54, 0  ;;  %v1581_v61 = vsel %vm1438_vm2, %v1272_v55, 0 }
 0x23b   : > { %2827 = vmatpush3.bf16.xpose.msra.mxu1 %v1443_v46  ;;  %2833 = vmatpush3.bf16.xpose.msra.mxu0 %v1489_v47  ;;  %v1115_v52 = vcombine.low %v1091_v44, %v1107_v45  ;;  %v1116_v53 = vcombine.high %v1091_v44, %v1107_v45  ;;  %v1117_v62 = vcombine.low %v1098_v58, %v1114_v59  ;;  %v1428_v55 = vand.u32 127, %v988_v27  ;;  %v2732_v27 = vld [vmem:[%s4156_s15 + $0x1] ss:$0 sm:$0xff] }
 0x23c   : > { %2838 = vmatprep.subr.bf16.mxu1 %v3379_v0  ;;  %2844 = vmatprep.subr.bf16.mxu0 %v3379_v0  ;;  %v1118_v63 = vcombine.high %v1098_v58, %v1114_v59  ;;  %v2731_v59 = vld [vmem:[%s4156_s15] ss:$0 sm:$0xff] }
 0x23d   : > { %v1119_v56 = vpack.c.bf16 %v1115_v52, %v1115_v52  ;;  %v1120_v57 = vpack.c.bf16 %v1116_v53, %v1116_v53  ;;  %v1121_v1 = vpack.c.bf16 %v1117_v62, %v1117_v62  ;;  %vm1435_vm3 = vcmp.gt.s32.totalorder %v3774_v31, %v1428_v55  ;;  %v2734_v62 = vld [vmem:[%s4156_s15 + $0x3] ss:$0 sm:$0xff] }
 0x23e   : > { %v1122_v2 = vpack.c.bf16 %v1118_v63, %v1118_v63  ;;  %vm3876_vm5 = vcmp.lt.s32.totalorder %v1428_v55, %v3774_v31 }
 0x242   : > { %2829 = vmatmul.mubr.msk.bf16.vlgmr.msra.gmra.mrb[8].mxu1 %vm1438_vm2, %v1119_v56  ;;  %2835 = vmatmul.mubr.msk.bf16.vlgmr.msra.gmra.mrb[4].mxu0 %vm1438_vm2, %v1120_v57  ;;  %v1436_v56 = vsel %vm1435_vm3, 1.0, %v3379_v0  ;;  %vm2291_vm3 = vcmp.eq.s32.totalorder %v3774_v31, 0 }
 0x243   : > { %2839 = vmatpush3.bf16.xpose.msra.mxu1 %v1535_v60  ;;  %2845 = vmatpush3.bf16.xpose.msra.mxu0 %v1581_v61  ;;  %v1437_v57 = vpack.c.bf16 %v1436_v56, %v1436_v56  ;;  %v3386_v60 = vmov 0   ;;  %v2733_v61 = vld [vmem:[%s4156_s15 + $0x2] ss:$0 sm:$0xff] }
 0x244   : > { %2840 = vmatprep.mubr.msk.bf16.mxu1 %vm3380_vm0, %v3379_v0  ;;  %2846 = vmatprep.mubr.msk.bf16.mxu0 %vm3380_vm0, %v3379_v0 }
 0x245   : > { %2856 = vmatprep.subr.bf16.mxu0 %v3379_v0  ;;  %2908 = vmatprep.subr.msk.bf16.mxu1 %vm1685_vm4, %v1437_v57  ;;  %v1687_v58 = vsel %vm1685_vm4, %v1437_v57, 0 }
 0x246   : > { %3038 = vset.pattern.permute.xlu1 %v3386_v60  ;;  %3039 = vset.pattern.permute.xlu0 %v3386_v60 }
 0x24a   : > { %2841 = vmatmul.mubr.msk.bf16.vlgmr.msra.gmra.mrb[12].mxu1 %vm1438_vm2, %v1121_v1  ;;  %2847 = vmatmul.mubr.msk.bf16.vlgmr.msra.gmra.mrb[8].mxu0 %vm1438_vm2, %v1122_v2 }
 0x24b   : > { %2858 = vmatprep.mubr.msk.bf16.mxu0 %vm3380_vm0, %v3379_v0  ;;  %2851 = vmatpush3.bf16.msra.mxu1 %v1687_v58 }
 0x24c   : > { %2862 = vmatprep.subr.bf16.mxu1 %v3379_v0 }
 0x315   : > { %v1479_v7 = vpop.f32.mrb[8].mxu1  ;;  %v1525_v8 = vpop.f32.mrb[4].mxu0 }
 0x316   : > { %v3833_v9 = vmul.f32 0.35355338, %v1479_v7  ;;  %v3835_v10 = vmul.f32 0.35355338, %v1525_v8  ;;  %v2830_v11 = vpop.f32.mrb[9].mxu1  ;;  %v2836_v12 = vpop.f32.mrb[5].mxu0 }
 0x317   : > { %v1482_v13 = vpop.f32.mrb[10].mxu1  ;;  %v1528_v14 = vpop.f32.mrb[6].mxu0 }
 0x318   : > { %v2831_v15 = vpop.f32.mrb[11].mxu1  ;;  %v2837_v16 = vpop.f32.mrb[7].mxu0  ;;  %v1630_v17 = vsel %vm1438_vm2, %v3835_v10, -inf  ;;  %v1627_v18 = vsel %vm1438_vm2, %v3833_v9, -inf }
 0x319   : > { %1631 = vmax.xlane.f32.xlu1 %v1630_v17  ;;  %1628 = vmax.xlane.f32.xlu0 %v1627_v18 }
 0x31d   : > { %v1571_v19 = vpop.f32.mrb[12].mxu1  ;;  %v1617_v20 = vpop.f32.mrb[8].mxu0 }
 0x31e   : > { %v3841_v21 = vmul.f32 0.35355338, %v1571_v19  ;;  %v2842_v22 = vpop.f32.mrb[13].mxu1  ;;  %v2848_v23 = vpop.f32.mrb[9].mxu0  ;;  %v3843_v26 = vmul.f32 0.35355338, %v1617_v20 }
 0x31f   : > { %v1574_v24 = vpop.f32.mrb[14].mxu1  ;;  %v1620_v25 = vpop.f32.mrb[10].mxu0  ;;  %v1430_v23 = vsub.s32 %v3774_v31, %v1428_v55  ;;  %v3048_v31 = vld [vmem:[%s4099_s14] sm:$0xff]  }
 0x320   : > { %v2843_v28 = vpop.f32.mrb[15].mxu1  ;;  %v2849_v29 = vpop.f32.mrb[11].mxu0  ;;  %v1633_v30 = vsel %vm1438_vm2, %v3841_v21, -inf  ;;  %v1636_v32 = vsel %vm1438_vm2, %v3843_v26, -inf }
 0x321   : > { %1634 = vmax.xlane.f32.xlu0 %v1633_v30  ;;  %v1432_v24 = vsub.s32 0, %v1430_v23 }
 0x323   : > { %v2724_v25 = vmin.u32 %v1432_v24, %v1430_v23 }
 0x325   : > { %1637 = vmax.xlane.f32.xlu0 %v1636_v32  ;;  %v1434_v28 = vcvt.s32.f32 %v2724_v25 }
 0x3a6   : > { %v1632_v33 = vpop.xlane.xlu1 %1631  ;;  %v1629_v34 = vpop.xlane.xlu0 %1628 }
 0x3a7   : > { %v1640_v36 = vsub.f32 %v3835_v10, %v1632_v33  ;;  %v1639_v37 = vsub.f32 %v3833_v9, %v1629_v34 }
 0x3a9   : > { %v1645_v38 = vmul.f32 1.442695, %v1640_v36  ;;  %v1643_v39 = vmul.f32 1.442695, %v1639_v37 }
 0x3ab   : > { %3054 = vpow2.f32 %v1645_v38 }
 0x3ac   : > { %3056 = vpow2.f32 %v1643_v39 }
 0x3ae   : > { %v1635_v40 = vpop.xlane.xlu0 %1634 }
 0x3af   : > { %v1641_v41 = vsub.f32 %v3841_v21, %v1635_v40 }
 0x3b1   : > { %v1647_v43 = vmul.f32 1.442695, %v1641_v41 }
 0x3b2   : > { %v1638_v44 = vpop.xlane.xlu0 %1637 }
 0x3b3   : > { %3058 = vpow2.f32 %v1647_v43  ;;  %v1642_v45 = vsub.f32 %v3843_v26, %v1638_v44 }
 0x3b5   : > { %v3055_v46 = vpop.eup %3054  ;;  %v1649_v47 = vmul.f32 1.442695, %v1642_v45 }
 0x3b6   : > { %v3057_v48 = vpop.eup %3056  ;;  %v1654_v49 = vsel %vm1438_vm2, %v3055_v46, 0.0 }
 0x3b7   : > { %3060 = vpow2.f32 %v1649_v47  ;;  %v1651_v50 = vsel %vm1438_vm2, %v3057_v48, 0.0  ;;  %1655 = vadd.xlane.f32.xlu0 %v1654_v49 }
 0x3b8   : > { %1652 = vadd.xlane.f32.xlu1 %v1651_v50 }
 0x3bd   : > { %v3059_v51 = vpop.eup %3058 }
 0x3be   : > { %v1657_v52 = vsel %vm1438_vm2, %v3059_v51, 0.0 }
 0x3bf   : > { %1658 = vadd.xlane.f32.xlu1 %v1657_v52 }
 0x3c1   : > { %v3061_v53 = vpop.eup %3060 }
 0x3c2   : > { %v1660_v54 = vsel %vm1438_vm2, %v3061_v53, 0.0 }
 0x3c3   : > { %1661 = vadd.xlane.f32.xlu0 %v1660_v54 }
 0x3d0   : > { %1799 = vperm.xlu1 %3038, %v2731_v59  }
 0x3d4   : > { %1807 = vperm.xlu1 %3038, %v2733_v61  }
 0x3d8   : > { %1811 = vperm.xlu1 %3038, %v2734_v62  }
 0x3d9   : > { %1803 = vperm.xlu0 %3039, %v2732_v27  }
 0x444   : > { %v1656_v63 = vpop.xlane.xlu0 %1655 }
 0x445   : > { %v1653_v1 = vpop.xlane.xlu1 %1652  ;;  %3062 = vrcp.f32 %v1656_v63 }
 0x446   : > { %3064 = vrcp.f32 %v1653_v1 }
 0x44c   : > { %v1659_v2 = vpop.xlane.xlu1 %1658 }
 0x44d   : > { %3066 = vrcp.f32 %v1659_v2 }
 0x44f   : > { %v3063_v4 = vpop.eup %3062 }
 0x450   : > { %v3065_v6 = vpop.eup %3064  ;;  %v1662_v7 = vpop.xlane.xlu0 %1661  ;;  %v1668_v8 = vmul.f32 %v3063_v4, %v3055_v46 }
 0x451   : > { %3068 = vrcp.f32 %v1662_v7  ;;  %v1667_v11 = vmul.f32 %v3065_v6, %v3057_v48  ;;  %v1800_v44 = vpop.permute.xlu1 %1799 }
 0x452   : > { %v1674_v12 = vsel %vm3876_vm5, %v1668_v8, 0.0 }
 0x453   : > { %v1673_v13 = vsel %vm3876_vm5, %v1667_v11, 0.0 }
 0x454   : > { %v1677_v14 = vpack.c.bf16 %v1674_v12, %v1673_v13 }
 0x455   : > { %v1808_v45 = vpop.permute.xlu1 %1807 }
 0x456   : > { %2852 = vmatprep.mubr.msk.bf16.mxu1 %vm1438_vm2, %v1677_v14 }
 0x457   : > { %v3067_v15 = vpop.eup %3066 }
 0x458   : > { %v1669_v16 = vmul.f32 %v3067_v15, %v3059_v51  ;;  %v1804_v63 = vpop.permute.xlu0 %1803 }
 0x459   : > { %v1812_v59 = vpop.permute.xlu1 %1811 }
 0x45a   : > { %v1675_v19 = vsel %vm3876_vm5, %v1669_v16, 0.0 }
 0x45b   : > { %v3069_v17 = vpop.eup %3068 }
 0x45c   : > { %v1670_v18 = vmul.f32 %v3069_v17, %v3061_v53 }
 0x45e   : > { %v1676_v20 = vsel %vm3876_vm5, %v1670_v18, 0.0 }
 0x45f   : > { %v1678_v22 = vpack.c.bf16 %v1676_v20, %v1675_v19 }
 0x461   : > { %2853 = vmatmul.mubr.msk.bf16.vlgmr.msra.gmra.mrb[16].mxu1 %vm1438_vm2, %v1678_v22 }
 0x462   : > { %2864 = vmatprep.mubr.msk.bf16.mxu1 %vm3380_vm0, %v3379_v0 }
 0x534   : > { %v2854_v29 = vpop.f32.mrb[16].mxu1 }
 0x535   : > { %v1740_v30 = vmul.f32 %v2854_v29, %v1434_v28  ;;  %v1723_v32 = vpop.f32.mrb[17].mxu1 }
 0x536   : > { %v1738_v33 = vmul.f32 %v1723_v32, %v1434_v28  ;;  %v2855_v34 = vpop.f32.mrb[18].mxu1 }
 0x537   : > { %v1744_v36 = vmax.f32 %v1740_v30, 0.0  ;;  %v1741_v37 = vmul.f32 %v2855_v34, %v1434_v28  ;;  %v1726_v38 = vpop.f32.mrb[19].mxu1 }
 0x538   : > { %v1742_v39 = vmax.f32 %v1738_v33, 0.0  ;;  %v1739_v40 = vmul.f32 %v1726_v38, %v1434_v28 }
 0x539   : > { %3070 = vrsqrt.f32 %v1744_v36  ;;  %v1745_v41 = vmax.f32 %v1741_v37, 0.0  ;;  %vm1762_vm6 = vcmp.eq.f32.partialorder %v1744_v36, inf  ;;  %vm1764_vm9 = vcmp.eq.f32.partialorder %v1744_v36, 0.0 }
 0x53a   : > { %3072 = vrsqrt.f32 %v1742_v39  ;;  %v1743_v43 = vmax.f32 %v1739_v40, 0.0  ;;  %vm1748_vm7 = vcmp.eq.f32.partialorder %v1742_v39, inf  ;;  %vm1750_vm8 = vcmp.eq.f32.partialorder %v1742_v39, 0.0 }
 0x53b   : > { %3074 = vrsqrt.f32 %v1745_v41  ;;  %v1751_v51 = vand.u32 2147483648, %v1742_v39  ;;  %v1765_v52 = vand.u32 2147483648, %v1744_v36  ;;  %vm1769_vm10 = vcmp.eq.f32.partialorder %v1745_v41, inf }
 0x53c   : > { %3076 = vrsqrt.f32 %v1743_v43  ;;  %vm1771_vm11 = vcmp.eq.f32.partialorder %v1745_v41, 0.0  ;;  %v1772_v56 = vand.u32 2147483648, %v1745_v41  ;;  %vm1755_vm12 = vcmp.eq.f32.partialorder %v1743_v43, inf }
 0x53d   : > { %v1758_v1 = vand.u32 2147483648, %v1743_v43  ;;  %vm1757_vm13 = vcmp.eq.f32.partialorder %v1743_v43, 0.0 }
 0x543   : > { %v3071_v46 = vpop.eup %3070 }
 0x544   : > { %v3073_v47 = vpop.eup %3072  ;;  %v1761_v48 = vmul.f32 %v3071_v46, %v1744_v36 }
 0x545   : > { %v3075_v49 = vpop.eup %3074  ;;  %v1747_v50 = vmul.f32 %v3073_v47, %v1742_v39 }
 0x546   : > { %v3077_v53 = vpop.eup %3076  ;;  %v1763_v54 = vsel %vm1762_vm6, %v1744_v36, %v1761_v48  ;;  %v1768_v55 = vmul.f32 %v3075_v49, %v1745_v41 }
 0x547   : > { %v1749_v57 = vsel %vm1748_vm7, %v1742_v39, %v1747_v50  ;;  %v1766_v58 = vsel %vm1764_vm9, %v1765_v52, %v1763_v54  ;;  %v1754_v60 = vmul.f32 %v3077_v53, %v1743_v43 }
 0x548   : > { %v1752_v27 = vsel %vm1750_vm8, %v1751_v51, %v1749_v57  ;;  %v1816_v61 = vmul.f32 %v1808_v45, %v1766_v58  ;;  %v1770_v62 = vsel %vm1769_vm10, %v1745_v41, %v1768_v55 }
 0x549   : > { %v1814_v2 = vmul.f32 %v1800_v44, %v1752_v27  ;;  %v1773_v4 = vsel %vm1771_vm11, %v1772_v56, %v1770_v62  ;;  %v1756_v6 = vsel %vm1755_vm12, %v1743_v43, %v1754_v60  ;;  %v2714_v43 = vld [vmem:[#allocation7] ss:$0 sm:$0xff] }
 0x54a   : > { %v1822_v7 = vmul.f32 1.442695, %v1816_v61  ;;  %v1817_v8 = vmul.f32 %v1812_v59, %v1773_v4  ;;  %v1759_v11 = vsel %vm1757_vm13, %v1758_v1, %v1756_v6  ;;  %v968_v44 = vadd.f32 %v2714_v43, %v3831_v3 }
 0x54b   : > { %v1818_v12 = vmul.f32 1.442695, %v1814_v2  ;;  %v1815_v13 = vmul.f32 %v1804_v63, %v1759_v11 }
 0x54c   : > { %3078 = vpow2.f32 %v1822_v7  ;;  %v1824_v14 = vmul.f32 1.442695, %v1817_v8 }
 0x54d   : > { %3080 = vpow2.f32 %v1818_v12  ;;  %v1820_v15 = vmul.f32 1.442695, %v1815_v13 }
 0x54e   : > { %3082 = vpow2.f32 %v1824_v14 }
 0x54f   : > { %3084 = vpow2.f32 %v1820_v15 }
 0x556   : > { %v3079_v16 = vpop.eup %3078 }
 0x557   : > { %v3081_v17 = vpop.eup %3080  ;;  %v1828_v18 = vmax.f32 %v3079_v16, 1e-05 }
 0x558   : > { %v3083_v19 = vpop.eup %3082  ;;  %v1826_v20 = vmax.f32 %v3081_v17, 1e-05 }
 0x559   : > { %v3085_v22 = vpop.eup %3084  ;;  %v1832_v23 = vmin.f32 %v1828_v18, 100000.0  ;;  %v1829_v24 = vmax.f32 %v3083_v19, 1e-05 }
 0x55a   : > { %v1830_v25 = vmin.f32 %v1826_v20, 100000.0  ;;  %v1827_v28 = vmax.f32 %v3085_v22, 1e-05 }
 0x55b   : > { %v1833_v29 = vmin.f32 %v1829_v24, 100000.0  ;;  %v1836_v33 = vmul.f32 %v1832_v23, %v3841_v21 }
 0x55c   : > { %v1831_v30 = vmin.f32 %v1827_v28, 100000.0  ;;  %v1834_v32 = vmul.f32 %v1830_v25, %v3833_v9 }
 0x55d   : > { %v1840_v39 = vsel %vm3876_vm5, %v1836_v33, -1e+20  ;;  %v1837_v40 = vmul.f32 %v1833_v29, %v3843_v26 }
 0x55e   : > { %v1838_v34 = vsel %vm3876_vm5, %v1834_v32, -1e+20  ;;  %v1835_v36 = vmul.f32 %v1831_v30, %v3835_v10  ;;  %v1848_v21 = vsel %vm1438_vm2, %v1840_v39, -inf }
 0x55f   : > { %v1842_v37 = vsel %vm1438_vm2, %v1838_v34, -inf  ;;  %v1841_v10 = vsel %vm3876_vm5, %v1837_v40, -1e+20 }
 0x560   : > { %1843 = vmax.xlane.f32.xlu1 %v1842_v37  ;;  %v1839_v38 = vsel %vm3876_vm5, %v1835_v36, -1e+20  ;;  %v1851_v41 = vsel %vm1438_vm2, %v1841_v10, -inf }
 0x561   : > { %v1845_v9 = vsel %vm1438_vm2, %v1839_v38, -inf }
 0x562   : > { %1846 = vmax.xlane.f32.xlu0 %v1845_v9 }
 0x564   : > { %1849 = vmax.xlane.f32.xlu1 %v1848_v21 }
 0x568   : > { %1852 = vmax.xlane.f32.xlu1 %v1851_v41 }
 0x578   : > { %1277 = vrot.lane.b32.xlu0 %v968_v44, %s3383_s1  ;;  %s4160_s1 = sld [smem:[#allocation35_spill]] }
 0x579   : > { %1274 = vrot.lane.b32.xlu1 %v968_v44, %s3382_s18  ;;  %s3388_s18 = smov 8  }
 0x5ed   : > { %v1844_v26 = vpop.xlane.xlu1 %1843 }
 0x5ee   : > { %v1854_v45 = vsub.f32 %v1838_v34, %v1844_v26 }
 0x5ef   : > { %v1847_v46 = vpop.xlane.xlu0 %1846 }
 0x5f0   : > { %v1858_v47 = vmul.f32 1.442695, %v1854_v45  ;;  %v1855_v48 = vsub.f32 %v1839_v38, %v1847_v46 }
 0x5f1   : > { %v1850_v49 = vpop.xlane.xlu1 %1849 }
 0x5f2   : > { %3086 = vpow2.f32 %v1858_v47  ;;  %v1860_v50 = vmul.f32 1.442695, %v1855_v48  ;;  %v1856_v58 = vsub.f32 %v1840_v39, %v1850_v49 }
 0x5f3   : > { %v1278_v63 = vpop.permute.xlu0 %1277 }
 0x5f4   : > { %3088 = vpow2.f32 %v1860_v50  ;;  %v1862_v59 = vmul.f32 1.442695, %v1856_v58  ;;  %v1283_v2 = vcombine.low %v968_v44, %v1278_v63  ;;  %v1284_v4 = vcombine.high %v968_v44, %v1278_v63 }
 0x5f5   : > { %v1853_v5 = vpop.xlane.xlu1 %1852 }
 0x5f6   : > { %v1857_v51 = vsub.f32 %v1841_v10, %v1853_v5  ;;  %v1291_v11 = vrot.slane %v1283_v2, %v3777_v35  ;;  %v1298_v12 = vrot.slane %v1284_v4, %v3777_v35 }
 0x5f8   : > { %v1864_v52 = vmul.f32 1.442695, %v1857_v51 }
 0x5f9   : > { %v1275_v61 = vpop.permute.xlu1 %1274 }
 0x5fa   : > { %3090 = vpow2.f32 %v1864_v52 }
 0x5fb   : > { %3092 = vpow2.f32 %v1862_v59 }
 0x5fc   : > { %v3913_v53 = vpop.eup %3086 }
 0x5fd   : > { %v1866_v3 = vsel %vm1438_vm2, %v3913_v53, 0.0 }
 0x5fe   : > { %v3089_v54 = vpop.eup %3088  ;;  %1867 = vadd.xlane.f32.xlu1 %v1866_v3 }
 0x5ff   : > { %v1869_v55 = vsel %vm1438_vm2, %v3089_v54, 0.0 }
 0x602   : > { %1870 = vadd.xlane.f32.xlu1 %v1869_v55 }
 0x604   : > { %v3918_v56 = vpop.eup %3090 }
 0x605   : > { %v1875_v57 = vsel %vm1438_vm2, %v3918_v56, 0.0  ;;  %v3923_v60 = vpop.eup %3092 }
 0x606   : > { %1876 = vadd.xlane.f32.xlu0 %v1875_v57  ;;  %v1872_v27 = vsel %vm1438_vm2, %v3923_v60, 0.0 }
 0x613   : > { %1280 = vrot.lane.b32.xlu1 %v968_v44, %s3381_s6  ;;  %s3387_s6 = smov 16  }
 0x637   : > { %1873 = vadd.xlane.f32.xlu1 %v1872_v27 }
 0x68b   : > { %v1868_v62 = vpop.xlane.xlu1 %1867 }
 0x68c   : > { %3094 = vrcp.f32 %v1868_v62 }
 0x68f   : > { %v1871_v1 = vpop.xlane.xlu1 %1870 }
 0x690   : > { %3096 = vrcp.f32 %v1871_v1 }
 0x693   : > { %v1281_v6 = vpop.permute.xlu1 %1280  ;;  %v1877_v36 = vpop.xlane.xlu0 %1876 }
 0x694   : > { %v1299_v7 = vcombine.low %v1275_v61, %v1281_v6  ;;  %v1300_v8 = vcombine.high %v1275_v61, %v1281_v6  ;;  %3098 = vrcp.f32 %v1877_v36 }
 0x696   : > { %v1307_v13 = vrot.slane %v1299_v7, %v3777_v35  ;;  %v1314_v14 = vrot.slane %v1300_v8, %v3777_v35  ;;  %v3095_v9 = vpop.eup %3094 }
 0x697   : > { %v1886_v48 = vmul.f32 %v3095_v9, %v3913_v53 }
 0x698   : > { %v1315_v15 = vcombine.low %v1291_v11, %v1307_v13  ;;  %v1316_v16 = vcombine.high %v1291_v11, %v1307_v13  ;;  %v1331_v17 = vcombine.low %v1298_v12, %v1314_v14  ;;  %v1332_v18 = vcombine.high %v1298_v12, %v1314_v14 }
 0x699   : > { %v1890_v57 = vpack.c.bf16 %v1886_v48, %v1886_v48 }
 0x69a   : > { %v1323_v19 = vrot.slane %v1315_v15, %v3780_v42  ;;  %v1330_v20 = vrot.slane %v1316_v16, %v3780_v42  ;;  %v1339_v22 = vrot.slane %v1331_v17, %v3780_v42  ;;  %v1346_v23 = vrot.slane %v1332_v18, %v3780_v42  ;;  %v3097_v44 = vpop.eup %3096 }
 0x69b   : > { %v1887_v49 = vmul.f32 %v3097_v44, %v3089_v54 }
 0x69c   : > { %v1351_v24 = vcombine.low %v1323_v19, %v1330_v20  ;;  %v2722_v25 = vcombine.high %v1323_v19, %v1330_v20  ;;  %v1367_v28 = vcombine.low %v1339_v22, %v1346_v23  ;;  %v2723_v29 = vcombine.high %v1339_v22, %v1346_v23 }
 0x69d   : > { %v1891_v58 = vpack.c.bf16 %v1887_v49, %v1887_v49 }
 0x69e   : > { %v1358_v30 = vrot.slane %v1351_v24, %v3777_v35  ;;  %v1366_v32 = vrot.slane %v2722_v25, %v3777_v35  ;;  %v1374_v33 = vrot.slane %v1367_v28, %v3777_v35  ;;  %v1382_v34 = vrot.slane %v2723_v29, %v3777_v35  ;;  %v3099_v59 = vpop.eup %3098 }
 0x69f   : > { %v1889_v27 = vmul.f32 %v3099_v59, %v3918_v56 }
 0x6a0   : > { %v1383_v37 = vcombine.low %v1358_v30, %v1366_v32  ;;  %v1399_v38 = vcombine.low %v1374_v33, %v1382_v34  ;;  %v1384_v39 = vcombine.high %v1358_v30, %v1366_v32  ;;  %v1400_v40 = vcombine.high %v1374_v33, %v1382_v34 }
 0x6a1   : > { %v1893_v61 = vpack.c.bf16 %v1889_v27, %v1889_v27 }
 0x6a2   : > { %v1391_v21 = vrot.slane %v1383_v37, %v3780_v42  ;;  %v1407_v10 = vrot.slane %v1399_v38, %v3780_v42  ;;  %v1398_v41 = vrot.slane %v1384_v39, %v3780_v42  ;;  %v1414_v43 = vrot.slane %v1400_v40, %v3780_v42  ;;  %v3046_v38 = vld [vmem:[#allocation8] sm:$0xff]  }
 0x6a4   : > { %v1415_v26 = vcombine.low %v1391_v21, %v1407_v10  ;;  %v1416_v45 = vcombine.high %v1391_v21, %v1407_v10  ;;  %v1417_v46 = vcombine.low %v1398_v41, %v1414_v43  ;;  %v1418_v47 = vcombine.high %v1398_v41, %v1414_v43 }
 0x6a6   : > { %v1419_v50 = vpack.c.bf16 %v1415_v26, %v1415_v26  ;;  %v1420_v5 = vpack.c.bf16 %v1416_v45, %v1416_v45  ;;  %v1421_v3 = vpack.c.bf16 %v1417_v46, %v1417_v46  ;;  %v1422_v55 = vpack.c.bf16 %v1418_v47, %v1418_v47  ;;  %v3047_v26 = vld [vmem:[#allocation8 + $0x8] sm:$0xff]  }
 0x6a8   : > { %v1898_v51 = vsel %vm1685_vm4, %v1419_v50, 0  ;;  %v1944_v52 = vsel %vm1685_vm4, %v1420_v5, 0  ;;  %v1990_v53 = vsel %vm1685_vm4, %v1421_v3, 0  ;;  %v2036_v54 = vsel %vm1685_vm4, %v1422_v55, 0 }
 0x6a9   : > { %2857 = vmatpush3.bf16.msra.mxu0 %v1898_v51  ;;  %2863 = vmatpush3.bf16.msra.mxu1 %v1944_v52 }
 0x6aa   : > { %2868 = vmatprep.subr.bf16.mxu0 %v3379_v0  ;;  %2874 = vmatprep.subr.bf16.mxu1 %v3379_v0 }
 0x6ac   : > { %2859 = vmatmul.mubr.msk.bf16.vlgmr.msra.gmra.mrb[12].mxu0 %vm1438_vm2, %v1890_v57  ;;  %2865 = vmatmul.mubr.msk.bf16.vlgmr.msra.gmra.mrb[20].mxu1 %vm1438_vm2, %v1891_v58 }
 0x6ad   : > { %2869 = vmatpush3.bf16.msra.mxu0 %v1990_v53  ;;  %2875 = vmatpush3.bf16.msra.mxu1 %v2036_v54 }
 0x6ae   : > { %2876 = vmatprep.mubr.msk.bf16.mxu1 %vm3380_vm0, %v3379_v0  ;;  %2870 = vmatprep.mubr.msk.bf16.mxu0 %vm3380_vm0, %v3379_v0 }
 0x6af   : > { %2880 = vmatprep.subr.bf16.mxu0 %v3379_v0  ;;  %2888 = vmatprep.subr.bf16.mxu1 %v3379_v0 }
 0x6b4   : > { %2877 = vmatmul.mubr.msk.bf16.vlgmr.msra.gmra.mrb[24].mxu1 %vm1438_vm2, %v1893_v61 }
 0x6b5   : > { %2892 = vmatprep.mubr.msk.bf16.mxu1 %vm3380_vm0, %v3379_v0  ;;  %2889 = vmatpush3.bf16.msra.mxu1 %v3048_v31 }
 0x6b6   : > { %2890 = vmatprep.subr.bf16.mxu1 %v3379_v0 }
 0x6c4   : > { %v1874_v62 = vpop.xlane.xlu1 %1873 }
 0x6c5   : > { %3100 = vrcp.f32 %v1874_v62 }
 0x6cf   : > { %v3101_v63 = vpop.eup %3100 }
 0x6d0   : > { %v1888_v56 = vmul.f32 %v3101_v63, %v3923_v60 }
 0x6d2   : > { %v1892_v1 = vpack.c.bf16 %v1888_v56, %v1888_v56 }
 0x6d4   : > { %2871 = vmatmul.mubr.msk.bf16.vlgmr.msra.gmra.mrb[16].mxu0 %vm1438_vm2, %v1892_v1  ;;  %v2744_v1 = vld [vmem:[#allocation10] ss:$0 sm:$0xff] }
 0x6d5   : > { %2884 = vmatprep.mubr.msk.bf16.mxu0 %vm3380_vm0, %v3379_v0  ;;  %2881 = vmatpush3.bf16.msra.mxu0 %v3046_v38  ;;  %v3053_v38 = vld [vmem:[%s4101_s16 + $0x18] sm:$0xff]  }
 0x6d6   : > { %2882 = vmatprep.subr.bf16.mxu0 %v3379_v0 }
 0x6d9   : > { %2883 = vmatpush3.bf16.msra.mxu0 %v3047_v26 }
 0x6da   : > { %2896 = vmatprep.subr.bf16.mxu0 %v3379_v0 }
 0x77f   : > { %v1934_v2 = vpop.f32.mrb[12].mxu0  ;;  %v1980_v4 = vpop.f32.mrb[20].mxu1 }
 0x780   : > { %v2860_v6 = vpop.f32.mrb[13].mxu0  ;;  %v2866_v7 = vpop.f32.mrb[21].mxu1 }
 0x781   : > { %v1937_v8 = vpop.f32.mrb[14].mxu0  ;;  %v1983_v11 = vpop.f32.mrb[22].mxu1 }
 0x782   : > { %v2861_v12 = vpop.f32.mrb[15].mxu0  ;;  %v2867_v13 = vpop.f32.mrb[23].mxu1 }
 0x783   : > { %v3106_v12 = vld [vmem:[%s3729_s25] sm:$0xff]  ;;  %s2702_s25 = sshll.u32 %s748_s17, 3 }
 0x784   : > { %s750_s28 = scalar_lea.vmem [#allocation13], %s2702_s25  ;;  %s3279_s25 = sshll.u32 %s3390_s24, 4  ;;  %s3280_s25 = int_to_ptr.vmem [resolvable:$false] %s3279_s25 }
 0x785   : > { %s2530_s29 = sshll.u32 %s750_s28, 4  ;;  %s3281_s21 = scalar_lea.vmem %s3280_s25, 256  ;;  %s4039_s29 = int_to_ptr.vmem [resolvable:$true] %s2530_s29 }
 0x786   : > { %s3275_s4 = scalar_lea.vmem %s4039_s29, 128  ;;  %p3282_p2 = scmp.lt.s32.totalorder %s4039_s29, %s3280_s25 }
 0x787   : > { %v2072_v14 = vpop.f32.mrb[24].mxu1  ;;  %p3276_p1 = scmp.ne.s32.totalorder %s4039_s29, %s3275_s4  ;;  %p3283_p3 = scmp.lt.s32.totalorder %s3281_s21, %s3275_s4 }
 0x788   : > { %v2094_v15 = vcombine.low %v1980_v4, %v2072_v14  ;;  %v2095_v16 = vcombine.high %v1980_v4, %v2072_v14  ;;  %v2878_v17 = vpop.f32.mrb[25].mxu1 }
 0x789   : > { %v2075_v18 = vpop.f32.mrb[26].mxu1  ;;  %p3277_p11 = pnand %p3276_p1, %p4167_p10  ;;  %p3284_p5 = por %p3283_p3, %p3282_p2 }
 0x78a   : > { %v2879_v60 = vpop.f32.mrb[27].mxu1  ;;  %v2102_v25 = vrot.slane %v2094_v15, %v3777_v35  ;;  %v2109_v28 = vrot.slane %v2095_v16, %v3777_v35 }
 0x78b   : > { %p3278_p0 = pneg %p3277_p11 }
 0x78d   : > { %p3285_p6 = pnand %p3284_p5, %p3278_p0 }
 0x7a7   : > { %v2026_v19 = vpop.f32.mrb[16].mxu0 }
 0x7a8   : > { %v2078_v20 = vcombine.low %v1934_v2, %v2026_v19  ;;  %v2079_v22 = vcombine.high %v1934_v2, %v2026_v19  ;;  %v2872_v23 = vpop.f32.mrb[17].mxu0  ;;  %v3049_v19 = vld [vmem:[%s4099_s14 + $0x8] sm:$0xff]  }
 0x7a9   : > { %v2029_v24 = vpop.f32.mrb[18].mxu0  ;;  %2891 = vmatpush3.bf16.msra.mxu1 %v3049_v19 }
 0x7aa   : > { %v2086_v29 = vrot.slane %v2078_v20, %v3777_v35  ;;  %v2093_v30 = vrot.slane %v2079_v22, %v3777_v35  ;;  %v2873_v32 = vpop.f32.mrb[19].mxu0  ;;  %v3050_v20 = vld [vmem:[%s4101_s16] sm:$0xff]   ;;  %v3051_v22 = vld [vmem:[%s4101_s16 + $0x8] sm:$0xff]  }
 0x7ab   : > { %v2746_v32 = vld [vmem:[%s4098_s13] ss:$0 sm:$0xff] }
 0x7ac   : > { %v2110_v33 = vcombine.low %v2086_v29, %v2102_v25  ;;  %v2111_v34 = vcombine.high %v2086_v29, %v2102_v25  ;;  %v2126_v36 = vcombine.low %v2093_v30, %v2109_v28  ;;  %v2127_v37 = vcombine.high %v2093_v30, %v2109_v28  ;;  %v2745_v29 = vld [vmem:[#allocation11] ss:$0 sm:$0xff] }
 0x7ae   : > { %v2118_v39 = vrot.slane %v2110_v33, %v3780_v42  ;;  %v2125_v40 = vrot.slane %v2111_v34, %v3780_v42  ;;  %v2134_v9 = vrot.slane %v2126_v36, %v3780_v42  ;;  %v2141_v21 = vrot.slane %v2127_v37, %v3780_v42  ;;  %v3052_v37 = vld [vmem:[%s4101_s16 + $0x10] sm:$0xff]  }
 0x7b0   : > { %v2146_v10 = vcombine.low %v2118_v39, %v2125_v40  ;;  %v2739_v41 = vcombine.high %v2118_v39, %v2125_v40  ;;  %v2162_v43 = vcombine.low %v2134_v9, %v2141_v21  ;;  %v2740_v44 = vcombine.high %v2134_v9, %v2141_v21 }
 0x7b2   : > { %v2153_v45 = vrot.slane %v2146_v10, %v3777_v35  ;;  %v2161_v46 = vrot.slane %v2739_v41, %v3777_v35  ;;  %v2169_v47 = vrot.slane %v2162_v43, %v3777_v35  ;;  %v2177_v48 = vrot.slane %v2740_v44, %v3777_v35 }
 0x7b4   : > { %v2179_v49 = vcombine.high %v2153_v45, %v2161_v46  ;;  %v2195_v50 = vcombine.high %v2169_v47, %v2177_v48  ;;  %v2178_v5 = vcombine.low %v2153_v45, %v2161_v46  ;;  %v2194_v51 = vcombine.low %v2169_v47, %v2177_v48 }
 0x7b6   : > { %v2193_v52 = vrot.slane %v2179_v49, %v3780_v42  ;;  %v2209_v3 = vrot.slane %v2195_v50, %v3780_v42  ;;  %v2186_v55 = vrot.slane %v2178_v5, %v3780_v42  ;;  %v2202_v57 = vrot.slane %v2194_v51, %v3780_v42 }
 0x7b8   : > { %v2212_v58 = vcombine.low %v2193_v52, %v2209_v3  ;;  %v2211_v59 = vcombine.high %v2186_v55, %v2202_v57  ;;  %v2213_v53 = vcombine.high %v2193_v52, %v2209_v3  ;;  %v2210_v54 = vcombine.low %v2186_v55, %v2202_v57 }
 0x7ba   : > { %2219 = vrot.lane.b32.xlu1 %v2212_v58, %s3387_s6  ;;  %2215 = vrot.lane.b32.xlu0 %v2211_v59, %s3388_s18  ;;  %s4159_s18 = sld [smem:[#allocation34_spill]] }
 0x7be   : > { %2223 = vrot.lane.b32.xlu1 %v2213_v53, %s3389_s23  ;;  %s4165_s23 = sld [smem:[#allocation38_spill]] }
 0x7c0   : > { %v2747_v39 = vld [vmem:[%s4159_s18] ss:$0 sm:$0xff] }
 0x7c4   : > { %s4166_s27 = smov %s4165_s23 }
 0x82c   : > { %v2220_v35 = vpop.permute.xlu1 %2219  ;;  %v2216_v27 = vpop.permute.xlu0 %2215 }
 0x82d   : > { %v2226_v61 = vsel %vm1438_vm2, %v2210_v54, %v2216_v27  ;;  %v2757_v54 = vld [vmem:[%s4163_s2] ss:$0 sm:$0xff] }
 0x82e   : > { %v2228_v63 = vsel %vm2227_vm14, %v2226_v61, %v2220_v35  ;;  %v2758_v27 = vld [vmem:[%s4164_s20] ss:$0 sm:$0xff] }
 0x830   : > { %v2224_v62 = vpop.permute.xlu1 %2223 }
 0x831   : > { %v2230_v42 = vsel %vm2229_vm15, %v2228_v63, %v2224_v62 }
 0x832   : > { %v2231_v56 = vpack.c.bf16 %v2230_v42, %v2230_v42 }
 0x834   : > { %2885 = vmatmul.mubr.msk.bf16.vlgmr.msra.gmra.mrb[20].mxu0 %vm795_vm1, %v2231_v56 }
 0x835   : > { %2904 = vmatprep.mubr.msk.bf16.mxu0 %vm3380_vm0, %v3379_v0  ;;  %2897 = vmatpush3.bf16.msra.mxu0 %v3050_v20  ;;  %vm2440_vm0 = vcmask 523264  }
 0x836   : > { %2898 = vmatprep.subr.bf16.mxu0 %v3379_v0 }
 0x839   : > { %2899 = vmatpush3.bf16.msra.mxu0 %v3051_v22 }
 0x83a   : > { %2900 = vmatprep.subr.bf16.mxu0 %v3379_v0 }
 0x83d   : > { %2901 = vmatpush3.bf16.msra.mxu0 %v3052_v37 }
 0x83e   : > { %2902 = vmatprep.subr.bf16.mxu0 %v3379_v0  ;;  %v2751_v0 = vld [vmem:[%s4160_s1] ss:$0 sm:$0xff]  ;;  %s4037_s1 = scalar_lea.hbm %s4165_s23, %s2760_s3 }
 0x841   : > { %2903 = vmatpush3.bf16.msra.mxu0 %v3053_v38 }
 0x907   : > { %v2285_v2 = vpop.f32.mrb[20].mxu0 }
 0x908   : > { %v2292_v4 = vsel %vm2291_vm3, 0.0, %v2285_v2  ;;  %v2886_v6 = vpop.f32.mrb[21].mxu0 }
 0x909   : > { %v2300_v7 = vadd.f32 %v2744_v1, %v2292_v4  ;;  %v2288_v8 = vpop.f32.mrb[22].mxu0 }
 0x90a   : > { %v2887_v11 = vpop.f32.mrb[23].mxu0 }
 0x90b   : > { %v2301_v13 = vadd.f32 %v3106_v12, %v2300_v7 }
 0x90d   : > { %v2304_v14 = vsel %vm795_vm1, %v2301_v13, 0.0 }
 0x90e   : > { %2305 = vadd.xlane.f32.xlu0 %v2304_v14 }
 0x99b   : > { %v2306_v15 = vpop.xlane.xlu0 %2305 }
 0x99c   : > { %v2308_v16 = vmul.f32 0.03125, %v2306_v15 }
 0x99e   : > { %v2309_v17 = vsub.f32 %v2301_v13, %v2308_v16 }
 0x9a0   : > { %v2310_v18 = vmul.f32 %v2309_v17, %v2309_v17 }
 0x9a2   : > { %v2311_v60 = vsel %vm795_vm1, %v2310_v18, 0.0 }
 0x9a3   : > { %2312 = vadd.xlane.f32.xlu1 %v2311_v60 }
 0xa30   : > { %v2313_v23 = vpop.xlane.xlu1 %2312 }
 0xa31   : > { %v2314_v24 = vmul.f32 0.03125, %v2313_v23 }
 0xa33   : > { %v2315_v25 = vadd.f32 1e-05, %v2314_v24 }
 0xa35   : > { %3102 = vrsqrt.f32 %v2315_v25 }
 0xa3f   : > { %v3103_v28 = vpop.eup %3102 }
 0xa40   : > { %v2317_v30 = vmul.f32 %v3103_v28, %v2309_v17 }
 0xa42   : > { %v2324_v33 = vmul.f32 %v2745_v29, %v2317_v30 }
 0xa44   : > { %v2331_v34 = vadd.f32 %v2746_v32, %v2324_v33 }
 0xa46   : > { %v2332_v36 = vpack.c.bf16 %v2331_v34, %v2331_v34 }
 0xa48   : > { %2893 = vmatmul.mubr.msk.bf16.vlgmr.msra.gmra.mrb[28].mxu1 %vm795_vm1, %v2332_v36 }
 0xb1b   : > { %v2393_v40 = vpop.f32.mrb[28].mxu1 }
 0xb1c   : > { %v2394_v9 = vadd.f32 %v2747_v39, %v2393_v40  ;;  %v2894_v21 = vpop.f32.mrb[29].mxu1 }
 0xb1d   : > { %v2396_v10 = vpop.f32.mrb[30].mxu1 }
 0xb1e   : > { %v2399_v41 = vmax.f32 %v2394_v9, 0.0  ;;  %v2895_v43 = vpop.f32.mrb[31].mxu1 }
 0xb20   : > { %v2400_v44 = vpack.c.bf16 %v2399_v41, %v2399_v41 }
 0xb22   : > { %2905 = vmatmul.mubr.msk.bf16.vlgmr.msra.gmra.mrb[24].mxu0 %vm2440_vm0, %v2400_v44 }
 0xbf5   : > { %v2478_v26 = vpop.f32.mrb[24].mxu0 }
 0xbf6   : > { %v2479_v45 = vadd.f32 %v2751_v0, %v2478_v26  ;;  %v2906_v46 = vpop.f32.mrb[25].mxu0 }
 0xbf7   : > { %v2481_v47 = vpop.f32.mrb[26].mxu0 }
 0xbf8   : > { %v2907_v48 = vpop.f32.mrb[27].mxu0  ;;  %v2484_v49 = vadd.f32 %v2479_v45, %v2331_v34 }
 0xbfa   : > { %v2487_v50 = vsel %vm795_vm1, %v2484_v49, 0.0 }
 0xbfb   : > { %2488 = vadd.xlane.f32.xlu0 %v2487_v50 }
 0xc88   : > { %v2489_v5 = vpop.xlane.xlu0 %2488 }
 0xc89   : > { %v2490_v51 = vmul.f32 0.03125, %v2489_v5 }
 0xc8b   : > { %v2491_v52 = vsub.f32 %v2484_v49, %v2490_v51 }
 0xc8d   : > { %v2492_v3 = vmul.f32 %v2491_v52, %v2491_v52 }
 0xc8f   : > { %v2493_v55 = vsel %vm795_vm1, %v2492_v3, 0.0 }
 0xc90   : > { %2494 = vadd.xlane.f32.xlu0 %v2493_v55 }
 0xd1d   : > { %v2495_v57 = vpop.xlane.xlu0 %2494 }
 0xd1e   : > { %v2496_v58 = vmul.f32 0.03125, %v2495_v57 }
 0xd20   : > { %v2497_v59 = vadd.f32 1e-05, %v2496_v58 }
 0xd22   : > { %3104 = vrsqrt.f32 %v2497_v59 }
 0xd2c   : > { %v3105_v53 = vpop.eup %3104 }
 0xd2d   : > { %v2499_v35 = vmul.f32 %v3105_v53, %v2491_v52 }
 0xd2f   : > { %v2506_v61 = vmul.f32 %v2757_v54, %v2499_v35 }
 0xd31   : > { %v2513_v62 = vadd.f32 %v2758_v27, %v2506_v61 }
 0xd33   : > { %2514 = vst.msk [vmem:[%s750_s28] sm:$0xff] %vm795_vm1, %v2513_v62 }
 0xd34   : > { %3288 = shalt.err (!%p3285_p6)
}
 0xd35   : > { %s3289_s17 = scalar_lea.hbm %s4037_s1, 128  ;;  %s3293_s22 = scalar_lea.hbm %s4166_s27, 256 }
 0xd36   : > { %p3290_p7 = scmp.ne.s32.totalorder %s4037_s1, %s3289_s17  ;;  %p3294_p4 = scmp.lt.u32.totalorder %s4037_s1, %s4166_s27 }
 0xd37   : > { %p3295_p8 = scmp.lt.u32.totalorder %s3293_s22, %s3289_s17  ;;  %p3297_p1 = scmp.lt.u32.totalorder %s3289_s17, %s4037_s1 }
 0xd38   : > { %p3291_p9 = pnand %p3290_p7, %p4167_p10 }
 0xd39   : > { %p3296_p13 = por %p3295_p8, %p3294_p4 }
 0xd3a   : > { %p3292_p12 = pneg %p3291_p9 }
 0xd3b   : > { %p3298_p11 = por %p3297_p1, %p3296_p13 }
 0xd3d   : > { %p3299_p0 = pnand %p3298_p11, %p3292_p12 }
 0xd3f   : > { %3302 = shalt.err (!%p3299_p0)
}
 0xd40   : > { %2933 = dma.vmem_to_hbm [thread:$0]  (%p4167_p10), %s4039_s29, 128, %s4037_s1, %s2516_s26  }
 0xd41 PF: > { %s4168_s28 = sld [smem:[#allocation23_spill]]  ;;  %s4169_s6 = sld [smem:[#allocation19_spill]] }
 0xd42   : > { %s4170_s18 = sld [smem:[#allocation26_spill]] }
 0xd47   : > { %p2970_p2 = scmp.ge.s32.totalorder %s4168_s28, 2  ;;  %s2542_s23 = sand.u32 1, %s4169_s6  }
 0xd48   : > { %p4171_p3 = scmp.ne.s32.totalorder %s4170_s18, 0  ;;  %s2543_s4 = scalar_lea.sflag [#allocation4], %s2542_s23 }
 0xd4a   : > { %p2955_p5 = pnand %p2970_p2, %p4171_p3 }
 0xd4c   : > { %3344 = dma.done.wait (!%p2955_p5), %s2543_s4, 128  }
 0xd4d   : > { %3346 = vsyncadd (!%p2955_p5), %s2543_s4, 4294967168  ;;  %s37_s25 = sadd.s32 1, %s4168_s28   ;;  %s4172_s1 = sld [smem:[#allocation20_spill]] }
 0xd4e   : > { %p34_p6 = scmp.ge.s32.totalorder %s37_s25, 4   ;;  %s4173_s22 = sld [smem:[#allocation21_spill]] }
 0xd4f   : > { %s4174_s23 = sld [smem:[#allocation27_spill]]  ;;  %s4175_s24 = sld [smem:[#allocation22_spill]] }
 0xd50   : > { %s4176_s2 = sld [smem:[#allocation24_spill]]  ;;  %36 = sbr.rel (!%p34_p6) target bundleno = 20 (0x14), region = 166 }
 0xd57   :  { %2548 = vsyncpa [#allocation3], 1 }
 0xd58   :  { %2550 = vsyncpa [#allocation3 + $0x1], 1 }
 0xd59   :  { %2551 = vsyncpa [#allocation6], 1 }
 0xd5a   :  { %2552 = vsyncpa [#allocation9], 1 }
 0xd5b   :  { %2553 = vsyncpa [#allocation12], 1 }
 0xd5c   :  { %2554 = vsyncpa [#allocation4], 1 }
 0xd5d   :  { %2556 = vsyncpa [#allocation4 + $0x1], 1 }

// kernel: tpu_custom_call.1
= control target key start
LH: loop header
LB: loop body
LE: loop exit
PB: predicated region body
PF: predicated region fallthrough
CT: control target
= control target key end

     0   :  { %s4085_s0 = inlined_call_operand.vmem [shape: f32[4,1,1], index: 0, kind: input, shape index: {}]   ;;  %s4086_s1 = inlined_call_operand.vmem [shape: f32[2,8,32], index: 1, kind: input, shape index: {}]   ;;  %s4087_s2 = inlined_call_operand.vmem [shape: f32[2,8,32], index: 2, kind: input, shape index: {}]   ;;  %s4088_s3 = inlined_call_operand.vmem [shape: f32[2,8,32], index: 3, kind: input, shape index: {}]   ;;  %s4089_s4 = inlined_call_operand.hbm [shape: bf16[32,32], index: 4, kind: input, shape index: {}]   ;;  %s4090_s5 = inlined_call_operand.vmem [shape: f32[1,32], index: 5, kind: input, shape index: {}]   ;;  %s4091_s6 = inlined_call_operand.hbm [shape: bf16[32,32], index: 6, kind: input, shape index: {}]   ;;  %s4092_s7 = inlined_call_operand.vmem [shape: f32[1,32], index: 7, kind: input, shape index: {}]   ;;  %s4093_s8 = inlined_call_operand.vmem [shape: bf16[32,32], index: 8, kind: input, shape index: {}]   ;;  %s4094_s9 = inlined_call_operand.hbm [shape: f32[1,32], index: 9, kind: input, shape index: {}]   ;;  %s4095_s10 = inlined_call_operand.hbm [shape: bf16[32,32], index: 10, kind: input, shape index: {}]   ;;  %s4096_s11 = inlined_call_operand.hbm [shape: f32[1,32], index: 11, kind: input, shape index: {}]   ;;  %s4097_s12 = inlined_call_operand.hbm [shape: f32[1,32], index: 12, kind: input, shape index: {}]   ;;  %s4098_s13 = inlined_call_operand.vmem [shape: f32[1,32], index: 13, kind: input, shape index: {}]   ;;  %s4099_s14 = inlined_call_operand.vmem [shape: bf16[32,64], index: 14, kind: input, shape index: {}]   ;;  %s4100_s15 = inlined_call_operand.vmem [shape: f32[1,64], index: 15, kind: input, shape index: {}]   ;;  %s4101_s16 = inlined_call_operand.vmem [shape: bf16[64,32], index: 16, kind: input, shape index: {}]   ;;  %s4102_s17 = inlined_call_operand.vmem [shape: f32[1,32], index: 17, kind: input, shape index: {}]   ;;  %s4103_s18 = inlined_call_operand.vmem [shape: f32[1,32], index: 18, kind: input, shape index: {}]   ;;  %s4104_s19 = inlined_call_operand.vmem [shape: f32[1,32], index: 19, kind: input, shape index: {}]   ;;  %s4105_s20 = inlined_call_operand.hbm [shape: f32[2,8,32], index: 20, kind: output, shape index: {}]  }
   0x1   :  { %4123 = sst [smem:[#allocation28_spill]] %s4085_s0 }
   0x2   :  { %4124 = sst [smem:[#allocation29_spill]] %s4086_s1 }
   0x3   :  { %4125 = sst [smem:[#allocation30_spill]] %s4087_s2 }
   0x4   :  { %4126 = sst [smem:[#allocation31_spill]] %s4088_s3 }
   0x5   :  { %4127 = sst [smem:[#allocation32_spill]] %s4089_s4 }
   0x6   :  { %4128 = sst [smem:[#allocation33_spill]] %s4091_s6 }
   0x7   :  { %4129 = sst [smem:[#allocation34_spill]] %s4100_s15 }
   0x8   :  { %4130 = sst [smem:[#allocation35_spill]] %s4102_s17 }
   0x9   :  { %4131 = sst [smem:[#allocation36_spill]] %s4103_s18 }
   0xa   :  { %4132 = sst [smem:[#allocation37_spill]] %s4104_s19 }
   0xb   :  { %4133 = sst [smem:[#allocation38_spill]] %s4105_s20 }
   0xc   :  { %25 = vsyncpa [#allocation3], 0 }
   0xd   :  { %26 = vsyncpa [#allocation6], 0 }
   0xe   :  { %27 = vsyncpa [#allocation9], 0 }
   0xf   :  { %28 = vsyncpa [#allocation12], 0 }
  0x10   :  { %29 = vsyncpa [#allocation4], 0 }
  0x11   :  { %31 = vsyncpa [#allocation4 + $0x1], 0  ;;  %s3496_s1 = smov 0   ;;  %s3498_s22 = smov 0  }
  0x12   :  { %s3500_s23 = smov 0   ;;  %s3502_s24 = smov 0  }
  0x13   :  { %s3504_s2 = smov 0   ;;  %s3506_s25 = smov 0  }
  0x14 LB: > { %4134 = sst [smem:[#allocation19_spill]] %s3349_s1  ;;  %s2685_s3 = sadd.s32 4294967295, %s3369_s25   ;;  %s3369_s25 = sphi %s3506_s25, %s37_s25   ;;  %s3365_s2 = sphi %s3504_s2, %s4176_s2   ;;  %s3361_s24 = sphi %s3502_s24, %s4175_s24   ;;  %s3357_s23 = sphi %s3500_s23, %s4174_s23   ;;  %s3353_s22 = sphi %s3498_s22, %s4173_s22   ;;  %s3349_s1 = sphi %s3496_s1, %s4172_s1  }
  0x15   : > { %4135 = sst [smem:[#allocation20_spill]] %s3353_s22  ;;  %s2686_s26 = sadd.s32 4294967294, %s3369_s25  }
  0x16   : > { %4136 = sst [smem:[#allocation21_spill]] %s3357_s23  ;;  %s49_s27 = sadd.s32 1, %s3365_s2 }
  0x17   : > { %4137 = sst [smem:[#allocation22_spill]] %s3365_s2  ;;  %s495_s28 = sadd.s32 1, %s3357_s23 }
  0x18   : > { %4138 = sst [smem:[#allocation23_spill]] %s3369_s25  ;;  %p51_p0 = scmp.ge.s32.totalorder %s49_s27, 2 }
  0x19   : > { %p505_p1 = scmp.ne.s32.totalorder %s3357_s23, %s3353_s22  ;;  %p506_p2 = scmp.eq.s32.totalorder %s2685_s3, 1 }
  0x1a   : > { %p511_p3 = scmp.ne.s32.totalorder %s3353_s22, %s3349_s1  ;;  %s4178_s27 = smov (%p51_p0, %s49_s27), 0 }
  0x1b   : > { %4139 = sst [smem:[#allocation24_spill]] %s4178_s27  ;;  %p3536_p4 = por %p506_p2, %p505_p1 }
  0x1c   : > { %p512_p5 = scmp.eq.s32.totalorder %s2686_s26, 1  ;;  %s490_s29 = ssub.s32 %s3365_s2, %s4178_s27 }
  0x1d   : > { %s4140_s4 = scalar_select %p3536_p4, 1, 0 }
  0x1e   : > { %p2687_p6 = scmp.ge.s32.totalorder %s3369_s25, 1  ;;  %p493_p7 = scmp.eq.s32.totalorder %s490_s29, 0 }
  0x1f   : > { %4141 = sst [smem:[#allocation25_spill]] %s4140_s4  ;;  %p3543_p8 = por %p512_p5, %p511_p3 }
  0x20   : > { %p519_p9 = scmp.lt.s32.totalorder %s3369_s25, 3  ;;  %p3555_p11 = scmp.eq.s32.totalorder %s2685_s3, 0 }
  0x21   : > { %s4142_s30 = scalar_select %p3543_p8, 1, 0 }
  0x22   : > { %s3549_s0 = scalar_select %p493_p7, %s3357_s23, %s495_s28  }
  0x23   : > { %4143 = sst [smem:[#allocation26_spill]] %s4142_s30  ;;  %p3551_p10 = pnand %p2687_p6, %p519_p9 }
  0x24   : > { %4144 = sst [smem:[#allocation27_spill]] %s3549_s0  ;;  %s3371_s26 = smov [#allocation5]  }
  0x25   : > { %s4145_s21 = scalar_select %p3551_p10, 1, 0 }
  0x26   : > { %s4146_s1 = scalar_select %p3555_p11, 1, 0 }
  0x27   : > { %p2935_p12 = pneg %p3551_p10  ;;  %s550_s29 = sshll.u32 %s3371_s26, 4  ;;  %s551_s29 = int_to_ptr.vmem [resolvable:$true] %s550_s29 }
  0x28   : > { %s3372_s28 = smov [#allocation8]   ;;  %s4148_s6 = sld [smem:[#allocation33_spill]] }
  0x29   : > { %p3563_p13 = pnand %p3555_p11, %p2935_p12  ;;  %s580_s2 = sshll.u32 %s3372_s28, 4  ;;  %s3567_s2 = int_to_ptr.vmem [resolvable:$true] %s580_s2 }
  0x2b   : > { %p3577_p1 = pneg %p3563_p13 }
  0x2e   : > { %s3107_s23 = scalar_lea.hbm %s4148_s6, 256 }
  0x2f   : > { %p3108_p0 = scmp.ne.s32.totalorder %s4148_s6, %s3107_s23  ;;  %p3114_p5 = scmp.lt.u32.totalorder %s3107_s23, %s4148_s6 }
  0x31   : > { %p3110_p2 = pnand %p3577_p1, %p3108_p0 }
  0x33   : > { %p3111_p3 = pneg %p3110_p2 }
  0x35   : > { %p3116_p6 = pnand %p3114_p5, %p3111_p3 }
  0x37   : > { %3119 = shalt.err (!%p3116_p6)
}
  0x38   : > { %s3120_s0 = scalar_lea.vmem %s551_s29, 256  ;;  %p3128_p8 = scmp.lt.s32.totalorder %s551_s29, %s551_s29 }
  0x39   : > { %p3121_p7 = scmp.ne.s32.totalorder %s551_s29, %s3120_s0  ;;  %p3129_p4 = scmp.lt.s32.totalorder %s3120_s0, %s3120_s0 }
  0x3b   : > { %p3123_p9 = pnand %p3121_p7, %p3577_p1  ;;  %p3130_p11 = por %p3129_p4, %p3128_p8 }
  0x3d   : > { %p3124_p12 = pneg %p3123_p9 }
  0x3f   : > { %p3131_p10 = pnand %p3130_p11, %p3124_p12 }
  0x41   : > { %3134 = shalt.err (!%p3131_p10)
}
  0x42   : > { %s3373_s25 = smov 64   ;;  %s3374_s30 = smov 4  }
  0x43   : > { %2941 = dma.hbm_to_vmem [thread:$0]  (!%p3563_p13), %s4148_s6, 256, %s551_s29, [#allocation6], %s3373_s25, %s3373_s25, %s3374_s30  }
  0x44   : > { %s3135_s19 = scalar_lea.hbm %s4095_s10, 256 }
  0x45   : > { %p3136_p4 = scmp.ne.s32.totalorder %s4095_s10, %s3135_s19  ;;  %p3142_p11 = scmp.lt.u32.totalorder %s3135_s19, %s4095_s10 }
  0x47   : > { %p3138_p8 = pnand %p3136_p4, %p3577_p1 }
  0x49   : > { %p3139_p10 = pneg %p3138_p8 }
  0x4b   : > { %p3144_p0 = pnand %p3142_p11, %p3139_p10 }
  0x4d   : > { %3147 = shalt.err (!%p3144_p0)
}
  0x4e   : > { %s3148_s29 = scalar_lea.vmem %s3567_s2, 256  ;;  %p3156_p6 = scmp.lt.s32.totalorder %s3567_s2, %s3567_s2 }
  0x4f   : > { %p3149_p2 = scmp.ne.s32.totalorder %s3567_s2, %s3148_s29  ;;  %p3157_p7 = scmp.lt.s32.totalorder %s3148_s29, %s3148_s29 }
  0x51   : > { %p3151_p3 = pnand %p3149_p2, %p3577_p1  ;;  %p3158_p9 = por %p3157_p7, %p3156_p6 }
  0x53   : > { %p3152_p5 = pneg %p3151_p3 }
  0x55   : > { %p3159_p12 = pnand %p3158_p9, %p3152_p5 }
  0x57   : > { %3162 = shalt.err (!%p3159_p12)
}
  0x58   : > { %2947 = dma.hbm_to_vmem [thread:$0]  (!%p3563_p13), %s4095_s10, 256, %s3567_s2, [#allocation9], %s3373_s25, %s3373_s25, %s3374_s30  }
  0x59   : > { %s3375_s22 = smov [#allocation2]   ;;  %s3376_s20 = smov [#allocation7]  }
  0x5a   : > { %s534_s4 = sshll.u32 %s3375_s22, 4  ;;  %s570_s23 = sshll.u32 %s3376_s20, 4  ;;  %s535_s4 = int_to_ptr.vmem [resolvable:$true] %s534_s4  ;;  %s571_s23 = int_to_ptr.vmem [resolvable:$true] %s570_s23 }
  0x5b   : > { %s4150_s0 = sld [smem:[#allocation32_spill]] }
  0x61   : > { %s3163_s29 = scalar_lea.hbm %s4150_s0, 256 }
  0x62   : > { %p3164_p4 = scmp.ne.s32.totalorder %s4150_s0, %s3163_s29  ;;  %p3170_p11 = scmp.lt.u32.totalorder %s3163_s29, %s4150_s0 }
  0x64   : > { %p3166_p8 = pnand %p3164_p4, %p3577_p1 }
  0x66   : > { %p3167_p10 = pneg %p3166_p8 }
  0x68   : > { %p3172_p0 = pnand %p3170_p11, %p3167_p10 }
  0x6a   : > { %3175 = shalt.err (!%p3172_p0)
}
  0x6b   : > { %s3176_s2 = scalar_lea.vmem %s535_s4, 256  ;;  %p3184_p6 = scmp.lt.s32.totalorder %s535_s4, %s535_s4 }
  0x6c   : > { %p3177_p2 = scmp.ne.s32.totalorder %s535_s4, %s3176_s2  ;;  %p3185_p7 = scmp.lt.s32.totalorder %s3176_s2, %s3176_s2 }
  0x6e   : > { %p3179_p3 = pnand %p3177_p2, %p3577_p1  ;;  %p3186_p9 = por %p3185_p7, %p3184_p6 }
  0x70   : > { %p3180_p5 = pneg %p3179_p3 }
  0x72   : > { %p3187_p12 = pnand %p3186_p9, %p3180_p5 }
  0x74   : > { %3190 = shalt.err (!%p3187_p12)
}
  0x75   : > { %2938 = dma.hbm_to_vmem [thread:$0]  (!%p3563_p13), %s4150_s0, 256, %s535_s4, [#allocation3], %s3373_s25, %s3373_s25, %s3374_s30  }
  0x76   : > { %s3191_s22 = scalar_lea.hbm %s4094_s9, 16 }
  0x77   : > { %p3192_p4 = scmp.ne.s32.totalorder %s4094_s9, %s3191_s22  ;;  %p3198_p11 = scmp.lt.u32.totalorder %s3191_s22, %s4094_s9 }
  0x79   : > { %p3194_p8 = pnand %p3192_p4, %p3577_p1 }
  0x7b   : > { %p3195_p10 = pneg %p3194_p8 }
  0x7d   : > { %p3200_p0 = pnand %p3198_p11, %p3195_p10 }
  0x7f   : > { %3203 = shalt.err (!%p3200_p0)
}
  0x80   : > { %s3204_s18 = scalar_lea.vmem %s571_s23, 16  ;;  %s3211_s25 = scalar_lea.vmem %s571_s23, 32 }
  0x81   : > { %p3205_p2 = scmp.ne.s32.totalorder %s571_s23, %s3204_s18  ;;  %p3212_p6 = scmp.lt.s32.totalorder %s571_s23, %s571_s23 }
  0x82   : > { %p3213_p7 = scmp.lt.s32.totalorder %s3211_s25, %s3204_s18 }
  0x83   : > { %p3207_p3 = pnand %p3205_p2, %p3577_p1 }
  0x84   : > { %p3214_p9 = por %p3213_p7, %p3212_p6 }
  0x85   : > { %p3208_p5 = pneg %p3207_p3 }
  0x87   : > { %p3215_p12 = pnand %p3214_p9, %p3208_p5 }
  0x89   : > { %3218 = shalt.err (!%p3215_p12)
}
  0x8a   : > { %2944 = dma.hbm_to_vmem [thread:$0]  (!%p3563_p13), %s4094_s9, 16, %s571_s23, [#allocation6]  }
  0x8b   : > { %s3377_s2 = smov [#allocation10]   ;;  %s3378_s15 = smov [#allocation11]  }
  0x8c   : > { %s594_s6 = sshll.u32 %s3377_s2, 4  ;;  %s605_s17 = sshll.u32 %s3378_s15, 4  ;;  %s595_s6 = int_to_ptr.vmem [resolvable:$true] %s594_s6  ;;  %s606_s17 = int_to_ptr.vmem [resolvable:$true] %s605_s17 }
  0x8d   : > { %s3219_s20 = scalar_lea.hbm %s4096_s11, 16 }
  0x8e   : > { %p3220_p4 = scmp.ne.s32.totalorder %s4096_s11, %s3219_s20  ;;  %p3226_p11 = scmp.lt.u32.totalorder %s3219_s20, %s4096_s11 }
  0x90   : > { %p3222_p8 = pnand %p3220_p4, %p3577_p1 }
  0x92   : > { %p3223_p10 = pneg %p3222_p8 }
  0x94   : > { %p3228_p0 = pnand %p3226_p11, %p3223_p10 }
  0x96   : > { %3231 = shalt.err (!%p3228_p0)
}
  0x97   : > { %s3232_s23 = scalar_lea.vmem %s595_s6, 16  ;;  %s3239_s25 = scalar_lea.vmem %s595_s6, 32 }
  0x98   : > { %p3233_p2 = scmp.ne.s32.totalorder %s595_s6, %s3232_s23  ;;  %p3240_p6 = scmp.lt.s32.totalorder %s595_s6, %s595_s6 }
  0x99   : > { %p3241_p7 = scmp.lt.s32.totalorder %s3239_s25, %s3232_s23 }
  0x9a   : > { %p3235_p3 = pnand %p3233_p2, %p3577_p1 }
  0x9b   : > { %p3242_p9 = por %p3241_p7, %p3240_p6 }
  0x9c   : > { %p3236_p5 = pneg %p3235_p3 }
  0x9e   : > { %p3243_p12 = pnand %p3242_p9, %p3236_p5 }
  0xa0   : > { %3246 = shalt.err (!%p3243_p12)
}
  0xa1   : > { %2950 = dma.hbm_to_vmem [thread:$0]  (!%p3563_p13), %s4096_s11, 16, %s595_s6, [#allocation9]  }
  0xa2   : > { %s3247_s19 = scalar_lea.hbm %s4097_s12, 16 }
  0xa3   : > { %p3248_p4 = scmp.ne.s32.totalorder %s4097_s12, %s3247_s19  ;;  %p3254_p11 = scmp.lt.u32.totalorder %s3247_s19, %s4097_s12 }
  0xa5   : > { %p3250_p8 = pnand %p3248_p4, %p3577_p1 }
  0xa7   : > { %p3251_p10 = pneg %p3250_p8 }
  0xa9   : > { %p3256_p0 = pnand %p3254_p11, %p3251_p10 }
  0xab   : > { %3259 = shalt.err (!%p3256_p0)
}
  0xac   : > { %s3260_s29 = scalar_lea.vmem %s606_s17, 16  ;;  %s3267_s6 = scalar_lea.vmem %s606_s17, 32 }
  0xad   : > { %p3261_p2 = scmp.ne.s32.totalorder %s606_s17, %s3260_s29  ;;  %p3268_p6 = scmp.lt.s32.totalorder %s606_s17, %s606_s17 }
  0xae   : > { %p3269_p7 = scmp.lt.s32.totalorder %s3267_s6, %s3260_s29 }
  0xaf   : > { %p3263_p3 = pnand %p3261_p2, %p3577_p1 }
  0xb0   : > { %p3270_p9 = por %p3269_p7, %p3268_p6 }
  0xb1   : > { %p3264_p5 = pneg %p3263_p3 }
  0xb3   : > { %p3271_p12 = pnand %p3270_p9, %p3264_p5 }
  0xb5   : > { %3274 = shalt.err (!%p3271_p12)
}
  0xb6   : > { %2953 = dma.hbm_to_vmem [thread:$0]  (!%p3563_p13), %s4097_s12, 16, %s606_s17, [#allocation12]  }
  0xb7   : > { %p4151_p4 = scmp.ne.s32.totalorder %s4145_s21, 0 }
  0xb8   : > { %p4152_p8 = scmp.ne.s32.totalorder (!%p4151_p4), %s4146_s1, 0 }
  0xb9   : > { %663 = sbr.rel (%p4151_p4) target bundleno = 3393 (0xd41), region = 100 }
  0xc0   : > { %3328 = dma.done.wait (%p4152_p8), [#allocation3], 256  }
  0xc1   : > { %3330 = vsyncadd (%p4152_p8), [#allocation3], 4294967040 }
  0xc2   : > { %3332 = dma.done.wait (%p4152_p8), [#allocation6], 272  }
  0xc3   : > { %3334 = vsyncadd (%p4152_p8), [#allocation6], 4294967024 }
  0xc4   : > { %3336 = dma.done.wait (%p4152_p8), [#allocation9], 272  }
  0xc5   : > { %3338 = vsyncadd (%p4152_p8), [#allocation9], 4294967024 }
  0xc6   : > { %3340 = dma.done.wait (%p4152_p8), [#allocation12], 16  }
  0xc7   : > { %3342 = vsyncadd (%p4152_p8), [#allocation12], 4294967280  ;;  %p751_p13 = scmp.lt.s32.totalorder %s3361_s24, 1  ;;  %v3379_v0 = vmov 0.0   ;;  %vm3380_vm0 = vmmov 0   ;;  %s4153_s17 = sld [smem:[#allocation29_spill]]  ;;  %v988_v27 = vlaneseq }
  0xc8   : > { %2802 = vmatprep.subr.bf16.mxu1 %v3379_v0  ;;  %2806 = vmatprep.mubr.msk.bf16.mxu1 %vm3380_vm0, %v3379_v0  ;;  %v3040_v1 = vld [vmem:[#allocation2] sm:$0xff]   ;;  %v3041_v2 = vld [vmem:[#allocation2 + $0x8] sm:$0xff]   ;;  %vm795_vm1 = vcmask 261120   ;;  %v3042_v4 = vld [vmem:[#allocation5] sm:$0xff]   ;;  %s4154_s2 = sld [smem:[#allocation30_spill]]  ;;  %s3381_s6 = smov 104  }
  0xc9   : > { %s752_s27 = scalar_select %p751_p13, %s3361_s24, 1  ;;  %2818 = vmatprep.subr.bf16.mxu0 %v3379_v0  ;;  %2822 = vmatprep.mubr.msk.bf16.mxu0 %vm3380_vm0, %v3379_v0  ;;  %v3043_v6 = vld [vmem:[#allocation5 + $0x8] sm:$0xff]   ;;  %v2710_v13 = vld [vmem:[%s4092_s7] ss:$0 sm:$0xff]  ;;  %v3045_v22 = vld [vmem:[%s4093_s8 + $0x8] sm:$0xff]   ;;  %v3774_v31 = vshrl.u32 %v988_v27, 7 }
  0xca   : > { %2803 = vmatpush3.bf16.msra.mxu1 %v3040_v1  ;;  %v3044_v17 = vld [vmem:[%s4093_s8] sm:$0xff]   ;;  %s3382_s18 = smov 120   ;;  %s3383_s1 = smov 112   ;;  %v3384_v25 = vmov 1983009808   ;;  %vm1438_vm2 = vcmask 64512  }
  0xcb   : > { %s3723_s21 = sshll.u32 %s752_s27, 3  ;;  %2804 = vmatprep.subr.bf16.mxu1 %v3379_v0  ;;  %v2706_v18 = vld [vmem:[%s4090_s5] ss:$0 sm:$0xff]  ;;  %2819 = vmatpush3.bf16.msra.mxu0 %v3044_v17  ;;  %s4155_s30 = sld [smem:[#allocation31_spill]]  ;;  %v986_v26 = vunpack.c.l.s4 %v3384_v25  ;;  %v3385_v28 = vmov 1934713408  }
  0xcc   : > { %2820 = vmatprep.subr.bf16.mxu0 %v3379_v0  ;;  %v1018_v29 = vunpack.c.l.s4 %v3385_v28  ;;  %vm1685_vm4 = vcmask 1043456   ;;  %s3389_s23 = smov 24   ;;  %vm2227_vm14 = vcmask 130048   ;;  %vm2229_vm15 = vcmask 195584   ;;  %s4161_s26 = sld [smem:[#allocation20_spill]] }
  0xcd   : > { %s3729_s25 = scalar_lea.vmem %s4153_s17, %s3723_s21  ;;  %v987_v30 = vunpack.c.0.s8 %v986_v26  ;;  %s4164_s20 = sld [smem:[#allocation37_spill]] }
  0xce   : > { %v768_v3 = vld [vmem:[%s3729_s25] sm:$0xff]  ;;  %s761_s15 = scalar_lea.vmem %s4154_s2, %s3723_s21  ;;  %2805 = vmatpush3.bf16.msra.mxu1 %v3041_v2  ;;  %v1019_v34 = vunpack.c.0.s8 %v1018_v29  ;;  %s4163_s2 = sld [smem:[#allocation36_spill]] }
  0xcf   : > { %v771_v5 = vpack.c.bf16 %v768_v3, %v768_v3  ;;  %2810 = vmatprep.subr.bf16.mxu1 %v3379_v0  ;;  %v769_v7 = vld [vmem:[%s761_s15] sm:$0xff]  ;;  %2821 = vmatpush3.bf16.msra.mxu0 %v3045_v22  ;;  %v3777_v35 = vsub.s32 %v987_v30, %v3774_v31  ;;  %s4156_s15 = sld [smem:[#allocation28_spill]]  ;;  %s2760_s3 = sshll.u32 %s3361_s24, 7 }
  0xd0   : > { %v839_v8 = vpack.c.bf16 %v769_v7, %v769_v7  ;;  %2832 = vmatprep.subr.bf16.mxu0 %v3379_v0  ;;  %v3780_v42 = vsub.s32 %v1019_v34, %v3774_v31  ;;  %s3390_s24 = smov [#allocation13]  }
  0xd1   : > { %2807 = vmatmul.mubr.msk.bf16.vlgmr.msra.gmra.mrb[0].mxu1 %vm795_vm1, %v771_v5  ;;  %s765_s4 = scalar_lea.vmem %s4155_s30, %s3723_s21  ;;  %s4162_s30 = sld [smem:[#allocation25_spill]] }
  0xd2   : > { %2811 = vmatpush3.bf16.msra.mxu1 %v3042_v4  ;;  %2814 = vmatprep.mubr.msk.bf16.mxu1 %vm3380_vm0, %v3379_v0  ;;  %v770_v23 = vld [vmem:[%s765_s4] sm:$0xff]  ;;  %s748_s17 = sand.u32 1, %s4161_s26  }
  0xd3   : > { %2812 = vmatprep.subr.bf16.mxu1 %v3379_v0  ;;  %v906_v24 = vpack.c.bf16 %v770_v23, %v770_v23  ;;  %s2516_s26 = scalar_lea.sflag [#allocation4], %s748_s17 }
  0xd5   : > { %2823 = vmatmul.mubr.msk.bf16.vlgmr.msra.gmra.mrb[0].mxu0 %vm795_vm1, %v906_v24 }
  0xd6   : > { %2813 = vmatpush3.bf16.msra.mxu1 %v3043_v6  ;;  %2834 = vmatprep.mubr.msk.bf16.mxu0 %vm3380_vm0, %v3379_v0 }
  0xd7   : > { %2826 = vmatprep.subr.bf16.mxu1 %v3379_v0  ;;  %p4167_p10 = scmp.ne.s32.totalorder %s4162_s30, 0 }
  0xd9   : > { %2815 = vmatmul.mubr.msk.bf16.vlgmr.msra.gmra.mrb[4].mxu1 %vm795_vm1, %v839_v8 }
  0xda   : > { %2828 = vmatprep.mubr.msk.bf16.mxu1 %vm3380_vm0, %v3379_v0 }
 0x1a4   : > { %v833_v9 = vpop.f32.mrb[0].mxu1 }
 0x1a5   : > { %v2808_v10 = vpop.f32.mrb[1].mxu1  ;;  %v834_v21 = vadd.f32 %v2706_v18, %v833_v9 }
 0x1a6   : > { %v836_v11 = vpop.f32.mrb[2].mxu1 }
 0x1a7   : > { %v2809_v12 = vpop.f32.mrb[3].mxu1 }
 0x1ac   : > { %v900_v14 = vpop.f32.mrb[4].mxu1 }
 0x1ad   : > { %v901_v15 = vadd.f32 %v2710_v13, %v900_v14  ;;  %v2816_v16 = vpop.f32.mrb[5].mxu1 }
 0x1ae   : > { %v903_v19 = vpop.f32.mrb[6].mxu1 }
 0x1af   : > { %1130 = vrot.lane.b32.xlu1 %v901_v15, %s3381_s6  ;;  %1124 = vrot.lane.b32.xlu0 %v901_v15, %s3382_s18  ;;  %v2817_v20 = vpop.f32.mrb[7].mxu1 }
 0x1b3   : > { %974 = vrot.lane.b32.xlu1 %v834_v21, %s3382_s18  ;;  %1127 = vrot.lane.b32.xlu0 %v901_v15, %s3383_s1 }
 0x1b7   : > { %980 = vrot.lane.b32.xlu1 %v834_v21, %s3381_s6  ;;  %977 = vrot.lane.b32.xlu0 %v834_v21, %s3383_s1 }
 0x221   : > { %v1131_v32 = vpop.permute.xlu1 %1130  ;;  %v1125_v33 = vpop.permute.xlu0 %1124 }
 0x222   : > { %v1149_v36 = vcombine.low %v1125_v33, %v1131_v32  ;;  %v1150_v37 = vcombine.high %v1125_v33, %v1131_v32 }
 0x224   : > { %v1157_v43 = vrot.slane %v1149_v36, %v3777_v35  ;;  %v1164_v44 = vrot.slane %v1150_v37, %v3777_v35 }
 0x225   : > { %v975_v38 = vpop.permute.xlu1 %974  ;;  %v1128_v39 = vpop.permute.xlu0 %1127 }
 0x226   : > { %v1133_v40 = vcombine.low %v901_v15, %v1128_v39  ;;  %v1134_v41 = vcombine.high %v901_v15, %v1128_v39 }
 0x228   : > { %v1141_v45 = vrot.slane %v1133_v40, %v3777_v35  ;;  %v1148_v46 = vrot.slane %v1134_v41, %v3777_v35 }
 0x229   : > { %v981_v47 = vpop.permute.xlu1 %980  ;;  %v978_v48 = vpop.permute.xlu0 %977 }
 0x22a   : > { %v1165_v49 = vcombine.low %v1141_v45, %v1157_v43  ;;  %v1166_v50 = vcombine.high %v1141_v45, %v1157_v43  ;;  %v1181_v51 = vcombine.low %v1148_v46, %v1164_v44  ;;  %v1182_v52 = vcombine.high %v1148_v46, %v1164_v44 }
 0x22b   : > { %v999_v53 = vcombine.low %v975_v38, %v981_v47  ;;  %v1000_v54 = vcombine.high %v975_v38, %v981_v47  ;;  %v983_v55 = vcombine.low %v834_v21, %v978_v48  ;;  %v984_v56 = vcombine.high %v834_v21, %v978_v48 }
 0x22c   : > { %v1173_v57 = vrot.slane %v1165_v49, %v3780_v42  ;;  %v1180_v58 = vrot.slane %v1166_v50, %v3780_v42  ;;  %v1189_v59 = vrot.slane %v1181_v51, %v3780_v42  ;;  %v1196_v60 = vrot.slane %v1182_v52, %v3780_v42 }
 0x22d   : > { %v1007_v61 = vrot.slane %v999_v53, %v3777_v35  ;;  %v1014_v62 = vrot.slane %v1000_v54, %v3777_v35  ;;  %v991_v63 = vrot.slane %v983_v55, %v3777_v35  ;;  %v998_v1 = vrot.slane %v984_v56, %v3777_v35 }
 0x22e   : > { %v1201_v2 = vcombine.low %v1173_v57, %v1180_v58  ;;  %v2720_v3 = vcombine.high %v1173_v57, %v1180_v58  ;;  %v1217_v4 = vcombine.low %v1189_v59, %v1196_v60  ;;  %v2721_v5 = vcombine.high %v1189_v59, %v1196_v60 }
 0x22f   : > { %v1015_v6 = vcombine.low %v991_v63, %v1007_v61  ;;  %v1016_v7 = vcombine.high %v991_v63, %v1007_v61  ;;  %v1031_v8 = vcombine.low %v998_v1, %v1014_v62  ;;  %v1032_v9 = vcombine.high %v998_v1, %v1014_v62 }
 0x230   : > { %v1208_v10 = vrot.slane %v1201_v2, %v3777_v35  ;;  %v1216_v11 = vrot.slane %v2720_v3, %v3777_v35  ;;  %v1224_v12 = vrot.slane %v1217_v4, %v3777_v35  ;;  %v1232_v13 = vrot.slane %v2721_v5, %v3777_v35  ;;  %v3831_v3 = vpop.f32.mrb[0].mxu0 }
 0x231   : > { %v1023_v14 = vrot.slane %v1015_v6, %v3780_v42  ;;  %v1030_v15 = vrot.slane %v1016_v7, %v3780_v42  ;;  %v1039_v16 = vrot.slane %v1031_v8, %v3780_v42  ;;  %v1046_v17 = vrot.slane %v1032_v9, %v3780_v42  ;;  %v2824_v4 = vpop.f32.mrb[1].mxu0 }
 0x232   : > { %v1233_v18 = vcombine.low %v1208_v10, %v1216_v11  ;;  %v1249_v19 = vcombine.low %v1224_v12, %v1232_v13  ;;  %v1234_v20 = vcombine.high %v1208_v10, %v1216_v11  ;;  %v1250_v21 = vcombine.high %v1224_v12, %v1232_v13  ;;  %v970_v5 = vpop.f32.mrb[2].mxu0 }
 0x233   : > { %v1051_v22 = vcombine.low %v1023_v14, %v1030_v15  ;;  %v2718_v23 = vcombine.high %v1023_v14, %v1030_v15  ;;  %v1067_v24 = vcombine.low %v1039_v16, %v1046_v17  ;;  %v2719_v25 = vcombine.high %v1039_v16, %v1046_v17  ;;  %v2825_v6 = vpop.f32.mrb[3].mxu0 }
 0x234   : > { %v1241_v26 = vrot.slane %v1233_v18, %v3780_v42  ;;  %v1257_v28 = vrot.slane %v1249_v19, %v3780_v42  ;;  %v1248_v37 = vrot.slane %v1234_v20, %v3780_v42  ;;  %v1264_v38 = vrot.slane %v1250_v21, %v3780_v42 }
 0x235   : > { %v1058_v29 = vrot.slane %v1051_v22, %v3777_v35  ;;  %v1066_v30 = vrot.slane %v2718_v23, %v3777_v35  ;;  %v1074_v32 = vrot.slane %v1067_v24, %v3777_v35  ;;  %v1082_v33 = vrot.slane %v2719_v25, %v3777_v35 }
 0x236   : > { %v1265_v34 = vcombine.low %v1241_v26, %v1257_v28  ;;  %v1266_v36 = vcombine.high %v1241_v26, %v1257_v28  ;;  %v1267_v48 = vcombine.low %v1248_v37, %v1264_v38  ;;  %v1268_v49 = vcombine.high %v1248_v37, %v1264_v38 }
 0x237   : > { %v1083_v39 = vcombine.low %v1058_v29, %v1066_v30  ;;  %v1099_v40 = vcombine.low %v1074_v32, %v1082_v33  ;;  %v1084_v50 = vcombine.high %v1058_v29, %v1066_v30  ;;  %v1100_v51 = vcombine.high %v1074_v32, %v1082_v33 }
 0x238   : > { %v1269_v41 = vpack.c.bf16 %v1265_v34, %v1265_v34  ;;  %v1270_v43 = vpack.c.bf16 %v1266_v36, %v1266_v36  ;;  %v1271_v54 = vpack.c.bf16 %v1267_v48, %v1267_v48  ;;  %v1272_v55 = vpack.c.bf16 %v1268_v49, %v1268_v49 }
 0x239   : > { %v1091_v44 = vrot.slane %v1083_v39, %v3780_v42  ;;  %v1107_v45 = vrot.slane %v1099_v40, %v3780_v42  ;;  %v1098_v58 = vrot.slane %v1084_v50, %v3780_v42  ;;  %v1114_v59 = vrot.slane %v1100_v51, %v3780_v42 }
 0x23a   : > { %v1443_v46 = vsel %vm1438_vm2, %v1269_v41, 0  ;;  %v1489_v47 = vsel %vm1438_vm2, %v1270_v43, 0  ;;  %v1535_v60 = vsel %vm1438_vm2, %v1271_v54, 0  ;;  %v1581_v61 = vsel %vm1438_vm2, %v1272_v55, 0 }
 0x23b   : > { %2827 = vmatpush3.bf16.xpose.msra.mxu1 %v1443_v46  ;;  %2833 = vmatpush3.bf16.xpose.msra.mxu0 %v1489_v47  ;;  %v1115_v52 = vcombine.low %v1091_v44, %v1107_v45  ;;  %v1116_v53 = vcombine.high %v1091_v44, %v1107_v45  ;;  %v1117_v62 = vcombine.low %v1098_v58, %v1114_v59  ;;  %v1428_v55 = vand.u32 127, %v988_v27  ;;  %v2732_v27 = vld [vmem:[%s4156_s15 + $0x1] ss:$0 sm:$0xff] }
 0x23c   : > { %2838 = vmatprep.subr.bf16.mxu1 %v3379_v0  ;;  %2844 = vmatprep.subr.bf16.mxu0 %v3379_v0  ;;  %v1118_v63 = vcombine.high %v1098_v58, %v1114_v59  ;;  %v2731_v59 = vld [vmem:[%s4156_s15] ss:$0 sm:$0xff] }
 0x23d   : > { %v1119_v56 = vpack.c.bf16 %v1115_v52, %v1115_v52  ;;  %v1120_v57 = vpack.c.bf16 %v1116_v53, %v1116_v53  ;;  %v1121_v1 = vpack.c.bf16 %v1117_v62, %v1117_v62  ;;  %vm1435_vm3 = vcmp.gt.s32.totalorder %v3774_v31, %v1428_v55  ;;  %v2734_v62 = vld [vmem:[%s4156_s15 + $0x3] ss:$0 sm:$0xff] }
 0x23e   : > { %v1122_v2 = vpack.c.bf16 %v1118_v63, %v1118_v63  ;;  %vm3876_vm5 = vcmp.lt.s32.totalorder %v1428_v55, %v3774_v31 }
 0x242   : > { %2829 = vmatmul.mubr.msk.bf16.vlgmr.msra.gmra.mrb[8].mxu1 %vm1438_vm2, %v1119_v56  ;;  %2835 = vmatmul.mubr.msk.bf16.vlgmr.msra.gmra.mrb[4].mxu0 %vm1438_vm2, %v1120_v57  ;;  %v1436_v56 = vsel %vm1435_vm3, 1.0, %v3379_v0  ;;  %vm2291_vm3 = vcmp.eq.s32.totalorder %v3774_v31, 0 }
 0x243   : > { %2839 = vmatpush3.bf16.xpose.msra.mxu1 %v1535_v60  ;;  %2845 = vmatpush3.bf16.xpose.msra.mxu0 %v1581_v61  ;;  %v1437_v57 = vpack.c.bf16 %v1436_v56, %v1436_v56  ;;  %v3386_v60 = vmov 0   ;;  %v2733_v61 = vld [vmem:[%s4156_s15 + $0x2] ss:$0 sm:$0xff] }
 0x244   : > { %2840 = vmatprep.mubr.msk.bf16.mxu1 %vm3380_vm0, %v3379_v0  ;;  %2846 = vmatprep.mubr.msk.bf16.mxu0 %vm3380_vm0, %v3379_v0 }
 0x245   : > { %2856 = vmatprep.subr.bf16.mxu0 %v3379_v0  ;;  %2908 = vmatprep.subr.msk.bf16.mxu1 %vm1685_vm4, %v1437_v57  ;;  %v1687_v58 = vsel %vm1685_vm4, %v1437_v57, 0 }
 0x246   : > { %3038 = vset.pattern.permute.xlu1 %v3386_v60  ;;  %3039 = vset.pattern.permute.xlu0 %v3386_v60 }
 0x24a   : > { %2841 = vmatmul.mubr.msk.bf16.vlgmr.msra.gmra.mrb[12].mxu1 %vm1438_vm2, %v1121_v1  ;;  %2847 = vmatmul.mubr.msk.bf16.vlgmr.msra.gmra.mrb[8].mxu0 %vm1438_vm2, %v1122_v2 }
 0x24b   : > { %2858 = vmatprep.mubr.msk.bf16.mxu0 %vm3380_vm0, %v3379_v0  ;;  %2851 = vmatpush3.bf16.msra.mxu1 %v1687_v58 }
 0x24c   : > { %2862 = vmatprep.subr.bf16.mxu1 %v3379_v0 }
 0x315   : > { %v1479_v7 = vpop.f32.mrb[8].mxu1  ;;  %v1525_v8 = vpop.f32.mrb[4].mxu0 }
 0x316   : > { %v3833_v9 = vmul.f32 0.35355338, %v1479_v7  ;;  %v3835_v10 = vmul.f32 0.35355338, %v1525_v8  ;;  %v2830_v11 = vpop.f32.mrb[9].mxu1  ;;  %v2836_v12 = vpop.f32.mrb[5].mxu0 }
 0x317   : > { %v1482_v13 = vpop.f32.mrb[10].mxu1  ;;  %v1528_v14 = vpop.f32.mrb[6].mxu0 }
 0x318   : > { %v2831_v15 = vpop.f32.mrb[11].mxu1  ;;  %v2837_v16 = vpop.f32.mrb[7].mxu0  ;;  %v1630_v17 = vsel %vm1438_vm2, %v3835_v10, -inf  ;;  %v1627_v18 = vsel %vm1438_vm2, %v3833_v9, -inf }
 0x319   : > { %1631 = vmax.xlane.f32.xlu1 %v1630_v17  ;;  %1628 = vmax.xlane.f32.xlu0 %v1627_v18 }
 0x31d   : > { %v1571_v19 = vpop.f32.mrb[12].mxu1  ;;  %v1617_v20 = vpop.f32.mrb[8].mxu0 }
 0x31e   : > { %v3841_v21 = vmul.f32 0.35355338, %v1571_v19  ;;  %v2842_v22 = vpop.f32.mrb[13].mxu1  ;;  %v2848_v23 = vpop.f32.mrb[9].mxu0  ;;  %v3843_v26 = vmul.f32 0.35355338, %v1617_v20 }
 0x31f   : > { %v1574_v24 = vpop.f32.mrb[14].mxu1  ;;  %v1620_v25 = vpop.f32.mrb[10].mxu0  ;;  %v1430_v23 = vsub.s32 %v3774_v31, %v1428_v55  ;;  %v3048_v31 = vld [vmem:[%s4099_s14] sm:$0xff]  }
 0x320   : > { %v2843_v28 = vpop.f32.mrb[15].mxu1  ;;  %v2849_v29 = vpop.f32.mrb[11].mxu0  ;;  %v1633_v30 = vsel %vm1438_vm2, %v3841_v21, -inf  ;;  %v1636_v32 = vsel %vm1438_vm2, %v3843_v26, -inf }
 0x321   : > { %1634 = vmax.xlane.f32.xlu0 %v1633_v30  ;;  %v1432_v24 = vsub.s32 0, %v1430_v23 }
 0x323   : > { %v2724_v25 = vmin.u32 %v1432_v24, %v1430_v23 }
 0x325   : > { %1637 = vmax.xlane.f32.xlu0 %v1636_v32  ;;  %v1434_v28 = vcvt.s32.f32 %v2724_v25 }
 0x3a6   : > { %v1632_v33 = vpop.xlane.xlu1 %1631  ;;  %v1629_v34 = vpop.xlane.xlu0 %1628 }
 0x3a7   : > { %v1640_v36 = vsub.f32 %v3835_v10, %v1632_v33  ;;  %v1639_v37 = vsub.f32 %v3833_v9, %v1629_v34 }
 0x3a9   : > { %v1645_v38 = vmul.f32 1.442695, %v1640_v36  ;;  %v1643_v39 = vmul.f32 1.442695, %v1639_v37 }
 0x3ab   : > { %3054 = vpow2.f32 %v1645_v38 }
 0x3ac   : > { %3056 = vpow2.f32 %v1643_v39 }
 0x3ae   : > { %v1635_v40 = vpop.xlane.xlu0 %1634 }
 0x3af   : > { %v1641_v41 = vsub.f32 %v3841_v21, %v1635_v40 }
 0x3b1   : > { %v1647_v43 = vmul.f32 1.442695, %v1641_v41 }
 0x3b2   : > { %v1638_v44 = vpop.xlane.xlu0 %1637 }
 0x3b3   : > { %3058 = vpow2.f32 %v1647_v43  ;;  %v1642_v45 = vsub.f32 %v3843_v26, %v1638_v44 }
 0x3b5   : > { %v3055_v46 = vpop.eup %3054  ;;  %v1649_v47 = vmul.f32 1.442695, %v1642_v45 }
 0x3b6   : > { %v3057_v48 = vpop.eup %3056  ;;  %v1654_v49 = vsel %vm1438_vm2, %v3055_v46, 0.0 }
 0x3b7   : > { %3060 = vpow2.f32 %v1649_v47  ;;  %v1651_v50 = vsel %vm1438_vm2, %v3057_v48, 0.0  ;;  %1655 = vadd.xlane.f32.xlu0 %v1654_v49 }
 0x3b8   : > { %1652 = vadd.xlane.f32.xlu1 %v1651_v50 }
 0x3bd   : > { %v3059_v51 = vpop.eup %3058 }
 0x3be   : > { %v1657_v52 = vsel %vm1438_vm2, %v3059_v51, 0.0 }
 0x3bf   : > { %1658 = vadd.xlane.f32.xlu1 %v1657_v52 }
 0x3c1   : > { %v3061_v53 = vpop.eup %3060 }
 0x3c2   : > { %v1660_v54 = vsel %vm1438_vm2, %v3061_v53, 0.0 }
 0x3c3   : > { %1661 = vadd.xlane.f32.xlu0 %v1660_v54 }
 0x3d0   : > { %1799 = vperm.xlu1 %3038, %v2731_v59  }
 0x3d4   : > { %1807 = vperm.xlu1 %3038, %v2733_v61  }
 0x3d8   : > { %1811 = vperm.xlu1 %3038, %v2734_v62  }
 0x3d9   : > { %1803 = vperm.xlu0 %3039, %v2732_v27  }
 0x444   : > { %v1656_v63 = vpop.xlane.xlu0 %1655 }
 0x445   : > { %v1653_v1 = vpop.xlane.xlu1 %1652  ;;  %3062 = vrcp.f32 %v1656_v63 }
 0x446   : > { %3064 = vrcp.f32 %v1653_v1 }
 0x44c   : > { %v1659_v2 = vpop.xlane.xlu1 %1658 }
 0x44d   : > { %3066 = vrcp.f32 %v1659_v2 }
 0x44f   : > { %v3063_v4 = vpop.eup %3062 }
 0x450   : > { %v3065_v6 = vpop.eup %3064  ;;  %v1662_v7 = vpop.xlane.xlu0 %1661  ;;  %v1668_v8 = vmul.f32 %v3063_v4, %v3055_v46 }
 0x451   : > { %3068 = vrcp.f32 %v1662_v7  ;;  %v1667_v11 = vmul.f32 %v3065_v6, %v3057_v48  ;;  %v1800_v44 = vpop.permute.xlu1 %1799 }
 0x452   : > { %v1674_v12 = vsel %vm3876_vm5, %v1668_v8, 0.0 }
 0x453   : > { %v1673_v13 = vsel %vm3876_vm5, %v1667_v11, 0.0 }
 0x454   : > { %v1677_v14 = vpack.c.bf16 %v1674_v12, %v1673_v13 }
 0x455   : > { %v1808_v45 = vpop.permute.xlu1 %1807 }
 0x456   : > { %2852 = vmatprep.mubr.msk.bf16.mxu1 %vm1438_vm2, %v1677_v14 }
 0x457   : > { %v3067_v15 = vpop.eup %3066 }
 0x458   : > { %v1669_v16 = vmul.f32 %v3067_v15, %v3059_v51  ;;  %v1804_v63 = vpop.permute.xlu0 %1803 }
 0x459   : > { %v1812_v59 = vpop.permute.xlu1 %1811 }
 0x45a   : > { %v1675_v19 = vsel %vm3876_vm5, %v1669_v16, 0.0 }
 0x45b   : > { %v3069_v17 = vpop.eup %3068 }
 0x45c   : > { %v1670_v18 = vmul.f32 %v3069_v17, %v3061_v53 }
 0x45e   : > { %v1676_v20 = vsel %vm3876_vm5, %v1670_v18, 0.0 }
 0x45f   : > { %v1678_v22 = vpack.c.bf16 %v1676_v20, %v1675_v19 }
 0x461   : > { %2853 = vmatmul.mubr.msk.bf16.vlgmr.msra.gmra.mrb[16].mxu1 %vm1438_vm2, %v1678_v22 }
 0x462   : > { %2864 = vmatprep.mubr.msk.bf16.mxu1 %vm3380_vm0, %v3379_v0 }
 0x534   : > { %v2854_v29 = vpop.f32.mrb[16].mxu1 }
 0x535   : > { %v1740_v30 = vmul.f32 %v2854_v29, %v1434_v28  ;;  %v1723_v32 = vpop.f32.mrb[17].mxu1 }
 0x536   : > { %v1738_v33 = vmul.f32 %v1723_v32, %v1434_v28  ;;  %v2855_v34 = vpop.f32.mrb[18].mxu1 }
 0x537   : > { %v1744_v36 = vmax.f32 %v1740_v30, 0.0  ;;  %v1741_v37 = vmul.f32 %v2855_v34, %v1434_v28  ;;  %v1726_v38 = vpop.f32.mrb[19].mxu1 }
 0x538   : > { %v1742_v39 = vmax.f32 %v1738_v33, 0.0  ;;  %v1739_v40 = vmul.f32 %v1726_v38, %v1434_v28 }
 0x539   : > { %3070 = vrsqrt.f32 %v1744_v36  ;;  %v1745_v41 = vmax.f32 %v1741_v37, 0.0  ;;  %vm1762_vm6 = vcmp.eq.f32.partialorder %v1744_v36, inf  ;;  %vm1764_vm9 = vcmp.eq.f32.partialorder %v1744_v36, 0.0 }
 0x53a   : > { %3072 = vrsqrt.f32 %v1742_v39  ;;  %v1743_v43 = vmax.f32 %v1739_v40, 0.0  ;;  %vm1748_vm7 = vcmp.eq.f32.partialorder %v1742_v39, inf  ;;  %vm1750_vm8 = vcmp.eq.f32.partialorder %v1742_v39, 0.0 }
 0x53b   : > { %3074 = vrsqrt.f32 %v1745_v41  ;;  %v1751_v51 = vand.u32 2147483648, %v1742_v39  ;;  %v1765_v52 = vand.u32 2147483648, %v1744_v36  ;;  %vm1769_vm10 = vcmp.eq.f32.partialorder %v1745_v41, inf }
 0x53c   : > { %3076 = vrsqrt.f32 %v1743_v43  ;;  %vm1771_vm11 = vcmp.eq.f32.partialorder %v1745_v41, 0.0  ;;  %v1772_v56 = vand.u32 2147483648, %v1745_v41  ;;  %vm1755_vm12 = vcmp.eq.f32.partialorder %v1743_v43, inf }
 0x53d   : > { %v1758_v1 = vand.u32 2147483648, %v1743_v43  ;;  %vm1757_vm13 = vcmp.eq.f32.partialorder %v1743_v43, 0.0 }
 0x543   : > { %v3071_v46 = vpop.eup %3070 }
 0x544   : > { %v3073_v47 = vpop.eup %3072  ;;  %v1761_v48 = vmul.f32 %v3071_v46, %v1744_v36 }
 0x545   : > { %v3075_v49 = vpop.eup %3074  ;;  %v1747_v50 = vmul.f32 %v3073_v47, %v1742_v39 }
 0x546   : > { %v3077_v53 = vpop.eup %3076  ;;  %v1763_v54 = vsel %vm1762_vm6, %v1744_v36, %v1761_v48  ;;  %v1768_v55 = vmul.f32 %v3075_v49, %v1745_v41 }
 0x547   : > { %v1749_v57 = vsel %vm1748_vm7, %v1742_v39, %v1747_v50  ;;  %v1766_v58 = vsel %vm1764_vm9, %v1765_v52, %v1763_v54  ;;  %v1754_v60 = vmul.f32 %v3077_v53, %v1743_v43 }
 0x548   : > { %v1752_v27 = vsel %vm1750_vm8, %v1751_v51, %v1749_v57  ;;  %v1816_v61 = vmul.f32 %v1808_v45, %v1766_v58  ;;  %v1770_v62 = vsel %vm1769_vm10, %v1745_v41, %v1768_v55 }
 0x549   : > { %v1814_v2 = vmul.f32 %v1800_v44, %v1752_v27  ;;  %v1773_v4 = vsel %vm1771_vm11, %v1772_v56, %v1770_v62  ;;  %v1756_v6 = vsel %vm1755_vm12, %v1743_v43, %v1754_v60  ;;  %v2714_v43 = vld [vmem:[#allocation7] ss:$0 sm:$0xff] }
 0x54a   : > { %v1822_v7 = vmul.f32 1.442695, %v1816_v61  ;;  %v1817_v8 = vmul.f32 %v1812_v59, %v1773_v4  ;;  %v1759_v11 = vsel %vm1757_vm13, %v1758_v1, %v1756_v6  ;;  %v968_v44 = vadd.f32 %v2714_v43, %v3831_v3 }
 0x54b   : > { %v1818_v12 = vmul.f32 1.442695, %v1814_v2  ;;  %v1815_v13 = vmul.f32 %v1804_v63, %v1759_v11 }
 0x54c   : > { %3078 = vpow2.f32 %v1822_v7  ;;  %v1824_v14 = vmul.f32 1.442695, %v1817_v8 }
 0x54d   : > { %3080 = vpow2.f32 %v1818_v12  ;;  %v1820_v15 = vmul.f32 1.442695, %v1815_v13 }
 0x54e   : > { %3082 = vpow2.f32 %v1824_v14 }
 0x54f   : > { %3084 = vpow2.f32 %v1820_v15 }
 0x556   : > { %v3079_v16 = vpop.eup %3078 }
 0x557   : > { %v3081_v17 = vpop.eup %3080  ;;  %v1828_v18 = vmax.f32 %v3079_v16, 1e-05 }
 0x558   : > { %v3083_v19 = vpop.eup %3082  ;;  %v1826_v20 = vmax.f32 %v3081_v17, 1e-05 }
 0x559   : > { %v3085_v22 = vpop.eup %3084  ;;  %v1832_v23 = vmin.f32 %v1828_v18, 100000.0  ;;  %v1829_v24 = vmax.f32 %v3083_v19, 1e-05 }
 0x55a   : > { %v1830_v25 = vmin.f32 %v1826_v20, 100000.0  ;;  %v1827_v28 = vmax.f32 %v3085_v22, 1e-05 }
 0x55b   : > { %v1833_v29 = vmin.f32 %v1829_v24, 100000.0  ;;  %v1836_v33 = vmul.f32 %v1832_v23, %v3841_v21 }
 0x55c   : > { %v1831_v30 = vmin.f32 %v1827_v28, 100000.0  ;;  %v1834_v32 = vmul.f32 %v1830_v25, %v3833_v9 }
 0x55d   : > { %v1840_v39 = vsel %vm3876_vm5, %v1836_v33, -1e+20  ;;  %v1837_v40 = vmul.f32 %v1833_v29, %v3843_v26 }
 0x55e   : > { %v1838_v34 = vsel %vm3876_vm5, %v1834_v32, -1e+20  ;;  %v1835_v36 = vmul.f32 %v1831_v30, %v3835_v10  ;;  %v1848_v21 = vsel %vm1438_vm2, %v1840_v39, -inf }
 0x55f   : > { %v1842_v37 = vsel %vm1438_vm2, %v1838_v34, -inf  ;;  %v1841_v10 = vsel %vm3876_vm5, %v1837_v40, -1e+20 }
 0x560   : > { %1843 = vmax.xlane.f32.xlu1 %v1842_v37  ;;  %v1839_v38 = vsel %vm3876_vm5, %v1835_v36, -1e+20  ;;  %v1851_v41 = vsel %vm1438_vm2, %v1841_v10, -inf }
 0x561   : > { %v1845_v9 = vsel %vm1438_vm2, %v1839_v38, -inf }
 0x562   : > { %1846 = vmax.xlane.f32.xlu0 %v1845_v9 }
 0x564   : > { %1849 = vmax.xlane.f32.xlu1 %v1848_v21 }
 0x568   : > { %1852 = vmax.xlane.f32.xlu1 %v1851_v41 }
 0x578   : > { %1277 = vrot.lane.b32.xlu0 %v968_v44, %s3383_s1  ;;  %s4160_s1 = sld [smem:[#allocation35_spill]] }
 0x579   : > { %1274 = vrot.lane.b32.xlu1 %v968_v44, %s3382_s18  ;;  %s3388_s18 = smov 8  }
 0x5ed   : > { %v1844_v26 = vpop.xlane.xlu1 %1843 }
 0x5ee   : > { %v1854_v45 = vsub.f32 %v1838_v34, %v1844_v26 }
 0x5ef   : > { %v1847_v46 = vpop.xlane.xlu0 %1846 }
 0x5f0   : > { %v1858_v47 = vmul.f32 1.442695, %v1854_v45  ;;  %v1855_v48 = vsub.f32 %v1839_v38, %v1847_v46 }
 0x5f1   : > { %v1850_v49 = vpop.xlane.xlu1 %1849 }
 0x5f2   : > { %3086 = vpow2.f32 %v1858_v47  ;;  %v1860_v50 = vmul.f32 1.442695, %v1855_v48  ;;  %v1856_v58 = vsub.f32 %v1840_v39, %v1850_v49 }
 0x5f3   : > { %v1278_v63 = vpop.permute.xlu0 %1277 }
 0x5f4   : > { %3088 = vpow2.f32 %v1860_v50  ;;  %v1862_v59 = vmul.f32 1.442695, %v1856_v58  ;;  %v1283_v2 = vcombine.low %v968_v44, %v1278_v63  ;;  %v1284_v4 = vcombine.high %v968_v44, %v1278_v63 }
 0x5f5   : > { %v1853_v5 = vpop.xlane.xlu1 %1852 }
 0x5f6   : > { %v1857_v51 = vsub.f32 %v1841_v10, %v1853_v5  ;;  %v1291_v11 = vrot.slane %v1283_v2, %v3777_v35  ;;  %v1298_v12 = vrot.slane %v1284_v4, %v3777_v35 }
 0x5f8   : > { %v1864_v52 = vmul.f32 1.442695, %v1857_v51 }
 0x5f9   : > { %v1275_v61 = vpop.permute.xlu1 %1274 }
 0x5fa   : > { %3090 = vpow2.f32 %v1864_v52 }
 0x5fb   : > { %3092 = vpow2.f32 %v1862_v59 }
 0x5fc   : > { %v3913_v53 = vpop.eup %3086 }
 0x5fd   : > { %v1866_v3 = vsel %vm1438_vm2, %v3913_v53, 0.0 }
 0x5fe   : > { %v3089_v54 = vpop.eup %3088  ;;  %1867 = vadd.xlane.f32.xlu1 %v1866_v3 }
 0x5ff   : > { %v1869_v55 = vsel %vm1438_vm2, %v3089_v54, 0.0 }
 0x602   : > { %1870 = vadd.xlane.f32.xlu1 %v1869_v55 }
 0x604   : > { %v3918_v56 = vpop.eup %3090 }
 0x605   : > { %v1875_v57 = vsel %vm1438_vm2, %v3918_v56, 0.0  ;;  %v3923_v60 = vpop.eup %3092 }
 0x606   : > { %1876 = vadd.xlane.f32.xlu0 %v1875_v57  ;;  %v1872_v27 = vsel %vm1438_vm2, %v3923_v60, 0.0 }
 0x613   : > { %1280 = vrot.lane.b32.xlu1 %v968_v44, %s3381_s6  ;;  %s3387_s6 = smov 16  }
 0x637   : > { %1873 = vadd.xlane.f32.xlu1 %v1872_v27 }
 0x68b   : > { %v1868_v62 = vpop.xlane.xlu1 %1867 }
 0x68c   : > { %3094 = vrcp.f32 %v1868_v62 }
 0x68f   : > { %v1871_v1 = vpop.xlane.xlu1 %1870 }
 0x690   : > { %3096 = vrcp.f32 %v1871_v1 }
 0x693   : > { %v1281_v6 = vpop.permute.xlu1 %1280  ;;  %v1877_v36 = vpop.xlane.xlu0 %1876 }
 0x694   : > { %v1299_v7 = vcombine.low %v1275_v61, %v1281_v6  ;;  %v1300_v8 = vcombine.high %v1275_v61, %v1281_v6  ;;  %3098 = vrcp.f32 %v1877_v36 }
 0x696   : > { %v1307_v13 = vrot.slane %v1299_v7, %v3777_v35  ;;  %v1314_v14 = vrot.slane %v1300_v8, %v3777_v35  ;;  %v3095_v9 = vpop.eup %3094 }
 0x697   : > { %v1886_v48 = vmul.f32 %v3095_v9, %v3913_v53 }
 0x698   : > { %v1315_v15 = vcombine.low %v1291_v11, %v1307_v13  ;;  %v1316_v16 = vcombine.high %v1291_v11, %v1307_v13  ;;  %v1331_v17 = vcombine.low %v1298_v12, %v1314_v14  ;;  %v1332_v18 = vcombine.high %v1298_v12, %v1314_v14 }
 0x699   : > { %v1890_v57 = vpack.c.bf16 %v1886_v48, %v1886_v48 }
 0x69a   : > { %v1323_v19 = vrot.slane %v1315_v15, %v3780_v42  ;;  %v1330_v20 = vrot.slane %v1316_v16, %v3780_v42  ;;  %v1339_v22 = vrot.slane %v1331_v17, %v3780_v42  ;;  %v1346_v23 = vrot.slane %v1332_v18, %v3780_v42  ;;  %v3097_v44 = vpop.eup %3096 }
 0x69b   : > { %v1887_v49 = vmul.f32 %v3097_v44, %v3089_v54 }
 0x69c   : > { %v1351_v24 = vcombine.low %v1323_v19, %v1330_v20  ;;  %v2722_v25 = vcombine.high %v1323_v19, %v1330_v20  ;;  %v1367_v28 = vcombine.low %v1339_v22, %v1346_v23  ;;  %v2723_v29 = vcombine.high %v1339_v22, %v1346_v23 }
 0x69d   : > { %v1891_v58 = vpack.c.bf16 %v1887_v49, %v1887_v49 }
 0x69e   : > { %v1358_v30 = vrot.slane %v1351_v24, %v3777_v35  ;;  %v1366_v32 = vrot.slane %v2722_v25, %v3777_v35  ;;  %v1374_v33 = vrot.slane %v1367_v28, %v3777_v35  ;;  %v1382_v34 = vrot.slane %v2723_v29, %v3777_v35  ;;  %v3099_v59 = vpop.eup %3098 }
 0x69f   : > { %v1889_v27 = vmul.f32 %v3099_v59, %v3918_v56 }
 0x6a0   : > { %v1383_v37 = vcombine.low %v1358_v30, %v1366_v32  ;;  %v1399_v38 = vcombine.low %v1374_v33, %v1382_v34  ;;  %v1384_v39 = vcombine.high %v1358_v30, %v1366_v32  ;;  %v1400_v40 = vcombine.high %v1374_v33, %v1382_v34 }
 0x6a1   : > { %v1893_v61 = vpack.c.bf16 %v1889_v27, %v1889_v27 }
 0x6a2   : > { %v1391_v21 = vrot.slane %v1383_v37, %v3780_v42  ;;  %v1407_v10 = vrot.slane %v1399_v38, %v3780_v42  ;;  %v1398_v41 = vrot.slane %v1384_v39, %v3780_v42  ;;  %v1414_v43 = vrot.slane %v1400_v40, %v3780_v42  ;;  %v3046_v38 = vld [vmem:[#allocation8] sm:$0xff]  }
 0x6a4   : > { %v1415_v26 = vcombine.low %v1391_v21, %v1407_v10  ;;  %v1416_v45 = vcombine.high %v1391_v21, %v1407_v10  ;;  %v1417_v46 = vcombine.low %v1398_v41, %v1414_v43  ;;  %v1418_v47 = vcombine.high %v1398_v41, %v1414_v43 }
 0x6a6   : > { %v1419_v50 = vpack.c.bf16 %v1415_v26, %v1415_v26  ;;  %v1420_v5 = vpack.c.bf16 %v1416_v45, %v1416_v45  ;;  %v1421_v3 = vpack.c.bf16 %v1417_v46, %v1417_v46  ;;  %v1422_v55 = vpack.c.bf16 %v1418_v47, %v1418_v47  ;;  %v3047_v26 = vld [vmem:[#allocation8 + $0x8] sm:$0xff]  }
 0x6a8   : > { %v1898_v51 = vsel %vm1685_vm4, %v1419_v50, 0  ;;  %v1944_v52 = vsel %vm1685_vm4, %v1420_v5, 0  ;;  %v1990_v53 = vsel %vm1685_vm4, %v1421_v3, 0  ;;  %v2036_v54 = vsel %vm1685_vm4, %v1422_v55, 0 }
 0x6a9   : > { %2857 = vmatpush3.bf16.msra.mxu0 %v1898_v51  ;;  %2863 = vmatpush3.bf16.msra.mxu1 %v1944_v52 }
 0x6aa   : > { %2868 = vmatprep.subr.bf16.mxu0 %v3379_v0  ;;  %2874 = vmatprep.subr.bf16.mxu1 %v3379_v0 }
 0x6ac   : > { %2859 = vmatmul.mubr.msk.bf16.vlgmr.msra.gmra.mrb[12].mxu0 %vm1438_vm2, %v1890_v57  ;;  %2865 = vmatmul.mubr.msk.bf16.vlgmr.msra.gmra.mrb[20].mxu1 %vm1438_vm2, %v1891_v58 }
 0x6ad   : > { %2869 = vmatpush3.bf16.msra.mxu0 %v1990_v53  ;;  %2875 = vmatpush3.bf16.msra.mxu1 %v2036_v54 }
 0x6ae   : > { %2876 = vmatprep.mubr.msk.bf16.mxu1 %vm3380_vm0, %v3379_v0  ;;  %2870 = vmatprep.mubr.msk.bf16.mxu0 %vm3380_vm0, %v3379_v0 }
 0x6af   : > { %2880 = vmatprep.subr.bf16.mxu0 %v3379_v0  ;;  %2888 = vmatprep.subr.bf16.mxu1 %v3379_v0 }
 0x6b4   : > { %2877 = vmatmul.mubr.msk.bf16.vlgmr.msra.gmra.mrb[24].mxu1 %vm1438_vm2, %v1893_v61 }
 0x6b5   : > { %2892 = vmatprep.mubr.msk.bf16.mxu1 %vm3380_vm0, %v3379_v0  ;;  %2889 = vmatpush3.bf16.msra.mxu1 %v3048_v31 }
 0x6b6   : > { %2890 = vmatprep.subr.bf16.mxu1 %v3379_v0 }
 0x6c4   : > { %v1874_v62 = vpop.xlane.xlu1 %1873 }
 0x6c5   : > { %3100 = vrcp.f32 %v1874_v62 }
 0x6cf   : > { %v3101_v63 = vpop.eup %3100 }
 0x6d0   : > { %v1888_v56 = vmul.f32 %v3101_v63, %v3923_v60 }
 0x6d2   : > { %v1892_v1 = vpack.c.bf16 %v1888_v56, %v1888_v56 }
 0x6d4   : > { %2871 = vmatmul.mubr.msk.bf16.vlgmr.msra.gmra.mrb[16].mxu0 %vm1438_vm2, %v1892_v1  ;;  %v2744_v1 = vld [vmem:[#allocation10] ss:$0 sm:$0xff] }
 0x6d5   : > { %2884 = vmatprep.mubr.msk.bf16.mxu0 %vm3380_vm0, %v3379_v0  ;;  %2881 = vmatpush3.bf16.msra.mxu0 %v3046_v38  ;;  %v3053_v38 = vld [vmem:[%s4101_s16 + $0x18] sm:$0xff]  }
 0x6d6   : > { %2882 = vmatprep.subr.bf16.mxu0 %v3379_v0 }
 0x6d9   : > { %2883 = vmatpush3.bf16.msra.mxu0 %v3047_v26 }
 0x6da   : > { %2896 = vmatprep.subr.bf16.mxu0 %v3379_v0 }
 0x77f   : > { %v1934_v2 = vpop.f32.mrb[12].mxu0  ;;  %v1980_v4 = vpop.f32.mrb[20].mxu1 }
 0x780   : > { %v2860_v6 = vpop.f32.mrb[13].mxu0  ;;  %v2866_v7 = vpop.f32.mrb[21].mxu1 }
 0x781   : > { %v1937_v8 = vpop.f32.mrb[14].mxu0  ;;  %v1983_v11 = vpop.f32.mrb[22].mxu1 }
 0x782   : > { %v2861_v12 = vpop.f32.mrb[15].mxu0  ;;  %v2867_v13 = vpop.f32.mrb[23].mxu1 }
 0x783   : > { %v3106_v12 = vld [vmem:[%s3729_s25] sm:$0xff]  ;;  %s2702_s25 = sshll.u32 %s748_s17, 3 }
 0x784   : > { %s750_s28 = scalar_lea.vmem [#allocation13], %s2702_s25  ;;  %s3279_s25 = sshll.u32 %s3390_s24, 4  ;;  %s3280_s25 = int_to_ptr.vmem [resolvable:$false] %s3279_s25 }
 0x785   : > { %s2530_s29 = sshll.u32 %s750_s28, 4  ;;  %s3281_s21 = scalar_lea.vmem %s3280_s25, 256  ;;  %s4039_s29 = int_to_ptr.vmem [resolvable:$true] %s2530_s29 }
 0x786   : > { %s3275_s4 = scalar_lea.vmem %s4039_s29, 128  ;;  %p3282_p2 = scmp.lt.s32.totalorder %s4039_s29, %s3280_s25 }
 0x787   : > { %v2072_v14 = vpop.f32.mrb[24].mxu1  ;;  %p3276_p1 = scmp.ne.s32.totalorder %s4039_s29, %s3275_s4  ;;  %p3283_p3 = scmp.lt.s32.totalorder %s3281_s21, %s3275_s4 }
 0x788   : > { %v2094_v15 = vcombine.low %v1980_v4, %v2072_v14  ;;  %v2095_v16 = vcombine.high %v1980_v4, %v2072_v14  ;;  %v2878_v17 = vpop.f32.mrb[25].mxu1 }
 0x789   : > { %v2075_v18 = vpop.f32.mrb[26].mxu1  ;;  %p3277_p11 = pnand %p3276_p1, %p4167_p10  ;;  %p3284_p5 = por %p3283_p3, %p3282_p2 }
 0x78a   : > { %v2879_v60 = vpop.f32.mrb[27].mxu1  ;;  %v2102_v25 = vrot.slane %v2094_v15, %v3777_v35  ;;  %v2109_v28 = vrot.slane %v2095_v16, %v3777_v35 }
 0x78b   : > { %p3278_p0 = pneg %p3277_p11 }
 0x78d   : > { %p3285_p6 = pnand %p3284_p5, %p3278_p0 }
 0x7a7   : > { %v2026_v19 = vpop.f32.mrb[16].mxu0 }
 0x7a8   : > { %v2078_v20 = vcombine.low %v1934_v2, %v2026_v19  ;;  %v2079_v22 = vcombine.high %v1934_v2, %v2026_v19  ;;  %v2872_v23 = vpop.f32.mrb[17].mxu0  ;;  %v3049_v19 = vld [vmem:[%s4099_s14 + $0x8] sm:$0xff]  }
 0x7a9   : > { %v2029_v24 = vpop.f32.mrb[18].mxu0  ;;  %2891 = vmatpush3.bf16.msra.mxu1 %v3049_v19 }
 0x7aa   : > { %v2086_v29 = vrot.slane %v2078_v20, %v3777_v35  ;;  %v2093_v30 = vrot.slane %v2079_v22, %v3777_v35  ;;  %v2873_v32 = vpop.f32.mrb[19].mxu0  ;;  %v3050_v20 = vld [vmem:[%s4101_s16] sm:$0xff]   ;;  %v3051_v22 = vld [vmem:[%s4101_s16 + $0x8] sm:$0xff]  }
 0x7ab   : > { %v2746_v32 = vld [vmem:[%s4098_s13] ss:$0 sm:$0xff] }
 0x7ac   : > { %v2110_v33 = vcombine.low %v2086_v29, %v2102_v25  ;;  %v2111_v34 = vcombine.high %v2086_v29, %v2102_v25  ;;  %v2126_v36 = vcombine.low %v2093_v30, %v2109_v28  ;;  %v2127_v37 = vcombine.high %v2093_v30, %v2109_v28  ;;  %v2745_v29 = vld [vmem:[#allocation11] ss:$0 sm:$0xff] }
 0x7ae   : > { %v2118_v39 = vrot.slane %v2110_v33, %v3780_v42  ;;  %v2125_v40 = vrot.slane %v2111_v34, %v3780_v42  ;;  %v2134_v9 = vrot.slane %v2126_v36, %v3780_v42  ;;  %v2141_v21 = vrot.slane %v2127_v37, %v3780_v42  ;;  %v3052_v37 = vld [vmem:[%s4101_s16 + $0x10] sm:$0xff]  }
 0x7b0   : > { %v2146_v10 = vcombine.low %v2118_v39, %v2125_v40  ;;  %v2739_v41 = vcombine.high %v2118_v39, %v2125_v40  ;;  %v2162_v43 = vcombine.low %v2134_v9, %v2141_v21  ;;  %v2740_v44 = vcombine.high %v2134_v9, %v2141_v21 }
 0x7b2   : > { %v2153_v45 = vrot.slane %v2146_v10, %v3777_v35  ;;  %v2161_v46 = vrot.slane %v2739_v41, %v3777_v35  ;;  %v2169_v47 = vrot.slane %v2162_v43, %v3777_v35  ;;  %v2177_v48 = vrot.slane %v2740_v44, %v3777_v35 }
 0x7b4   : > { %v2179_v49 = vcombine.high %v2153_v45, %v2161_v46  ;;  %v2195_v50 = vcombine.high %v2169_v47, %v2177_v48  ;;  %v2178_v5 = vcombine.low %v2153_v45, %v2161_v46  ;;  %v2194_v51 = vcombine.low %v2169_v47, %v2177_v48 }
 0x7b6   : > { %v2193_v52 = vrot.slane %v2179_v49, %v3780_v42  ;;  %v2209_v3 = vrot.slane %v2195_v50, %v3780_v42  ;;  %v2186_v55 = vrot.slane %v2178_v5, %v3780_v42  ;;  %v2202_v57 = vrot.slane %v2194_v51, %v3780_v42 }
 0x7b8   : > { %v2212_v58 = vcombine.low %v2193_v52, %v2209_v3  ;;  %v2211_v59 = vcombine.high %v2186_v55, %v2202_v57  ;;  %v2213_v53 = vcombine.high %v2193_v52, %v2209_v3  ;;  %v2210_v54 = vcombine.low %v2186_v55, %v2202_v57 }
 0x7ba   : > { %2219 = vrot.lane.b32.xlu1 %v2212_v58, %s3387_s6  ;;  %2215 = vrot.lane.b32.xlu0 %v2211_v59, %s3388_s18  ;;  %s4159_s18 = sld [smem:[#allocation34_spill]] }
 0x7be   : > { %2223 = vrot.lane.b32.xlu1 %v2213_v53, %s3389_s23  ;;  %s4165_s23 = sld [smem:[#allocation38_spill]] }
 0x7c0   : > { %v2747_v39 = vld [vmem:[%s4159_s18] ss:$0 sm:$0xff] }
 0x7c4   : > { %s4166_s27 = smov %s4165_s23 }
 0x82c   : > { %v2220_v35 = vpop.permute.xlu1 %2219  ;;  %v2216_v27 = vpop.permute.xlu0 %2215 }
 0x82d   : > { %v2226_v61 = vsel %vm1438_vm2, %v2210_v54, %v2216_v27  ;;  %v2757_v54 = vld [vmem:[%s4163_s2] ss:$0 sm:$0xff] }
 0x82e   : > { %v2228_v63 = vsel %vm2227_vm14, %v2226_v61, %v2220_v35  ;;  %v2758_v27 = vld [vmem:[%s4164_s20] ss:$0 sm:$0xff] }
 0x830   : > { %v2224_v62 = vpop.permute.xlu1 %2223 }
 0x831   : > { %v2230_v42 = vsel %vm2229_vm15, %v2228_v63, %v2224_v62 }
 0x832   : > { %v2231_v56 = vpack.c.bf16 %v2230_v42, %v2230_v42 }
 0x834   : > { %2885 = vmatmul.mubr.msk.bf16.vlgmr.msra.gmra.mrb[20].mxu0 %vm795_vm1, %v2231_v56 }
 0x835   : > { %2904 = vmatprep.mubr.msk.bf16.mxu0 %vm3380_vm0, %v3379_v0  ;;  %2897 = vmatpush3.bf16.msra.mxu0 %v3050_v20  ;;  %vm2440_vm0 = vcmask 523264  }
 0x836   : > { %2898 = vmatprep.subr.bf16.mxu0 %v3379_v0 }
 0x839   : > { %2899 = vmatpush3.bf16.msra.mxu0 %v3051_v22 }
 0x83a   : > { %2900 = vmatprep.subr.bf16.mxu0 %v3379_v0 }
 0x83d   : > { %2901 = vmatpush3.bf16.msra.mxu0 %v3052_v37 }
 0x83e   : > { %2902 = vmatprep.subr.bf16.mxu0 %v3379_v0  ;;  %v2751_v0 = vld [vmem:[%s4160_s1] ss:$0 sm:$0xff]  ;;  %s4037_s1 = scalar_lea.hbm %s4165_s23, %s2760_s3 }
 0x841   : > { %2903 = vmatpush3.bf16.msra.mxu0 %v3053_v38 }
 0x907   : > { %v2285_v2 = vpop.f32.mrb[20].mxu0 }
 0x908   : > { %v2292_v4 = vsel %vm2291_vm3, 0.0, %v2285_v2  ;;  %v2886_v6 = vpop.f32.mrb[21].mxu0 }
 0x909   : > { %v2300_v7 = vadd.f32 %v2744_v1, %v2292_v4  ;;  %v2288_v8 = vpop.f32.mrb[22].mxu0 }
 0x90a   : > { %v2887_v11 = vpop.f32.mrb[23].mxu0 }
 0x90b   : > { %v2301_v13 = vadd.f32 %v3106_v12, %v2300_v7 }
 0x90d   : > { %v2304_v14 = vsel %vm795_vm1, %v2301_v13, 0.0 }
 0x90e   : > { %2305 = vadd.xlane.f32.xlu0 %v2304_v14 }
 0x99b   : > { %v2306_v15 = vpop.xlane.xlu0 %2305 }
 0x99c   : > { %v2308_v16 = vmul.f32 0.03125, %v2306_v15 }
 0x99e   : > { %v2309_v17 = vsub.f32 %v2301_v13, %v2308_v16 }
 0x9a0   : > { %v2310_v18 = vmul.f32 %v2309_v17, %v2309_v17 }
 0x9a2   : > { %v2311_v60 = vsel %vm795_vm1, %v2310_v18, 0.0 }
 0x9a3   : > { %2312 = vadd.xlane.f32.xlu1 %v2311_v60 }
 0xa30   : > { %v2313_v23 = vpop.xlane.xlu1 %2312 }
 0xa31   : > { %v2314_v24 = vmul.f32 0.03125, %v2313_v23 }
 0xa33   : > { %v2315_v25 = vadd.f32 1e-05, %v2314_v24 }
 0xa35   : > { %3102 = vrsqrt.f32 %v2315_v25 }
 0xa3f   : > { %v3103_v28 = vpop.eup %3102 }
 0xa40   : > { %v2317_v30 = vmul.f32 %v3103_v28, %v2309_v17 }
 0xa42   : > { %v2324_v33 = vmul.f32 %v2745_v29, %v2317_v30 }
 0xa44   : > { %v2331_v34 = vadd.f32 %v2746_v32, %v2324_v33 }
 0xa46   : > { %v2332_v36 = vpack.c.bf16 %v2331_v34, %v2331_v34 }
 0xa48   : > { %2893 = vmatmul.mubr.msk.bf16.vlgmr.msra.gmra.mrb[28].mxu1 %vm795_vm1, %v2332_v36 }
 0xb1b   : > { %v2393_v40 = vpop.f32.mrb[28].mxu1 }
 0xb1c   : > { %v2394_v9 = vadd.f32 %v2747_v39, %v2393_v40  ;;  %v2894_v21 = vpop.f32.mrb[29].mxu1 }
 0xb1d   : > { %v2396_v10 = vpop.f32.mrb[30].mxu1 }
 0xb1e   : > { %v2399_v41 = vmax.f32 %v2394_v9, 0.0  ;;  %v2895_v43 = vpop.f32.mrb[31].mxu1 }
 0xb20   : > { %v2400_v44 = vpack.c.bf16 %v2399_v41, %v2399_v41 }
 0xb22   : > { %2905 = vmatmul.mubr.msk.bf16.vlgmr.msra.gmra.mrb[24].mxu0 %vm2440_vm0, %v2400_v44 }
 0xbf5   : > { %v2478_v26 = vpop.f32.mrb[24].mxu0 }
 0xbf6   : > { %v2479_v45 = vadd.f32 %v2751_v0, %v2478_v26  ;;  %v2906_v46 = vpop.f32.mrb[25].mxu0 }
 0xbf7   : > { %v2481_v47 = vpop.f32.mrb[26].mxu0 }
 0xbf8   : > { %v2907_v48 = vpop.f32.mrb[27].mxu0  ;;  %v2484_v49 = vadd.f32 %v2479_v45, %v2331_v34 }
 0xbfa   : > { %v2487_v50 = vsel %vm795_vm1, %v2484_v49, 0.0 }
 0xbfb   : > { %2488 = vadd.xlane.f32.xlu0 %v2487_v50 }
 0xc88   : > { %v2489_v5 = vpop.xlane.xlu0 %2488 }
 0xc89   : > { %v2490_v51 = vmul.f32 0.03125, %v2489_v5 }
 0xc8b   : > { %v2491_v52 = vsub.f32 %v2484_v49, %v2490_v51 }
 0xc8d   : > { %v2492_v3 = vmul.f32 %v2491_v52, %v2491_v52 }
 0xc8f   : > { %v2493_v55 = vsel %vm795_vm1, %v2492_v3, 0.0 }
 0xc90   : > { %2494 = vadd.xlane.f32.xlu0 %v2493_v55 }
 0xd1d   : > { %v2495_v57 = vpop.xlane.xlu0 %2494 }
 0xd1e   : > { %v2496_v58 = vmul.f32 0.03125, %v2495_v57 }
 0xd20   : > { %v2497_v59 = vadd.f32 1e-05, %v2496_v58 }
 0xd22   : > { %3104 = vrsqrt.f32 %v2497_v59 }
 0xd2c   : > { %v3105_v53 = vpop.eup %3104 }
 0xd2d   : > { %v2499_v35 = vmul.f32 %v3105_v53, %v2491_v52 }
 0xd2f   : > { %v2506_v61 = vmul.f32 %v2757_v54, %v2499_v35 }
 0xd31   : > { %v2513_v62 = vadd.f32 %v2758_v27, %v2506_v61 }
 0xd33   : > { %2514 = vst.msk [vmem:[%s750_s28] sm:$0xff] %vm795_vm1, %v2513_v62 }
 0xd34   : > { %3288 = shalt.err (!%p3285_p6)
}
 0xd35   : > { %s3289_s17 = scalar_lea.hbm %s4037_s1, 128  ;;  %s3293_s22 = scalar_lea.hbm %s4166_s27, 256 }
 0xd36   : > { %p3290_p7 = scmp.ne.s32.totalorder %s4037_s1, %s3289_s17  ;;  %p3294_p4 = scmp.lt.u32.totalorder %s4037_s1, %s4166_s27 }
 0xd37   : > { %p3295_p8 = scmp.lt.u32.totalorder %s3293_s22, %s3289_s17  ;;  %p3297_p1 = scmp.lt.u32.totalorder %s3289_s17, %s4037_s1 }
 0xd38   : > { %p3291_p9 = pnand %p3290_p7, %p4167_p10 }
 0xd39   : > { %p3296_p13 = por %p3295_p8, %p3294_p4 }
 0xd3a   : > { %p3292_p12 = pneg %p3291_p9 }
 0xd3b   : > { %p3298_p11 = por %p3297_p1, %p3296_p13 }
 0xd3d   : > { %p3299_p0 = pnand %p3298_p11, %p3292_p12 }
 0xd3f   : > { %3302 = shalt.err (!%p3299_p0)
}
 0xd40   : > { %2933 = dma.vmem_to_hbm [thread:$0]  (%p4167_p10), %s4039_s29, 128, %s4037_s1, %s2516_s26  }
 0xd41 PF: > { %s4168_s28 = sld [smem:[#allocation23_spill]]  ;;  %s4169_s6 = sld [smem:[#allocation19_spill]] }
 0xd42   : > { %s4170_s18 = sld [smem:[#allocation26_spill]] }
 0xd47   : > { %p2970_p2 = scmp.ge.s32.totalorder %s4168_s28, 2  ;;  %s2542_s23 = sand.u32 1, %s4169_s6  }
 0xd48   : > { %p4171_p3 = scmp.ne.s32.totalorder %s4170_s18, 0  ;;  %s2543_s4 = scalar_lea.sflag [#allocation4], %s2542_s23 }
 0xd4a   : > { %p2955_p5 = pnand %p2970_p2, %p4171_p3 }
 0xd4c   : > { %3344 = dma.done.wait (!%p2955_p5), %s2543_s4, 128  }
 0xd4d   : > { %3346 = vsyncadd (!%p2955_p5), %s2543_s4, 4294967168  ;;  %s37_s25 = sadd.s32 1, %s4168_s28   ;;  %s4172_s1 = sld [smem:[#allocation20_spill]] }
 0xd4e   : > { %p34_p6 = scmp.ge.s32.totalorder %s37_s25, 4   ;;  %s4173_s22 = sld [smem:[#allocation21_spill]] }
 0xd4f   : > { %s4174_s23 = sld [smem:[#allocation27_spill]]  ;;  %s4175_s24 = sld [smem:[#allocation22_spill]] }
 0xd50   : > { %s4176_s2 = sld [smem:[#allocation24_spill]]  ;;  %36 = sbr.rel (!%p34_p6) target bundleno = 20 (0x14), region = 166 }
 0xd57   :  { %2548 = vsyncpa [#allocation3], 1 }
 0xd58   :  { %2550 = vsyncpa [#allocation3 + $0x1], 1 }
 0xd59   :  { %2551 = vsyncpa [#allocation6], 1 }
 0xd5a   :  { %2552 = vsyncpa [#allocation9], 1 }
 0xd5b   :  { %2553 = vsyncpa [#allocation12], 1 }
 0xd5c   :  { %2554 = vsyncpa [#allocation4], 1 }
 0xd5d   :  { %2556 = vsyncpa [#allocation4 + $0x1], 1 }

</bundles_post_ra>
